<compile_context>
chip_gen: v5e
topology: v5e:2x2
jax: 0.10.0
libtpu: 0.0.40
codegen_flags: <defaults>
</compile_context>

<pallas_src>
import functools

import jax
import jax.numpy as jnp
from jax.experimental import pallas as pl
from jax.experimental.pallas import tpu as pltpu


LN_EPS = 1e-6


# ----------------------------------------------------------------------------
# In-kernel helpers (operate on values already resident in VMEM / vregs)
# ----------------------------------------------------------------------------
def _ln_normalize(x, eps=LN_EPS):
    # LayerNorm without affine (gamma/beta are folded into the downstream linear).
    mean = jnp.mean(x, axis=-1, keepdims=True)
    xc = x - mean
    var = jnp.mean(xc * xc, axis=-1, keepdims=True)
    return xc * jax.lax.rsqrt(var + eps)


def _erf(x):
    # Abramowitz & Stegun 7.1.26; reciprocal goes to the EUP slot.
    p = 0.3275911
    a1, a2, a3, a4, a5 = 0.254829592, -0.284496736, 1.421413741, -1.453152027, 1.061405429
    ax = jnp.abs(x)
    t = pl.reciprocal(1.0 + p * ax, approx=True)
    poly = (((((a5 * t + a4) * t) + a3) * t + a2) * t + a1) * t
    y = 1.0 - poly * jnp.exp(-ax * ax)
    return jnp.where(x < 0.0, -y, y)


def _gelu(x):
    # nn.GELU default (erf form)
    return 0.5 * x * (1.0 + _erf(x * 0.7071067811865476))


def _attention(qp, kp, vp, out_ref, *, bt, num_heads):
    """Multi-head attention, batched over the batch dim, per-head output written
    into `out_ref` (a (bt*Nq, C) VMEM scratch) at static lane offsets (no concat).

    qp: (bt*Nq, C) bf16 (attention scale already folded into the q projection)
    kp, vp: (bt*Nk, C) bf16
    """
    M, C = qp.shape
    nq = M // bt
    nk = kp.shape[0] // bt
    dh = C // num_heads
    q3 = qp.reshape(bt, nq, C)
    k3 = kp.reshape(bt, nk, C)
    v3 = vp.reshape(bt, nk, C)
    for h in range(num_heads):
        lo = h * dh
        s = jnp.einsum('bqd,bkd->bqk', q3[:, :, lo:lo + dh], k3[:, :, lo:lo + dh],
                       preferred_element_type=jnp.float32)           # (bt, nq, nk) f32
        s = s - jnp.max(s, axis=-1, keepdims=True)
        e = jnp.exp(s)
        inv = pl.reciprocal(jnp.sum(e, axis=-1, keepdims=True), approx=True)
        p = (e * inv).astype(jnp.bfloat16)
        o = jnp.einsum('bqk,bkd->bqd', p, v3[:, :, lo:lo + dh],
                       preferred_element_type=jnp.float32)           # (bt, nq, dh) f32
        out_ref[:, lo:lo + dh] = o.reshape(bt * nq, dh).astype(out_ref.dtype)


# ----------------------------------------------------------------------------
# Fused decoder kernel: grid = (batch_tiles, depth); one grid step == one block
# applied to a tile of batches. Residual stream stays in VMEM across depth.
# ----------------------------------------------------------------------------
def _decoder_kernel(
        q_ref, v_ref,
        qkv_w, qkv_b, sp_w, sp_b,
        cq_w, cq_b, ck_w, ck_b, cv_w, cv_b, cp_w, cp_b,
        f1_w, f1_b, f2_w, f2_b,
        o_ref,
        q_acc, vn_cache, attn_buf,
        *, num_heads, bt):
    d = pl.program_id(1)
    nq = q_ref.shape[1]
    nv = v_ref.shape[1]
    C = q_ref.shape[2]

    @pl.when(d == 0)
    def _():
        q_acc[...] = q_ref[...].reshape(bt * nq, C).astype(jnp.float32)
        v = v_ref[...].reshape(bt * nv, C).astype(jnp.float32)
        # LN(v) without affine is block-independent (affine folded into k/v proj) -> cache once.
        vn_cache[...] = _ln_normalize(v).astype(jnp.bfloat16)

    x = q_acc[...]                                            # (M, C) f32 residual stream

    # ---- self-attention: x = x + proj(MHSA(LN(x))) ----
    xn = _ln_normalize(x).astype(jnp.bfloat16)
    qkv = jnp.dot(xn, qkv_w[0], preferred_element_type=jnp.float32) + qkv_b[0]
    qkv = qkv.astype(jnp.bfloat16)                            # (M, 3C)
    _attention(qkv[:, 0:C], qkv[:, C:2 * C], qkv[:, 2 * C:3 * C], attn_buf,
               bt=bt, num_heads=num_heads)
    x = x + jnp.dot(attn_buf[...], sp_w[0], preferred_element_type=jnp.float32) + sp_b[0]

    # ---- cross-attention: x = x + proj(MHA(LN_q(x), LN_v(v))) ----
    xn = _ln_normalize(x).astype(jnp.bfloat16)
    vn = vn_cache[...]
    qp = (jnp.dot(xn, cq_w[0], preferred_element_type=jnp.float32) + cq_b[0]).astype(jnp.bfloat16)
    kp = (jnp.dot(vn, ck_w[0], preferred_element_type=jnp.float32) + ck_b[0]).astype(jnp.bfloat16)
    vp = (jnp.dot(vn, cv_w[0], preferred_element_type=jnp.float32) + cv_b[0]).astype(jnp.bfloat16)
    _attention(qp, kp, vp, attn_buf, bt=bt, num_heads=num_heads)
    x = x + jnp.dot(attn_buf[...], cp_w[0], preferred_element_type=jnp.float32) + cp_b[0]

    # ---- MLP: x = x + fc2(GELU(fc1(LN(x)))) ----
    xn = _ln_normalize(x).astype(jnp.bfloat16)
    h = jnp.dot(xn, f1_w[0], preferred_element_type=jnp.float32) + f1_b[0]
    h = _gelu(h).astype(jnp.bfloat16)
    x = x + jnp.dot(h, f2_w[0], preferred_element_type=jnp.float32) + f2_b[0]

    q_acc[...] = x

    @pl.when(d == pl.num_programs(1) - 1)
    def _():
        o_ref[...] = x.reshape(bt, nq, C).astype(o_ref.dtype)


# ----------------------------------------------------------------------------
# Parameter preprocessing: fold LN affine + attention scale into the linear
# layers, stack per-block params along a depth axis, cast weights to bf16.
# ----------------------------------------------------------------------------
_PARAM_NAMES = ("qkv_w", "qkv_b", "sp_w", "sp_b",
                "cq_w", "cq_b", "ck_w", "ck_b", "cv_w", "cv_b", "cp_w", "cp_b",
                "f1_w", "f1_b", "f2_w", "f2_b")


def _fold_and_stack(blocks, dim, num_heads):
    D = dim
    scale = (D // num_heads) ** -0.5

    def fold(g, b, w, bias):
        # (x_hat*g + b) @ W + bias == x_hat @ (diag(g) @ W) + (b @ W + bias)
        return g[:, None] * w, b @ w + bias

    stk = {k: [] for k in _PARAM_NAMES}
    for blk in blocks:
        sa, ca, mlp = blk["self_attn"], blk["cross_attn"], blk["mlp"]

        qkv_w, qkv_b = fold(blk["norm1_g"], blk["norm1_b"], sa["qkv_w"], sa["qkv_b"])
        qkv_w = qkv_w.at[:, :D].multiply(scale)      # fold attention scale into q columns
        qkv_b = qkv_b.at[:D].multiply(scale)

        cq_w, cq_b = fold(blk["normq_g"], blk["normq_b"], ca["q_w"], ca["q_b"])
        cq_w = cq_w * scale
        cq_b = cq_b * scale
        ck_w, ck_b = fold(blk["normv_g"], blk["normv_b"], ca["k_w"], ca["k_b"])
        cv_w, cv_b = fold(blk["normv_g"], blk["normv_b"], ca["v_w"], ca["v_b"])

        f1_w, f1_b = fold(blk["norm2_g"], blk["norm2_b"], mlp["fc1_w"], mlp["fc1_b"])

        vals = dict(qkv_w=qkv_w, qkv_b=qkv_b, sp_w=sa["proj_w"], sp_b=sa["proj_b"],
                    cq_w=cq_w, cq_b=cq_b, ck_w=ck_w, ck_b=ck_b, cv_w=cv_w, cv_b=cv_b,
                    cp_w=ca["proj_w"], cp_b=ca["proj_b"],
                    f1_w=f1_w, f1_b=f1_b, f2_w=mlp["fc2_w"], f2_b=mlp["fc2_b"])
        for k, v in vals.items():
            stk[k].append(v)

    out = {}
    for k, lst in stk.items():
        a = jnp.stack(lst, axis=0)                                  # (depth, ...)
        if k.endswith("_w"):
            out[k] = a.astype(jnp.bfloat16)                         # (depth, in, out) bf16
        else:
            out[k] = a.reshape(a.shape[0], 1, -1).astype(jnp.float32)  # (depth, 1, out) f32
    return out


# ----------------------------------------------------------------------------
# Public wrapper: whole TransformerDecoder forward as one pallas_call
# ----------------------------------------------------------------------------
def point_transformer_decoder_fwd(params, q, v, q_pos, v_pos, *, num_heads, k,
                                  batch_tile=None):
    # knn_point(self.k, ...) indices only feed the deform/graph branches, which do not
    # exist in the 'attn'/'attn' configuration, so the O(B*N^2) knn work is elided.
    del q_pos, v_pos, k
    B, Nq, C = q.shape
    Nv = v.shape[1]
    depth = len(params["blocks"])

    bt = B if batch_tile is None else batch_tile
    assert B % bt == 0, "batch must be divisible by batch_tile"

    w = _fold_and_stack(params["blocks"], C, num_heads)
    w_list = [w[n] for n in _PARAM_NAMES]
    w_specs = [pl.BlockSpec((1,) + a.shape[1:], lambda bi, d: (d, 0, 0)) for a in w_list]

    kernel = functools.partial(_decoder_kernel, num_heads=num_heads, bt=bt)

    return pl.pallas_call(
        kernel,
        out_shape=jax.ShapeDtypeStruct((B, Nq, C), q.dtype),
        grid=(B // bt, depth),
        in_specs=[pl.BlockSpec((bt, Nq, C), lambda bi, d: (bi, 0, 0)),
                  pl.BlockSpec((bt, Nv, C), lambda bi, d: (bi, 0, 0))] + w_specs,
        out_specs=pl.BlockSpec((bt, Nq, C), lambda bi, d: (bi, 0, 0)),
        scratch_shapes=[
            pltpu.VMEM((bt * Nq, C), jnp.float32),    # residual stream, carried across depth
            pltpu.VMEM((bt * Nv, C), jnp.bfloat16),   # cached LN-normalized v (affine folded)
            pltpu.VMEM((bt * Nq, C), jnp.bfloat16),   # lane-dense attention output staging
        ],
        compiler_params=pltpu.CompilerParams(
            dimension_semantics=("parallel", "arbitrary"),
            vmem_limit_bytes=48 * 1024 * 1024),
    )(q, v, *w_list)


# ----------------------------------------------------------------------------
# Deterministic parameter init (trunc_normal std=0.02 for Linear, LN = (1, 0))
# ----------------------------------------------------------------------------
def _trunc_normal(key, shape, std=0.02):
    return jax.random.truncated_normal(key, -2.0, 2.0, shape, jnp.float32) * std


def init_params(key, embed_dim, depth, mlp_ratio=4.0):
    D = embed_dim
    H = int(D * mlp_ratio)
    blocks = []
    for _ in range(depth):
        keys = jax.random.split(key, 10)
        key = keys[0]
        blk = {
            "norm1_g": jnp.ones((D,), jnp.float32), "norm1_b": jnp.zeros((D,), jnp.float32),
            "normq_g": jnp.ones((D,), jnp.float32), "normq_b": jnp.zeros((D,), jnp.float32),
            "normv_g": jnp.ones((D,), jnp.float32), "normv_b": jnp.zeros((D,), jnp.float32),
            "norm2_g": jnp.ones((D,), jnp.float32), "norm2_b": jnp.zeros((D,), jnp.float32),
            "self_attn": {
                "qkv_w": _trunc_normal(keys[1], (D, 3 * D)), "qkv_b": jnp.zeros((3 * D,), jnp.float32),
                "proj_w": _trunc_normal(keys[2], (D, D)), "proj_b": jnp.zeros((D,), jnp.float32),
            },
            "cross_attn": {
                "q_w": _trunc_normal(keys[3], (D, D)), "q_b": jnp.zeros((D,), jnp.float32),
                "k_w": _trunc_normal(keys[4], (D, D)), "k_b": jnp.zeros((D,), jnp.float32),
                "v_w": _trunc_normal(keys[5], (D, D)), "v_b": jnp.zeros((D,), jnp.float32),
                "proj_w": _trunc_normal(keys[6], (D, D)), "proj_b": jnp.zeros((D,), jnp.float32),
            },
            "mlp": {
                "fc1_w": _trunc_normal(keys[7], (D, H)), "fc1_b": jnp.zeros((H,), jnp.float32),
                "fc2_w": _trunc_normal(keys[8], (H, D)), "fc2_b": jnp.zeros((D,), jnp.float32),
            },
        }
        blocks.append(blk)
    return {"blocks": blocks}


# ----------------------------------------------------------------------------
# Pure-JAX f32 reference of the same forward (for a loose correctness check)
# ----------------------------------------------------------------------------
def _reference_fwd(params, q, v, num_heads):
    def ln(x, g, b):
        mean = x.mean(-1, keepdims=True)
        var = ((x - mean) ** 2).mean(-1, keepdims=True)
        return (x - mean) / jnp.sqrt(var + LN_EPS) * g + b

    def mha(qx, kx, vx, H):
        B, Nq, C = qx.shape
        Nk = kx.shape[1]
        dh = C // H
        qh = qx.reshape(B, Nq, H, dh).transpose(0, 2, 1, 3)
        kh = kx.reshape(B, Nk, H, dh).transpose(0, 2, 1, 3)
        vh = vx.reshape(B, Nk, H, dh).transpose(0, 2, 1, 3)
        s = jnp.einsum('bhqd,bhkd->bhqk', qh * dh ** -0.5, kh)
        p = jax.nn.softmax(s, axis=-1)
        o = jnp.einsum('bhqk,bhkd->bhqd', p, vh)
        return o.transpose(0, 2, 1, 3).reshape(B, Nq, C)

    C = q.shape[-1]
    for blk in params["blocks"]:
        sa, ca, mlp = blk["self_attn"], blk["cross_attn"], blk["mlp"]
        nq_ = ln(q, blk["norm1_g"], blk["norm1_b"])
        qkv = nq_ @ sa["qkv_w"] + sa["qkv_b"]
        attn = mha(qkv[..., :C], qkv[..., C:2 * C], qkv[..., 2 * C:], num_heads)
        q = q + attn @ sa["proj_w"] + sa["proj_b"]

        nq_ = ln(q, blk["normq_g"], blk["normq_b"])
        nv_ = ln(v, blk["normv_g"], blk["normv_b"])
        qp = nq_ @ ca["q_w"] + ca["q_b"]
        kp = nv_ @ ca["k_w"] + ca["k_b"]
        vp = nv_ @ ca["v_w"] + ca["v_b"]
        attn = mha(qp, kp, vp, num_heads)
        q = q + attn @ ca["proj_w"] + ca["proj_b"]

        nq_ = ln(q, blk["norm2_g"], blk["norm2_b"])
        h = jax.nn.gelu(nq_ @ mlp["fc1_w"] + mlp["fc1_b"], approximate=False)
        q = q + h @ mlp["fc2_w"] + mlp["fc2_b"]
    return q


# ----------------------------------------------------------------------------
if __name__ == "__main__":
    EMBED_DIM = 128
    DEPTH = 2
    NUM_HEADS = 4
    K = 8
    B, NQ, NV = 2, 16, 16

    root = jax.random.PRNGKey(0)
    kp, kq, kv, kqp, kvp = jax.random.split(root, 5)

    params = init_params(kp, EMBED_DIM, DEPTH)
    q = jax.random.normal(kq, (B, NQ, EMBED_DIM), jnp.float32)
    v = jax.random.normal(kv, (B, NV, EMBED_DIM), jnp.float32)
    q_pos = jax.random.normal(kqp, (B, NQ, 3), jnp.float32)
    v_pos = jax.random.normal(kvp, (B, NV, 3), jnp.float32)

    fwd = jax.jit(functools.partial(point_transformer_decoder_fwd,
                                    num_heads=NUM_HEADS, k=K))
    out = fwd(params, q, v, q_pos, v_pos)
    jax.block_until_ready(out)

    assert out.shape == (B, NQ, EMBED_DIM)
    assert bool(jnp.all(jnp.isfinite(out)))

    # Loose tolerance: bf16 matmul operands + approx reciprocal vs f32 reference.
    ref = _reference_fwd(params, q, v, NUM_HEADS)
    max_err = float(jnp.max(jnp.abs(out - ref)))
    assert max_err < 0.15, f"max abs error vs f32 reference too large: {max_err}"

    print("KERNEL_OK")
</pallas_src>

<mosaic_0001>
module attributes {stable_mosaic.version = 11 : i64} {
  func.func @_decoder_kernel(%arg0: i32, %arg1: i32, %arg2: memref<2x16x128xf32, #tpu.memory_space<vmem>>, %arg3: memref<2x16x128xf32, #tpu.memory_space<vmem>>, %arg4: memref<1x128x384xbf16, #tpu.memory_space<vmem>>, %arg5: memref<1x1x384xf32, #tpu.memory_space<vmem>>, %arg6: memref<1x128x128xbf16, #tpu.memory_space<vmem>>, %arg7: memref<1x1x128xf32, #tpu.memory_space<vmem>>, %arg8: memref<1x128x128xbf16, #tpu.memory_space<vmem>>, %arg9: memref<1x1x128xf32, #tpu.memory_space<vmem>>, %arg10: memref<1x128x128xbf16, #tpu.memory_space<vmem>>, %arg11: memref<1x1x128xf32, #tpu.memory_space<vmem>>, %arg12: memref<1x128x128xbf16, #tpu.memory_space<vmem>>, %arg13: memref<1x1x128xf32, #tpu.memory_space<vmem>>, %arg14: memref<1x128x128xbf16, #tpu.memory_space<vmem>>, %arg15: memref<1x1x128xf32, #tpu.memory_space<vmem>>, %arg16: memref<1x128x512xbf16, #tpu.memory_space<vmem>>, %arg17: memref<1x1x512xf32, #tpu.memory_space<vmem>>, %arg18: memref<1x512x128xbf16, #tpu.memory_space<vmem>>, %arg19: memref<1x1x128xf32, #tpu.memory_space<vmem>>, %arg20: memref<2x16x128xf32, #tpu.memory_space<vmem>>, %arg21: memref<32x128xf32, #tpu.memory_space<vmem>>, %arg22: memref<32x128xbf16, #tpu.memory_space<vmem>>, %arg23: memref<32x128xbf16, #tpu.memory_space<vmem>>) attributes {dimension_semantics = [#tpu.dimension_semantics<parallel>, #tpu.dimension_semantics<arbitrary>], iteration_bounds = array<i64: 1, 2>, scalar_prefetch = 0 : i64, scratch_operands = 3 : i64, tpu.core_type = #tpu.core_type<tc>, window_params = [{transform_indices = @transform_0, window_bounds = array<i64: 2, 16, 128>}, {transform_indices = @transform_1, window_bounds = array<i64: 2, 16, 128>}, {transform_indices = @transform_2, window_bounds = array<i64: 1, 128, 384>}, {transform_indices = @transform_3, window_bounds = array<i64: 1, 1, 384>}, {transform_indices = @transform_4, window_bounds = array<i64: 1, 128, 128>}, {transform_indices = @transform_5, window_bounds = array<i64: 1, 1, 128>}, {transform_indices = @transform_6, window_bounds = array<i64: 1, 128, 128>}, {transform_indices = @transform_7, window_bounds = array<i64: 1, 1, 128>}, {transform_indices = @transform_8, window_bounds = array<i64: 1, 128, 128>}, {transform_indices = @transform_9, window_bounds = array<i64: 1, 1, 128>}, {transform_indices = @transform_10, window_bounds = array<i64: 1, 128, 128>}, {transform_indices = @transform_11, window_bounds = array<i64: 1, 1, 128>}, {transform_indices = @transform_12, window_bounds = array<i64: 1, 128, 128>}, {transform_indices = @transform_13, window_bounds = array<i64: 1, 1, 128>}, {transform_indices = @transform_14, window_bounds = array<i64: 1, 128, 512>}, {transform_indices = @transform_15, window_bounds = array<i64: 1, 1, 512>}, {transform_indices = @transform_16, window_bounds = array<i64: 1, 512, 128>}, {transform_indices = @transform_17, window_bounds = array<i64: 1, 1, 128>}, {transform_indices = @transform_18, window_bounds = array<i64: 2, 16, 128>}]} {
    %c0_i32 = arith.constant 0 : i32
    %0 = arith.cmpi eq, %arg1, %c0_i32 : i32
    %1 = arith.extui %0 : i1 to i32
    %c0_i32_0 = arith.constant 0 : i32
    %2 = arith.cmpi ne, %1, %c0_i32_0 : i32
    scf.if %2 {
      %c0_140 = arith.constant 0 : index
      %c0_141 = arith.constant 0 : index
      %c0_142 = arith.constant 0 : index
      %326 = vector.load %arg2[%c0_140, %c0_141, %c0_142] : memref<2x16x128xf32, #tpu.memory_space<vmem>>, vector<2x16x128xf32>
      %327 = vector.shape_cast %326 : vector<2x16x128xf32> to vector<32x128xf32>
      %c0_143 = arith.constant 0 : index
      %c0_144 = arith.constant 0 : index
      %328 = vector.load %arg21[%c0_143, %c0_144] : memref<32x128xf32, #tpu.memory_space<vmem>>, vector<32x128xf32>
      tpu.vector_store %arg21[%c0_143, %c0_144], %327 {strides = array<i32>} : memref<32x128xf32, #tpu.memory_space<vmem>>, vector<32x128xf32>,
      %c0_145 = arith.constant 0 : index
      %c0_146 = arith.constant 0 : index
      %c0_147 = arith.constant 0 : index
      %329 = vector.load %arg3[%c0_145, %c0_146, %c0_147] : memref<2x16x128xf32, #tpu.memory_space<vmem>>, vector<2x16x128xf32>
      %330 = vector.shape_cast %329 : vector<2x16x128xf32> to vector<32x128xf32>
      %cst_148 = arith.constant dense<0.000000e+00> : vector<32xf32>
      %331 = vector.multi_reduction <add>, %330, %cst_148 [1] : vector<32x128xf32> to vector<32xf32>
      %332 = vector.shape_cast %331 : vector<32xf32> to vector<32x1xf32>
      %cst_149 = arith.constant 1.280000e+02 : f32
      %333 = vector.broadcast %cst_149 : f32 to vector<32x1xf32>
      %334 = arith.divf %332, %333 : vector<32x1xf32>
      %335 = vector.broadcast %334 : vector<32x1xf32> to vector<32x128xf32>
      %336 = arith.subf %330, %335 : vector<32x128xf32>
      %337 = arith.mulf %336, %336 : vector<32x128xf32>
      %cst_150 = arith.constant dense<0.000000e+00> : vector<32xf32>
      %338 = vector.multi_reduction <add>, %337, %cst_150 [1] : vector<32x128xf32> to vector<32xf32>
      %339 = vector.shape_cast %338 : vector<32xf32> to vector<32x1xf32>
      %cst_151 = arith.constant 1.280000e+02 : f32
      %340 = vector.broadcast %cst_151 : f32 to vector<32x1xf32>
      %341 = arith.divf %339, %340 : vector<32x1xf32>
      %cst_152 = arith.constant 9.99999997E-7 : f32
      %342 = vector.broadcast %cst_152 : f32 to vector<32x1xf32>
      %343 = arith.addf %341, %342 : vector<32x1xf32>
      %344 = math.rsqrt %343 : vector<32x1xf32>
      %345 = vector.broadcast %344 : vector<32x1xf32> to vector<32x128xf32>
      %346 = arith.mulf %336, %345 : vector<32x128xf32>
      %347 = arith.truncf %346 : vector<32x128xf32> to vector<32x128xbf16>
      %c0_153 = arith.constant 0 : index
      %c0_154 = arith.constant 0 : index
      %348 = vector.load %arg22[%c0_153, %c0_154] : memref<32x128xbf16, #tpu.memory_space<vmem>>, vector<32x128xbf16>
      tpu.vector_store %arg22[%c0_153, %c0_154], %347 {strides = array<i32>} : memref<32x128xbf16, #tpu.memory_space<vmem>>, vector<32x128xbf16>,
    } else {
    }
    %c0 = arith.constant 0 : index
    %c0_1 = arith.constant 0 : index
    %3 = vector.load %arg21[%c0, %c0_1] : memref<32x128xf32, #tpu.memory_space<vmem>>, vector<32x128xf32>
    %cst = arith.constant dense<0.000000e+00> : vector<32xf32>
    %4 = vector.multi_reduction <add>, %3, %cst [1] : vector<32x128xf32> to vector<32xf32>
    %5 = vector.shape_cast %4 : vector<32xf32> to vector<32x1xf32>
    %cst_2 = arith.constant 1.280000e+02 : f32
    %6 = vector.broadcast %cst_2 : f32 to vector<32x1xf32>
    %7 = arith.divf %5, %6 : vector<32x1xf32>
    %8 = vector.broadcast %7 : vector<32x1xf32> to vector<32x128xf32>
    %9 = arith.subf %3, %8 : vector<32x128xf32>
    %10 = arith.mulf %9, %9 : vector<32x128xf32>
    %cst_3 = arith.constant dense<0.000000e+00> : vector<32xf32>
    %11 = vector.multi_reduction <add>, %10, %cst_3 [1] : vector<32x128xf32> to vector<32xf32>
    %12 = vector.shape_cast %11 : vector<32xf32> to vector<32x1xf32>
    %cst_4 = arith.constant 1.280000e+02 : f32
    %13 = vector.broadcast %cst_4 : f32 to vector<32x1xf32>
    %14 = arith.divf %12, %13 : vector<32x1xf32>
    %cst_5 = arith.constant 9.99999997E-7 : f32
    %15 = vector.broadcast %cst_5 : f32 to vector<32x1xf32>
    %16 = arith.addf %14, %15 : vector<32x1xf32>
    %17 = math.rsqrt %16 : vector<32x1xf32>
    %18 = vector.broadcast %17 : vector<32x1xf32> to vector<32x128xf32>
    %19 = arith.mulf %9, %18 : vector<32x128xf32>
    %20 = arith.truncf %19 : vector<32x128xf32> to vector<32x128xbf16>
    %c0_6 = arith.constant 0 : index
    %c0_7 = arith.constant 0 : index
    %c0_8 = arith.constant 0 : index
    %21 = vector.load %arg4[%c0_6, %c0_7, %c0_8] : memref<1x128x384xbf16, #tpu.memory_space<vmem>>, vector<1x128x384xbf16>
    %22 = vector.shape_cast %21 : vector<1x128x384xbf16> to vector<128x384xbf16>
    %cst_9 = arith.constant dense<0.000000e+00> : vector<32x384xf32>
    %23 = tpu.matmul %20, %22, %cst_9 {dimension_numbers = #tpu.dot_dimension_numbers<[1], [0], [0], [1], [0, 0, 1, 1], [], []>} : vector<32x128xbf16>, vector<128x384xbf16>, vector<32x384xf32> -> vector<32x384xf32>
    %c0_10 = arith.constant 0 : index
    %c0_11 = arith.constant 0 : index
    %c0_12 = arith.constant 0 : index
    %24 = vector.load %arg5[%c0_10, %c0_11, %c0_12] : memref<1x1x384xf32, #tpu.memory_space<vmem>>, vector<1x1x384xf32>
    %25 = vector.shape_cast %24 : vector<1x1x384xf32> to vector<1x384xf32>
    %26 = vector.broadcast %25 : vector<1x384xf32> to vector<32x384xf32>
    %27 = arith.addf %23, %26 : vector<32x384xf32>
    %28 = arith.truncf %27 : vector<32x384xf32> to vector<32x384xbf16>
    %29 = vector.extract_strided_slice %28 {offsets = [0, 0], sizes = [32, 128], strides = [1, 1]} : vector<32x384xbf16> to vector<32x128xbf16>
    %30 = vector.extract_strided_slice %28 {offsets = [0, 128], sizes = [32, 128], strides = [1, 1]} : vector<32x384xbf16> to vector<32x128xbf16>
    %31 = vector.extract_strided_slice %28 {offsets = [0, 256], sizes = [32, 128], strides = [1, 1]} : vector<32x384xbf16> to vector<32x128xbf16>
    %32 = vector.shape_cast %29 : vector<32x128xbf16> to vector<2x16x128xbf16>
    %33 = vector.shape_cast %30 : vector<32x128xbf16> to vector<2x16x128xbf16>
    %34 = vector.shape_cast %31 : vector<32x128xbf16> to vector<2x16x128xbf16>
    %35 = vector.extract_strided_slice %32 {offsets = [0, 0, 0], sizes = [2, 16, 32], strides = [1, 1, 1]} : vector<2x16x128xbf16> to vector<2x16x32xbf16>
    %36 = vector.extract_strided_slice %33 {offsets = [0, 0, 0], sizes = [2, 16, 32], strides = [1, 1, 1]} : vector<2x16x128xbf16> to vector<2x16x32xbf16>
    "tpu.trace_start"() <{level = 10 : i32, message = "bqd,bkd->bqk"}> : () -> ()
    %cst_13 = arith.constant dense<0.000000e+00> : vector<2x16x16xf32>
    %37 = tpu.matmul %35, %36, %cst_13 {dimension_numbers = #tpu.dot_dimension_numbers<[2], [2], [1], [1], [0, 0, 0, 1, 1, 1], [0], [0]>} : vector<2x16x32xbf16>, vector<2x16x32xbf16>, vector<2x16x16xf32> -> vector<2x16x16xf32>
    "tpu.trace_stop"() : () -> ()
    %cst_14 = arith.constant dense<0xFF800000> : vector<2x16xf32>
    %38 = vector.multi_reduction <maximumf>, %37, %cst_14 [2] : vector<2x16x16xf32> to vector<2x16xf32>
    %39 = vector.shape_cast %38 : vector<2x16xf32> to vector<2x16x1xf32>
    %40 = vector.broadcast %39 : vector<2x16x1xf32> to vector<2x16x16xf32>
    %41 = arith.subf %37, %40 : vector<2x16x16xf32>
    %42 = math.exp %41 : vector<2x16x16xf32>
    %cst_15 = arith.constant dense<0.000000e+00> : vector<2x16xf32>
    %43 = vector.multi_reduction <add>, %42, %cst_15 [2] : vector<2x16x16xf32> to vector<2x16xf32>
    %44 = vector.shape_cast %43 : vector<2x16xf32> to vector<2x16x1xf32>
    %45 = tpu.reciprocal %44 {approx = true} : vector<2x16x1xf32> -> vector<2x16x1xf32>
    %46 = vector.broadcast %45 : vector<2x16x1xf32> to vector<2x16x16xf32>
    %47 = arith.mulf %42, %46 : vector<2x16x16xf32>
    %48 = arith.truncf %47 : vector<2x16x16xf32> to vector<2x16x16xbf16>
    %49 = vector.extract_strided_slice %34 {offsets = [0, 0, 0], sizes = [2, 16, 32], strides = [1, 1, 1]} : vector<2x16x128xbf16> to vector<2x16x32xbf16>
    "tpu.trace_start"() <{level = 10 : i32, message = "bqk,bkd->bqd"}> : () -> ()
    %cst_16 = arith.constant dense<0.000000e+00> : vector<2x16x32xf32>
    %50 = tpu.matmul %48, %49, %cst_16 {dimension_numbers = #tpu.dot_dimension_numbers<[2], [1], [1], [2], [0, 0, 0, 1, 1, 2], [0], [0]>} : vector<2x16x16xbf16>, vector<2x16x32xbf16>, vector<2x16x32xf32> -> vector<2x16x32xf32>
    "tpu.trace_stop"() : () -> ()
    %51 = vector.shape_cast %50 : vector<2x16x32xf32> to vector<32x32xf32>
    %52 = arith.truncf %51 : vector<32x32xf32> to vector<32x32xbf16>
    %c0_17 = arith.constant 0 : index
    %c0_18 = arith.constant 0 : index
    %53 = vector.load %arg23[%c0_17, %c0_18] : memref<32x128xbf16, #tpu.memory_space<vmem>>, vector<32x32xbf16>
    tpu.vector_store %arg23[%c0_17, %c0_18], %52 {strides = array<i32>} : memref<32x128xbf16, #tpu.memory_space<vmem>>, vector<32x32xbf16>,
    %54 = vector.extract_strided_slice %32 {offsets = [0, 0, 32], sizes = [2, 16, 32], strides = [1, 1, 1]} : vector<2x16x128xbf16> to vector<2x16x32xbf16>
    %55 = vector.extract_strided_slice %33 {offsets = [0, 0, 32], sizes = [2, 16, 32], strides = [1, 1, 1]} : vector<2x16x128xbf16> to vector<2x16x32xbf16>
    "tpu.trace_start"() <{level = 10 : i32, message = "bqd,bkd->bqk"}> : () -> ()
    %cst_19 = arith.constant dense<0.000000e+00> : vector<2x16x16xf32>
    %56 = tpu.matmul %54, %55, %cst_19 {dimension_numbers = #tpu.dot_dimension_numbers<[2], [2], [1], [1], [0, 0, 0, 1, 1, 1], [0], [0]>} : vector<2x16x32xbf16>, vector<2x16x32xbf16>, vector<2x16x16xf32> -> vector<2x16x16xf32>
    "tpu.trace_stop"() : () -> ()
    %cst_20 = arith.constant dense<0xFF800000> : vector<2x16xf32>
    %57 = vector.multi_reduction <maximumf>, %56, %cst_20 [2] : vector<2x16x16xf32> to vector<2x16xf32>
    %58 = vector.shape_cast %57 : vector<2x16xf32> to vector<2x16x1xf32>
    %59 = vector.broadcast %58 : vector<2x16x1xf32> to vector<2x16x16xf32>
    %60 = arith.subf %56, %59 : vector<2x16x16xf32>
    %61 = math.exp %60 : vector<2x16x16xf32>
    %cst_21 = arith.constant dense<0.000000e+00> : vector<2x16xf32>
    %62 = vector.multi_reduction <add>, %61, %cst_21 [2] : vector<2x16x16xf32> to vector<2x16xf32>
    %63 = vector.shape_cast %62 : vector<2x16xf32> to vector<2x16x1xf32>
    %64 = tpu.reciprocal %63 {approx = true} : vector<2x16x1xf32> -> vector<2x16x1xf32>
    %65 = vector.broadcast %64 : vector<2x16x1xf32> to vector<2x16x16xf32>
    %66 = arith.mulf %61, %65 : vector<2x16x16xf32>
    %67 = arith.truncf %66 : vector<2x16x16xf32> to vector<2x16x16xbf16>
    %68 = vector.extract_strided_slice %34 {offsets = [0, 0, 32], sizes = [2, 16, 32], strides = [1, 1, 1]} : vector<2x16x128xbf16> to vector<2x16x32xbf16>
    "tpu.trace_start"() <{level = 10 : i32, message = "bqk,bkd->bqd"}> : () -> ()
    %cst_22 = arith.constant dense<0.000000e+00> : vector<2x16x32xf32>
    %69 = tpu.matmul %67, %68, %cst_22 {dimension_numbers = #tpu.dot_dimension_numbers<[2], [1], [1], [2], [0, 0, 0, 1, 1, 2], [0], [0]>} : vector<2x16x16xbf16>, vector<2x16x32xbf16>, vector<2x16x32xf32> -> vector<2x16x32xf32>
    "tpu.trace_stop"() : () -> ()
    %70 = vector.shape_cast %69 : vector<2x16x32xf32> to vector<32x32xf32>
    %71 = arith.truncf %70 : vector<32x32xf32> to vector<32x32xbf16>
    %c0_23 = arith.constant 0 : index
    %c32 = arith.constant 32 : index
    %72 = vector.load %arg23[%c0_23, %c32] : memref<32x128xbf16, #tpu.memory_space<vmem>>, vector<32x32xbf16>
    tpu.vector_store %arg23[%c0_23, %c32], %71 {strides = array<i32>} : memref<32x128xbf16, #tpu.memory_space<vmem>>, vector<32x32xbf16>,
    %73 = vector.extract_strided_slice %32 {offsets = [0, 0, 64], sizes = [2, 16, 32], strides = [1, 1, 1]} : vector<2x16x128xbf16> to vector<2x16x32xbf16>
    %74 = vector.extract_strided_slice %33 {offsets = [0, 0, 64], sizes = [2, 16, 32], strides = [1, 1, 1]} : vector<2x16x128xbf16> to vector<2x16x32xbf16>
    "tpu.trace_start"() <{level = 10 : i32, message = "bqd,bkd->bqk"}> : () -> ()
    %cst_24 = arith.constant dense<0.000000e+00> : vector<2x16x16xf32>
    %75 = tpu.matmul %73, %74, %cst_24 {dimension_numbers = #tpu.dot_dimension_numbers<[2], [2], [1], [1], [0, 0, 0, 1, 1, 1], [0], [0]>} : vector<2x16x32xbf16>, vector<2x16x32xbf16>, vector<2x16x16xf32> -> vector<2x16x16xf32>
    "tpu.trace_stop"() : () -> ()
    %cst_25 = arith.constant dense<0xFF800000> : vector<2x16xf32>
    %76 = vector.multi_reduction <maximumf>, %75, %cst_25 [2] : vector<2x16x16xf32> to vector<2x16xf32>
    %77 = vector.shape_cast %76 : vector<2x16xf32> to vector<2x16x1xf32>
    %78 = vector.broadcast %77 : vector<2x16x1xf32> to vector<2x16x16xf32>
    %79 = arith.subf %75, %78 : vector<2x16x16xf32>
    %80 = math.exp %79 : vector<2x16x16xf32>
    %cst_26 = arith.constant dense<0.000000e+00> : vector<2x16xf32>
    %81 = vector.multi_reduction <add>, %80, %cst_26 [2] : vector<2x16x16xf32> to vector<2x16xf32>
    %82 = vector.shape_cast %81 : vector<2x16xf32> to vector<2x16x1xf32>
    %83 = tpu.reciprocal %82 {approx = true} : vector<2x16x1xf32> -> vector<2x16x1xf32>
    %84 = vector.broadcast %83 : vector<2x16x1xf32> to vector<2x16x16xf32>
    %85 = arith.mulf %80, %84 : vector<2x16x16xf32>
    %86 = arith.truncf %85 : vector<2x16x16xf32> to vector<2x16x16xbf16>
    %87 = vector.extract_strided_slice %34 {offsets = [0, 0, 64], sizes = [2, 16, 32], strides = [1, 1, 1]} : vector<2x16x128xbf16> to vector<2x16x32xbf16>
    "tpu.trace_start"() <{level = 10 : i32, message = "bqk,bkd->bqd"}> : () -> ()
    %cst_27 = arith.constant dense<0.000000e+00> : vector<2x16x32xf32>
    %88 = tpu.matmul %86, %87, %cst_27 {dimension_numbers = #tpu.dot_dimension_numbers<[2], [1], [1], [2], [0, 0, 0, 1, 1, 2], [0], [0]>} : vector<2x16x16xbf16>, vector<2x16x32xbf16>, vector<2x16x32xf32> -> vector<2x16x32xf32>
    "tpu.trace_stop"() : () -> ()
    %89 = vector.shape_cast %88 : vector<2x16x32xf32> to vector<32x32xf32>
    %90 = arith.truncf %89 : vector<32x32xf32> to vector<32x32xbf16>
    %c0_28 = arith.constant 0 : index
    %c64 = arith.constant 64 : index
    %91 = vector.load %arg23[%c0_28, %c64] : memref<32x128xbf16, #tpu.memory_space<vmem>>, vector<32x32xbf16>
    tpu.vector_store %arg23[%c0_28, %c64], %90 {strides = array<i32>} : memref<32x128xbf16, #tpu.memory_space<vmem>>, vector<32x32xbf16>,
    %92 = vector.extract_strided_slice %32 {offsets = [0, 0, 96], sizes = [2, 16, 32], strides = [1, 1, 1]} : vector<2x16x128xbf16> to vector<2x16x32xbf16>
    %93 = vector.extract_strided_slice %33 {offsets = [0, 0, 96], sizes = [2, 16, 32], strides = [1, 1, 1]} : vector<2x16x128xbf16> to vector<2x16x32xbf16>
    "tpu.trace_start"() <{level = 10 : i32, message = "bqd,bkd->bqk"}> : () -> ()
    %cst_29 = arith.constant dense<0.000000e+00> : vector<2x16x16xf32>
    %94 = tpu.matmul %92, %93, %cst_29 {dimension_numbers = #tpu.dot_dimension_numbers<[2], [2], [1], [1], [0, 0, 0, 1, 1, 1], [0], [0]>} : vector<2x16x32xbf16>, vector<2x16x32xbf16>, vector<2x16x16xf32> -> vector<2x16x16xf32>
    "tpu.trace_stop"() : () -> ()
    %cst_30 = arith.constant dense<0xFF800000> : vector<2x16xf32>
    %95 = vector.multi_reduction <maximumf>, %94, %cst_30 [2] : vector<2x16x16xf32> to vector<2x16xf32>
    %96 = vector.shape_cast %95 : vector<2x16xf32> to vector<2x16x1xf32>
    %97 = vector.broadcast %96 : vector<2x16x1xf32> to vector<2x16x16xf32>
    %98 = arith.subf %94, %97 : vector<2x16x16xf32>
    %99 = math.exp %98 : vector<2x16x16xf32>
    %cst_31 = arith.constant dense<0.000000e+00> : vector<2x16xf32>
    %100 = vector.multi_reduction <add>, %99, %cst_31 [2] : vector<2x16x16xf32> to vector<2x16xf32>
    %101 = vector.shape_cast %100 : vector<2x16xf32> to vector<2x16x1xf32>
    %102 = tpu.reciprocal %101 {approx = true} : vector<2x16x1xf32> -> vector<2x16x1xf32>
    %103 = vector.broadcast %102 : vector<2x16x1xf32> to vector<2x16x16xf32>
    %104 = arith.mulf %99, %103 : vector<2x16x16xf32>
    %105 = arith.truncf %104 : vector<2x16x16xf32> to vector<2x16x16xbf16>
    %106 = vector.extract_strided_slice %34 {offsets = [0, 0, 96], sizes = [2, 16, 32], strides = [1, 1, 1]} : vector<2x16x128xbf16> to vector<2x16x32xbf16>
    "tpu.trace_start"() <{level = 10 : i32, message = "bqk,bkd->bqd"}> : () -> ()
    %cst_32 = arith.constant dense<0.000000e+00> : vector<2x16x32xf32>
    %107 = tpu.matmul %105, %106, %cst_32 {dimension_numbers = #tpu.dot_dimension_numbers<[2], [1], [1], [2], [0, 0, 0, 1, 1, 2], [0], [0]>} : vector<2x16x16xbf16>, vector<2x16x32xbf16>, vector<2x16x32xf32> -> vector<2x16x32xf32>
    "tpu.trace_stop"() : () -> ()
    %108 = vector.shape_cast %107 : vector<2x16x32xf32> to vector<32x32xf32>
    %109 = arith.truncf %108 : vector<32x32xf32> to vector<32x32xbf16>
    %c0_33 = arith.constant 0 : index
    %c96 = arith.constant 96 : index
    %110 = vector.load %arg23[%c0_33, %c96] : memref<32x128xbf16, #tpu.memory_space<vmem>>, vector<32x32xbf16>
    tpu.vector_store %arg23[%c0_33, %c96], %109 {strides = array<i32>} : memref<32x128xbf16, #tpu.memory_space<vmem>>, vector<32x32xbf16>,
    %c0_34 = arith.constant 0 : index
    %c0_35 = arith.constant 0 : index
    %111 = vector.load %arg23[%c0_34, %c0_35] : memref<32x128xbf16, #tpu.memory_space<vmem>>, vector<32x128xbf16>
    %c0_36 = arith.constant 0 : index
    %c0_37 = arith.constant 0 : index
    %c0_38 = arith.constant 0 : index
    %112 = vector.load %arg6[%c0_36, %c0_37, %c0_38] : memref<1x128x128xbf16, #tpu.memory_space<vmem>>, vector<1x128x128xbf16>
    %113 = vector.shape_cast %112 : vector<1x128x128xbf16> to vector<128x128xbf16>
    %cst_39 = arith.constant dense<0.000000e+00> : vector<32x128xf32>
    %114 = tpu.matmul %111, %113, %cst_39 {dimension_numbers = #tpu.dot_dimension_numbers<[1], [0], [0], [1], [0, 0, 1, 1], [], []>} : vector<32x128xbf16>, vector<128x128xbf16>, vector<32x128xf32> -> vector<32x128xf32>
    %115 = arith.addf %3, %114 : vector<32x128xf32>
    %c0_40 = arith.constant 0 : index
    %c0_41 = arith.constant 0 : index
    %c0_42 = arith.constant 0 : index
    %116 = vector.load %arg7[%c0_40, %c0_41, %c0_42] : memref<1x1x128xf32, #tpu.memory_space<vmem>>, vector<1x1x128xf32>
    %117 = vector.shape_cast %116 : vector<1x1x128xf32> to vector<1x128xf32>
    %118 = vector.broadcast %117 : vector<1x128xf32> to vector<32x128xf32>
    %119 = arith.addf %115, %118 : vector<32x128xf32>
    %cst_43 = arith.constant dense<0.000000e+00> : vector<32xf32>
    %120 = vector.multi_reduction <add>, %119, %cst_43 [1] : vector<32x128xf32> to vector<32xf32>
    %121 = vector.shape_cast %120 : vector<32xf32> to vector<32x1xf32>
    %cst_44 = arith.constant 1.280000e+02 : f32
    %122 = vector.broadcast %cst_44 : f32 to vector<32x1xf32>
    %123 = arith.divf %121, %122 : vector<32x1xf32>
    %124 = vector.broadcast %123 : vector<32x1xf32> to vector<32x128xf32>
    %125 = arith.subf %119, %124 : vector<32x128xf32>
    %126 = arith.mulf %125, %125 : vector<32x128xf32>
    %cst_45 = arith.constant dense<0.000000e+00> : vector<32xf32>
    %127 = vector.multi_reduction <add>, %126, %cst_45 [1] : vector<32x128xf32> to vector<32xf32>
    %128 = vector.shape_cast %127 : vector<32xf32> to vector<32x1xf32>
    %cst_46 = arith.constant 1.280000e+02 : f32
    %129 = vector.broadcast %cst_46 : f32 to vector<32x1xf32>
    %130 = arith.divf %128, %129 : vector<32x1xf32>
    %cst_47 = arith.constant 9.99999997E-7 : f32
    %131 = vector.broadcast %cst_47 : f32 to vector<32x1xf32>
    %132 = arith.addf %130, %131 : vector<32x1xf32>
    %133 = math.rsqrt %132 : vector<32x1xf32>
    %134 = vector.broadcast %133 : vector<32x1xf32> to vector<32x128xf32>
    %135 = arith.mulf %125, %134 : vector<32x128xf32>
    %136 = arith.truncf %135 : vector<32x128xf32> to vector<32x128xbf16>
    %c0_48 = arith.constant 0 : index
    %c0_49 = arith.constant 0 : index
    %137 = vector.load %arg22[%c0_48, %c0_49] : memref<32x128xbf16, #tpu.memory_space<vmem>>, vector<32x128xbf16>
    %c0_50 = arith.constant 0 : index
    %c0_51 = arith.constant 0 : index
    %c0_52 = arith.constant 0 : index
    %138 = vector.load %arg8[%c0_50, %c0_51, %c0_52] : memref<1x128x128xbf16, #tpu.memory_space<vmem>>, vector<1x128x128xbf16>
    %139 = vector.shape_cast %138 : vector<1x128x128xbf16> to vector<128x128xbf16>
    %cst_53 = arith.constant dense<0.000000e+00> : vector<32x128xf32>
    %140 = tpu.matmul %136, %139, %cst_53 {dimension_numbers = #tpu.dot_dimension_numbers<[1], [0], [0], [1], [0, 0, 1, 1], [], []>} : vector<32x128xbf16>, vector<128x128xbf16>, vector<32x128xf32> -> vector<32x128xf32>
    %c0_54 = arith.constant 0 : index
    %c0_55 = arith.constant 0 : index
    %c0_56 = arith.constant 0 : index
    %141 = vector.load %arg9[%c0_54, %c0_55, %c0_56] : memref<1x1x128xf32, #tpu.memory_space<vmem>>, vector<1x1x128xf32>
    %142 = vector.shape_cast %141 : vector<1x1x128xf32> to vector<1x128xf32>
    %143 = vector.broadcast %142 : vector<1x128xf32> to vector<32x128xf32>
    %144 = arith.addf %140, %143 : vector<32x128xf32>
    %145 = arith.truncf %144 : vector<32x128xf32> to vector<32x128xbf16>
    %c0_57 = arith.constant 0 : index
    %c0_58 = arith.constant 0 : index
    %c0_59 = arith.constant 0 : index
    %146 = vector.load %arg10[%c0_57, %c0_58, %c0_59] : memref<1x128x128xbf16, #tpu.memory_space<vmem>>, vector<1x128x128xbf16>
    %147 = vector.shape_cast %146 : vector<1x128x128xbf16> to vector<128x128xbf16>
    %cst_60 = arith.constant dense<0.000000e+00> : vector<32x128xf32>
    %148 = tpu.matmul %137, %147, %cst_60 {dimension_numbers = #tpu.dot_dimension_numbers<[1], [0], [0], [1], [0, 0, 1, 1], [], []>} : vector<32x128xbf16>, vector<128x128xbf16>, vector<32x128xf32> -> vector<32x128xf32>
    %c0_61 = arith.constant 0 : index
    %c0_62 = arith.constant 0 : index
    %c0_63 = arith.constant 0 : index
    %149 = vector.load %arg11[%c0_61, %c0_62, %c0_63] : memref<1x1x128xf32, #tpu.memory_space<vmem>>, vector<1x1x128xf32>
    %150 = vector.shape_cast %149 : vector<1x1x128xf32> to vector<1x128xf32>
    %151 = vector.broadcast %150 : vector<1x128xf32> to vector<32x128xf32>
    %152 = arith.addf %148, %151 : vector<32x128xf32>
    %153 = arith.truncf %152 : vector<32x128xf32> to vector<32x128xbf16>
    %c0_64 = arith.constant 0 : index
    %c0_65 = arith.constant 0 : index
    %c0_66 = arith.constant 0 : index
    %154 = vector.load %arg12[%c0_64, %c0_65, %c0_66] : memref<1x128x128xbf16, #tpu.memory_space<vmem>>, vector<1x128x128xbf16>
    %155 = vector.shape_cast %154 : vector<1x128x128xbf16> to vector<128x128xbf16>
    %cst_67 = arith.constant dense<0.000000e+00> : vector<32x128xf32>
    %156 = tpu.matmul %137, %155, %cst_67 {dimension_numbers = #tpu.dot_dimension_numbers<[1], [0], [0], [1], [0, 0, 1, 1], [], []>} : vector<32x128xbf16>, vector<128x128xbf16>, vector<32x128xf32> -> vector<32x128xf32>
    %c0_68 = arith.constant 0 : index
    %c0_69 = arith.constant 0 : index
    %c0_70 = arith.constant 0 : index
    %157 = vector.load %arg13[%c0_68, %c0_69, %c0_70] : memref<1x1x128xf32, #tpu.memory_space<vmem>>, vector<1x1x128xf32>
    %158 = vector.shape_cast %157 : vector<1x1x128xf32> to vector<1x128xf32>
    %159 = vector.broadcast %158 : vector<1x128xf32> to vector<32x128xf32>
    %160 = arith.addf %156, %159 : vector<32x128xf32>
    %161 = arith.truncf %160 : vector<32x128xf32> to vector<32x128xbf16>
    %162 = vector.shape_cast %145 : vector<32x128xbf16> to vector<2x16x128xbf16>
    %163 = vector.shape_cast %153 : vector<32x128xbf16> to vector<2x16x128xbf16>
    %164 = vector.shape_cast %161 : vector<32x128xbf16> to vector<2x16x128xbf16>
    %165 = vector.extract_strided_slice %162 {offsets = [0, 0, 0], sizes = [2, 16, 32], strides = [1, 1, 1]} : vector<2x16x128xbf16> to vector<2x16x32xbf16>
    %166 = vector.extract_strided_slice %163 {offsets = [0, 0, 0], sizes = [2, 16, 32], strides = [1, 1, 1]} : vector<2x16x128xbf16> to vector<2x16x32xbf16>
    "tpu.trace_start"() <{level = 10 : i32, message = "bqd,bkd->bqk"}> : () -> ()
    %cst_71 = arith.constant dense<0.000000e+00> : vector<2x16x16xf32>
    %167 = tpu.matmul %165, %166, %cst_71 {dimension_numbers = #tpu.dot_dimension_numbers<[2], [2], [1], [1], [0, 0, 0, 1, 1, 1], [0], [0]>} : vector<2x16x32xbf16>, vector<2x16x32xbf16>, vector<2x16x16xf32> -> vector<2x16x16xf32>
    "tpu.trace_stop"() : () -> ()
    %cst_72 = arith.constant dense<0xFF800000> : vector<2x16xf32>
    %168 = vector.multi_reduction <maximumf>, %167, %cst_72 [2] : vector<2x16x16xf32> to vector<2x16xf32>
    %169 = vector.shape_cast %168 : vector<2x16xf32> to vector<2x16x1xf32>
    %170 = vector.broadcast %169 : vector<2x16x1xf32> to vector<2x16x16xf32>
    %171 = arith.subf %167, %170 : vector<2x16x16xf32>
    %172 = math.exp %171 : vector<2x16x16xf32>
    %cst_73 = arith.constant dense<0.000000e+00> : vector<2x16xf32>
    %173 = vector.multi_reduction <add>, %172, %cst_73 [2] : vector<2x16x16xf32> to vector<2x16xf32>
    %174 = vector.shape_cast %173 : vector<2x16xf32> to vector<2x16x1xf32>
    %175 = tpu.reciprocal %174 {approx = true} : vector<2x16x1xf32> -> vector<2x16x1xf32>
    %176 = vector.broadcast %175 : vector<2x16x1xf32> to vector<2x16x16xf32>
    %177 = arith.mulf %172, %176 : vector<2x16x16xf32>
    %178 = arith.truncf %177 : vector<2x16x16xf32> to vector<2x16x16xbf16>
    %179 = vector.extract_strided_slice %164 {offsets = [0, 0, 0], sizes = [2, 16, 32], strides = [1, 1, 1]} : vector<2x16x128xbf16> to vector<2x16x32xbf16>
    "tpu.trace_start"() <{level = 10 : i32, message = "bqk,bkd->bqd"}> : () -> ()
    %cst_74 = arith.constant dense<0.000000e+00> : vector<2x16x32xf32>
    %180 = tpu.matmul %178, %179, %cst_74 {dimension_numbers = #tpu.dot_dimension_numbers<[2], [1], [1], [2], [0, 0, 0, 1, 1, 2], [0], [0]>} : vector<2x16x16xbf16>, vector<2x16x32xbf16>, vector<2x16x32xf32> -> vector<2x16x32xf32>
    "tpu.trace_stop"() : () -> ()
    %181 = vector.shape_cast %180 : vector<2x16x32xf32> to vector<32x32xf32>
    %182 = arith.truncf %181 : vector<32x32xf32> to vector<32x32xbf16>
    %c0_75 = arith.constant 0 : index
    %c0_76 = arith.constant 0 : index
    %183 = vector.load %arg23[%c0_75, %c0_76] : memref<32x128xbf16, #tpu.memory_space<vmem>>, vector<32x32xbf16>
    tpu.vector_store %arg23[%c0_75, %c0_76], %182 {strides = array<i32>} : memref<32x128xbf16, #tpu.memory_space<vmem>>, vector<32x32xbf16>,
    %184 = vector.extract_strided_slice %162 {offsets = [0, 0, 32], sizes = [2, 16, 32], strides = [1, 1, 1]} : vector<2x16x128xbf16> to vector<2x16x32xbf16>
    %185 = vector.extract_strided_slice %163 {offsets = [0, 0, 32], sizes = [2, 16, 32], strides = [1, 1, 1]} : vector<2x16x128xbf16> to vector<2x16x32xbf16>
    "tpu.trace_start"() <{level = 10 : i32, message = "bqd,bkd->bqk"}> : () -> ()
    %cst_77 = arith.constant dense<0.000000e+00> : vector<2x16x16xf32>
    %186 = tpu.matmul %184, %185, %cst_77 {dimension_numbers = #tpu.dot_dimension_numbers<[2], [2], [1], [1], [0, 0, 0, 1, 1, 1], [0], [0]>} : vector<2x16x32xbf16>, vector<2x16x32xbf16>, vector<2x16x16xf32> -> vector<2x16x16xf32>
    "tpu.trace_stop"() : () -> ()
    %cst_78 = arith.constant dense<0xFF800000> : vector<2x16xf32>
    %187 = vector.multi_reduction <maximumf>, %186, %cst_78 [2] : vector<2x16x16xf32> to vector<2x16xf32>
    %188 = vector.shape_cast %187 : vector<2x16xf32> to vector<2x16x1xf32>
    %189 = vector.broadcast %188 : vector<2x16x1xf32> to vector<2x16x16xf32>
    %190 = arith.subf %186, %189 : vector<2x16x16xf32>
    %191 = math.exp %190 : vector<2x16x16xf32>
    %cst_79 = arith.constant dense<0.000000e+00> : vector<2x16xf32>
    %192 = vector.multi_reduction <add>, %191, %cst_79 [2] : vector<2x16x16xf32> to vector<2x16xf32>
    %193 = vector.shape_cast %192 : vector<2x16xf32> to vector<2x16x1xf32>
    %194 = tpu.reciprocal %193 {approx = true} : vector<2x16x1xf32> -> vector<2x16x1xf32>
    %195 = vector.broadcast %194 : vector<2x16x1xf32> to vector<2x16x16xf32>
    %196 = arith.mulf %191, %195 : vector<2x16x16xf32>
    %197 = arith.truncf %196 : vector<2x16x16xf32> to vector<2x16x16xbf16>
    %198 = vector.extract_strided_slice %164 {offsets = [0, 0, 32], sizes = [2, 16, 32], strides = [1, 1, 1]} : vector<2x16x128xbf16> to vector<2x16x32xbf16>
    "tpu.trace_start"() <{level = 10 : i32, message = "bqk,bkd->bqd"}> : () -> ()
    %cst_80 = arith.constant dense<0.000000e+00> : vector<2x16x32xf32>
    %199 = tpu.matmul %197, %198, %cst_80 {dimension_numbers = #tpu.dot_dimension_numbers<[2], [1], [1], [2], [0, 0, 0, 1, 1, 2], [0], [0]>} : vector<2x16x16xbf16>, vector<2x16x32xbf16>, vector<2x16x32xf32> -> vector<2x16x32xf32>
    "tpu.trace_stop"() : () -> ()
    %200 = vector.shape_cast %199 : vector<2x16x32xf32> to vector<32x32xf32>
    %201 = arith.truncf %200 : vector<32x32xf32> to vector<32x32xbf16>
    %c0_81 = arith.constant 0 : index
    %c32_82 = arith.constant 32 : index
    %202 = vector.load %arg23[%c0_81, %c32_82] : memref<32x128xbf16, #tpu.memory_space<vmem>>, vector<32x32xbf16>
    tpu.vector_store %arg23[%c0_81, %c32_82], %201 {strides = array<i32>} : memref<32x128xbf16, #tpu.memory_space<vmem>>, vector<32x32xbf16>,
    %203 = vector.extract_strided_slice %162 {offsets = [0, 0, 64], sizes = [2, 16, 32], strides = [1, 1, 1]} : vector<2x16x128xbf16> to vector<2x16x32xbf16>
    %204 = vector.extract_strided_slice %163 {offsets = [0, 0, 64], sizes = [2, 16, 32], strides = [1, 1, 1]} : vector<2x16x128xbf16> to vector<2x16x32xbf16>
    "tpu.trace_start"() <{level = 10 : i32, message = "bqd,bkd->bqk"}> : () -> ()
    %cst_83 = arith.constant dense<0.000000e+00> : vector<2x16x16xf32>
    %205 = tpu.matmul %203, %204, %cst_83 {dimension_numbers = #tpu.dot_dimension_numbers<[2], [2], [1], [1], [0, 0, 0, 1, 1, 1], [0], [0]>} : vector<2x16x32xbf16>, vector<2x16x32xbf16>, vector<2x16x16xf32> -> vector<2x16x16xf32>
    "tpu.trace_stop"() : () -> ()
    %cst_84 = arith.constant dense<0xFF800000> : vector<2x16xf32>
    %206 = vector.multi_reduction <maximumf>, %205, %cst_84 [2] : vector<2x16x16xf32> to vector<2x16xf32>
    %207 = vector.shape_cast %206 : vector<2x16xf32> to vector<2x16x1xf32>
    %208 = vector.broadcast %207 : vector<2x16x1xf32> to vector<2x16x16xf32>
    %209 = arith.subf %205, %208 : vector<2x16x16xf32>
    %210 = math.exp %209 : vector<2x16x16xf32>
    %cst_85 = arith.constant dense<0.000000e+00> : vector<2x16xf32>
    %211 = vector.multi_reduction <add>, %210, %cst_85 [2] : vector<2x16x16xf32> to vector<2x16xf32>
    %212 = vector.shape_cast %211 : vector<2x16xf32> to vector<2x16x1xf32>
    %213 = tpu.reciprocal %212 {approx = true} : vector<2x16x1xf32> -> vector<2x16x1xf32>
    %214 = vector.broadcast %213 : vector<2x16x1xf32> to vector<2x16x16xf32>
    %215 = arith.mulf %210, %214 : vector<2x16x16xf32>
    %216 = arith.truncf %215 : vector<2x16x16xf32> to vector<2x16x16xbf16>
    %217 = vector.extract_strided_slice %164 {offsets = [0, 0, 64], sizes = [2, 16, 32], strides = [1, 1, 1]} : vector<2x16x128xbf16> to vector<2x16x32xbf16>
    "tpu.trace_start"() <{level = 10 : i32, message = "bqk,bkd->bqd"}> : () -> ()
    %cst_86 = arith.constant dense<0.000000e+00> : vector<2x16x32xf32>
    %218 = tpu.matmul %216, %217, %cst_86 {dimension_numbers = #tpu.dot_dimension_numbers<[2], [1], [1], [2], [0, 0, 0, 1, 1, 2], [0], [0]>} : vector<2x16x16xbf16>, vector<2x16x32xbf16>, vector<2x16x32xf32> -> vector<2x16x32xf32>
    "tpu.trace_stop"() : () -> ()
    %219 = vector.shape_cast %218 : vector<2x16x32xf32> to vector<32x32xf32>
    %220 = arith.truncf %219 : vector<32x32xf32> to vector<32x32xbf16>
    %c0_87 = arith.constant 0 : index
    %c64_88 = arith.constant 64 : index
    %221 = vector.load %arg23[%c0_87, %c64_88] : memref<32x128xbf16, #tpu.memory_space<vmem>>, vector<32x32xbf16>
    tpu.vector_store %arg23[%c0_87, %c64_88], %220 {strides = array<i32>} : memref<32x128xbf16, #tpu.memory_space<vmem>>, vector<32x32xbf16>,
    %222 = vector.extract_strided_slice %162 {offsets = [0, 0, 96], sizes = [2, 16, 32], strides = [1, 1, 1]} : vector<2x16x128xbf16> to vector<2x16x32xbf16>
    %223 = vector.extract_strided_slice %163 {offsets = [0, 0, 96], sizes = [2, 16, 32], strides = [1, 1, 1]} : vector<2x16x128xbf16> to vector<2x16x32xbf16>
    "tpu.trace_start"() <{level = 10 : i32, message = "bqd,bkd->bqk"}> : () -> ()
    %cst_89 = arith.constant dense<0.000000e+00> : vector<2x16x16xf32>
    %224 = tpu.matmul %222, %223, %cst_89 {dimension_numbers = #tpu.dot_dimension_numbers<[2], [2], [1], [1], [0, 0, 0, 1, 1, 1], [0], [0]>} : vector<2x16x32xbf16>, vector<2x16x32xbf16>, vector<2x16x16xf32> -> vector<2x16x16xf32>
    "tpu.trace_stop"() : () -> ()
    %cst_90 = arith.constant dense<0xFF800000> : vector<2x16xf32>
    %225 = vector.multi_reduction <maximumf>, %224, %cst_90 [2] : vector<2x16x16xf32> to vector<2x16xf32>
    %226 = vector.shape_cast %225 : vector<2x16xf32> to vector<2x16x1xf32>
    %227 = vector.broadcast %226 : vector<2x16x1xf32> to vector<2x16x16xf32>
    %228 = arith.subf %224, %227 : vector<2x16x16xf32>
    %229 = math.exp %228 : vector<2x16x16xf32>
    %cst_91 = arith.constant dense<0.000000e+00> : vector<2x16xf32>
    %230 = vector.multi_reduction <add>, %229, %cst_91 [2] : vector<2x16x16xf32> to vector<2x16xf32>
    %231 = vector.shape_cast %230 : vector<2x16xf32> to vector<2x16x1xf32>
    %232 = tpu.reciprocal %231 {approx = true} : vector<2x16x1xf32> -> vector<2x16x1xf32>
    %233 = vector.broadcast %232 : vector<2x16x1xf32> to vector<2x16x16xf32>
    %234 = arith.mulf %229, %233 : vector<2x16x16xf32>
    %235 = arith.truncf %234 : vector<2x16x16xf32> to vector<2x16x16xbf16>
    %236 = vector.extract_strided_slice %164 {offsets = [0, 0, 96], sizes = [2, 16, 32], strides = [1, 1, 1]} : vector<2x16x128xbf16> to vector<2x16x32xbf16>
    "tpu.trace_start"() <{level = 10 : i32, message = "bqk,bkd->bqd"}> : () -> ()
    %cst_92 = arith.constant dense<0.000000e+00> : vector<2x16x32xf32>
    %237 = tpu.matmul %235, %236, %cst_92 {dimension_numbers = #tpu.dot_dimension_numbers<[2], [1], [1], [2], [0, 0, 0, 1, 1, 2], [0], [0]>} : vector<2x16x16xbf16>, vector<2x16x32xbf16>, vector<2x16x32xf32> -> vector<2x16x32xf32>
    "tpu.trace_stop"() : () -> ()
    %238 = vector.shape_cast %237 : vector<2x16x32xf32> to vector<32x32xf32>
    %239 = arith.truncf %238 : vector<32x32xf32> to vector<32x32xbf16>
    %c0_93 = arith.constant 0 : index
    %c96_94 = arith.constant 96 : index
    %240 = vector.load %arg23[%c0_93, %c96_94] : memref<32x128xbf16, #tpu.memory_space<vmem>>, vector<32x32xbf16>
    tpu.vector_store %arg23[%c0_93, %c96_94], %239 {strides = array<i32>} : memref<32x128xbf16, #tpu.memory_space<vmem>>, vector<32x32xbf16>,
    %c0_95 = arith.constant 0 : index
    %c0_96 = arith.constant 0 : index
    %241 = vector.load %arg23[%c0_95, %c0_96] : memref<32x128xbf16, #tpu.memory_space<vmem>>, vector<32x128xbf16>
    %c0_97 = arith.constant 0 : index
    %c0_98 = arith.constant 0 : index
    %c0_99 = arith.constant 0 : index
    %242 = vector.load %arg14[%c0_97, %c0_98, %c0_99] : memref<1x128x128xbf16, #tpu.memory_space<vmem>>, vector<1x128x128xbf16>
    %243 = vector.shape_cast %242 : vector<1x128x128xbf16> to vector<128x128xbf16>
    %cst_100 = arith.constant dense<0.000000e+00> : vector<32x128xf32>
    %244 = tpu.matmul %241, %243, %cst_100 {dimension_numbers = #tpu.dot_dimension_numbers<[1], [0], [0], [1], [0, 0, 1, 1], [], []>} : vector<32x128xbf16>, vector<128x128xbf16>, vector<32x128xf32> -> vector<32x128xf32>
    %245 = arith.addf %119, %244 : vector<32x128xf32>
    %c0_101 = arith.constant 0 : index
    %c0_102 = arith.constant 0 : index
    %c0_103 = arith.constant 0 : index
    %246 = vector.load %arg15[%c0_101, %c0_102, %c0_103] : memref<1x1x128xf32, #tpu.memory_space<vmem>>, vector<1x1x128xf32>
    %247 = vector.shape_cast %246 : vector<1x1x128xf32> to vector<1x128xf32>
    %248 = vector.broadcast %247 : vector<1x128xf32> to vector<32x128xf32>
    %249 = arith.addf %245, %248 : vector<32x128xf32>
    %cst_104 = arith.constant dense<0.000000e+00> : vector<32xf32>
    %250 = vector.multi_reduction <add>, %249, %cst_104 [1] : vector<32x128xf32> to vector<32xf32>
    %251 = vector.shape_cast %250 : vector<32xf32> to vector<32x1xf32>
    %cst_105 = arith.constant 1.280000e+02 : f32
    %252 = vector.broadcast %cst_105 : f32 to vector<32x1xf32>
    %253 = arith.divf %251, %252 : vector<32x1xf32>
    %254 = vector.broadcast %253 : vector<32x1xf32> to vector<32x128xf32>
    %255 = arith.subf %249, %254 : vector<32x128xf32>
    %256 = arith.mulf %255, %255 : vector<32x128xf32>
    %cst_106 = arith.constant dense<0.000000e+00> : vector<32xf32>
    %257 = vector.multi_reduction <add>, %256, %cst_106 [1] : vector<32x128xf32> to vector<32xf32>
    %258 = vector.shape_cast %257 : vector<32xf32> to vector<32x1xf32>
    %cst_107 = arith.constant 1.280000e+02 : f32
    %259 = vector.broadcast %cst_107 : f32 to vector<32x1xf32>
    %260 = arith.divf %258, %259 : vector<32x1xf32>
    %cst_108 = arith.constant 9.99999997E-7 : f32
    %261 = vector.broadcast %cst_108 : f32 to vector<32x1xf32>
    %262 = arith.addf %260, %261 : vector<32x1xf32>
    %263 = math.rsqrt %262 : vector<32x1xf32>
    %264 = vector.broadcast %263 : vector<32x1xf32> to vector<32x128xf32>
    %265 = arith.mulf %255, %264 : vector<32x128xf32>
    %266 = arith.truncf %265 : vector<32x128xf32> to vector<32x128xbf16>
    %c0_109 = arith.constant 0 : index
    %c0_110 = arith.constant 0 : index
    %c0_111 = arith.constant 0 : index
    %267 = vector.load %arg16[%c0_109, %c0_110, %c0_111] : memref<1x128x512xbf16, #tpu.memory_space<vmem>>, vector<1x128x512xbf16>
    %268 = vector.shape_cast %267 : vector<1x128x512xbf16> to vector<128x512xbf16>
    %cst_112 = arith.constant dense<0.000000e+00> : vector<32x512xf32>
    %269 = tpu.matmul %266, %268, %cst_112 {dimension_numbers = #tpu.dot_dimension_numbers<[1], [0], [0], [1], [0, 0, 1, 1], [], []>} : vector<32x128xbf16>, vector<128x512xbf16>, vector<32x512xf32> -> vector<32x512xf32>
    %c0_113 = arith.constant 0 : index
    %c0_114 = arith.constant 0 : index
    %c0_115 = arith.constant 0 : index
    %270 = vector.load %arg17[%c0_113, %c0_114, %c0_115] : memref<1x1x512xf32, #tpu.memory_space<vmem>>, vector<1x1x512xf32>
    %271 = vector.shape_cast %270 : vector<1x1x512xf32> to vector<1x512xf32>
    %272 = vector.broadcast %271 : vector<1x512xf32> to vector<32x512xf32>
    %273 = arith.addf %269, %272 : vector<32x512xf32>
    %cst_116 = arith.constant 5.000000e-01 : f32
    %274 = vector.broadcast %cst_116 : f32 to vector<32x512xf32>
    %275 = arith.mulf %274, %273 : vector<32x512xf32>
    %cst_117 = arith.constant 0.707106769 : f32
    %276 = vector.broadcast %cst_117 : f32 to vector<32x512xf32>
    %277 = arith.mulf %273, %276 : vector<32x512xf32>
    %278 = math.absf %277 : vector<32x512xf32>
    %cst_118 = arith.constant 0.327591091 : f32
    %279 = vector.broadcast %cst_118 : f32 to vector<32x512xf32>
    %280 = arith.mulf %279, %278 : vector<32x512xf32>
    %cst_119 = arith.constant 1.000000e+00 : f32
    %281 = vector.broadcast %cst_119 : f32 to vector<32x512xf32>
    %282 = arith.addf %281, %280 : vector<32x512xf32>
    %283 = tpu.reciprocal %282 {approx = true} : vector<32x512xf32> -> vector<32x512xf32>
    %cst_120 = arith.constant 1.06140542 : f32
    %284 = vector.broadcast %cst_120 : f32 to vector<32x512xf32>
    %285 = arith.mulf %284, %283 : vector<32x512xf32>
    %cst_121 = arith.constant -1.45315206 : f32
    %286 = vector.broadcast %cst_121 : f32 to vector<32x512xf32>
    %287 = arith.addf %285, %286 : vector<32x512xf32>
    %288 = arith.mulf %287, %283 : vector<32x512xf32>
    %cst_122 = arith.constant 1.42141378 : f32
    %289 = vector.broadcast %cst_122 : f32 to vector<32x512xf32>
    %290 = arith.addf %288, %289 : vector<32x512xf32>
    %291 = arith.mulf %290, %283 : vector<32x512xf32>
    %cst_123 = arith.constant -0.284496725 : f32
    %292 = vector.broadcast %cst_123 : f32 to vector<32x512xf32>
    %293 = arith.addf %291, %292 : vector<32x512xf32>
    %294 = arith.mulf %293, %283 : vector<32x512xf32>
    %cst_124 = arith.constant 0.254829586 : f32
    %295 = vector.broadcast %cst_124 : f32 to vector<32x512xf32>
    %296 = arith.addf %294, %295 : vector<32x512xf32>
    %297 = arith.mulf %296, %283 : vector<32x512xf32>
    %cst_125 = arith.constant 0.000000e+00 : f32
    %298 = vector.broadcast %cst_125 : f32 to vector<32x512xf32>
    %299 = arith.subf %298, %278 : vector<32x512xf32>
    %300 = arith.mulf %299, %278 : vector<32x512xf32>
    %301 = math.exp %300 : vector<32x512xf32>
    %302 = arith.mulf %297, %301 : vector<32x512xf32>
    %cst_126 = arith.constant 1.000000e+00 : f32
    %303 = vector.broadcast %cst_126 : f32 to vector<32x512xf32>
    %304 = arith.subf %303, %302 : vector<32x512xf32>
    %cst_127 = arith.constant 0.000000e+00 : f32
    %305 = vector.broadcast %cst_127 : f32 to vector<32x512xf32>
    %306 = arith.cmpf olt, %277, %305 : vector<32x512xf32>
    %cst_128 = arith.constant 0.000000e+00 : f32
    %307 = vector.broadcast %cst_128 : f32 to vector<32x512xf32>
    %308 = arith.subf %307, %304 : vector<32x512xf32>
    %309 = arith.select %306, %308, %304 : vector<32x512xi1>, vector<32x512xf32>
    %cst_129 = arith.constant 1.000000e+00 : f32
    %310 = vector.broadcast %cst_129 : f32 to vector<32x512xf32>
    %311 = arith.addf %310, %309 : vector<32x512xf32>
    %312 = arith.mulf %275, %311 : vector<32x512xf32>
    %313 = arith.truncf %312 : vector<32x512xf32> to vector<32x512xbf16>
    %c0_130 = arith.constant 0 : index
    %c0_131 = arith.constant 0 : index
    %c0_132 = arith.constant 0 : index
    %314 = vector.load %arg18[%c0_130, %c0_131, %c0_132] : memref<1x512x128xbf16, #tpu.memory_space<vmem>>, vector<1x512x128xbf16>
    %315 = vector.shape_cast %314 : vector<1x512x128xbf16> to vector<512x128xbf16>
    %cst_133 = arith.constant dense<0.000000e+00> : vector<32x128xf32>
    %316 = tpu.matmul %313, %315, %cst_133 {dimension_numbers = #tpu.dot_dimension_numbers<[1], [0], [0], [1], [0, 0, 1, 1], [], []>} : vector<32x512xbf16>, vector<512x128xbf16>, vector<32x128xf32> -> vector<32x128xf32>
    %317 = arith.addf %249, %316 : vector<32x128xf32>
    %c0_134 = arith.constant 0 : index
    %c0_135 = arith.constant 0 : index
    %c0_136 = arith.constant 0 : index
    %318 = vector.load %arg19[%c0_134, %c0_135, %c0_136] : memref<1x1x128xf32, #tpu.memory_space<vmem>>, vector<1x1x128xf32>
    %319 = vector.shape_cast %318 : vector<1x1x128xf32> to vector<1x128xf32>
    %320 = vector.broadcast %319 : vector<1x128xf32> to vector<32x128xf32>
    %321 = arith.addf %317, %320 : vector<32x128xf32>
    %c0_137 = arith.constant 0 : index
    %c0_138 = arith.constant 0 : index
    %322 = vector.load %arg21[%c0_137, %c0_138] : memref<32x128xf32, #tpu.memory_space<vmem>>, vector<32x128xf32>
    tpu.vector_store %arg21[%c0_137, %c0_138], %321 {strides = array<i32>} : memref<32x128xf32, #tpu.memory_space<vmem>>, vector<32x128xf32>,
    %c1_i32 = arith.constant 1 : i32
    %323 = arith.cmpi eq, %arg1, %c1_i32 : i32
    %324 = arith.extui %323 : i1 to i32
    %c0_i32_139 = arith.constant 0 : i32
    %325 = arith.cmpi ne, %324, %c0_i32_139 : i32
    scf.if %325 {
      %326 = vector.shape_cast %321 : vector<32x128xf32> to vector<2x16x128xf32>
      %c0_140 = arith.constant 0 : index
      %c0_141 = arith.constant 0 : index
      %c0_142 = arith.constant 0 : index
      %327 = vector.load %arg20[%c0_140, %c0_141, %c0_142] : memref<2x16x128xf32, #tpu.memory_space<vmem>>, vector<2x16x128xf32>
      tpu.vector_store %arg20[%c0_140, %c0_141, %c0_142], %326 {strides = array<i32>} : memref<2x16x128xf32, #tpu.memory_space<vmem>>, vector<2x16x128xf32>,
    } else {
    }
    return
  }
  func.func @transform_0(%arg0: i32, %arg1: i32) -> (i32, i32, i32) {
    %c0_i32 = arith.constant 0 : i32
    %c0_i32_0 = arith.constant 0 : i32
    %c0_i32_1 = arith.constant 0 : i32
    return %arg0, %c0_i32, %c0_i32_0 : i32, i32, i32
  }
  func.func @transform_1(%arg0: i32, %arg1: i32) -> (i32, i32, i32) {
    %c0_i32 = arith.constant 0 : i32
    %c0_i32_0 = arith.constant 0 : i32
    %c0_i32_1 = arith.constant 0 : i32
    return %arg0, %c0_i32, %c0_i32_0 : i32, i32, i32
  }
  func.func @transform_2(%arg0: i32, %arg1: i32) -> (i32, i32, i32) {
    %c0_i32 = arith.constant 0 : i32
    %c0_i32_0 = arith.constant 0 : i32
    %c0_i32_1 = arith.constant 0 : i32
    return %arg1, %c0_i32, %c0_i32_0 : i32, i32, i32
  }
  func.func @transform_3(%arg0: i32, %arg1: i32) -> (i32, i32, i32) {
    %c0_i32 = arith.constant 0 : i32
    %c0_i32_0 = arith.constant 0 : i32
    %c0_i32_1 = arith.constant 0 : i32
    return %arg1, %c0_i32, %c0_i32_0 : i32, i32, i32
  }
  func.func @transform_4(%arg0: i32, %arg1: i32) -> (i32, i32, i32) {
    %c0_i32 = arith.constant 0 : i32
    %c0_i32_0 = arith.constant 0 : i32
    %c0_i32_1 = arith.constant 0 : i32
    return %arg1, %c0_i32, %c0_i32_0 : i32, i32, i32
  }
  func.func @transform_5(%arg0: i32, %arg1: i32) -> (i32, i32, i32) {
    %c0_i32 = arith.constant 0 : i32
    %c0_i32_0 = arith.constant 0 : i32
    %c0_i32_1 = arith.constant 0 : i32
    return %arg1, %c0_i32, %c0_i32_0 : i32, i32, i32
  }
  func.func @transform_6(%arg0: i32, %arg1: i32) -> (i32, i32, i32) {
    %c0_i32 = arith.constant 0 : i32
    %c0_i32_0 = arith.constant 0 : i32
    %c0_i32_1 = arith.constant 0 : i32
    return %arg1, %c0_i32, %c0_i32_0 : i32, i32, i32
  }
  func.func @transform_7(%arg0: i32, %arg1: i32) -> (i32, i32, i32) {
    %c0_i32 = arith.constant 0 : i32
    %c0_i32_0 = arith.constant 0 : i32
    %c0_i32_1 = arith.constant 0 : i32
    return %arg1, %c0_i32, %c0_i32_0 : i32, i32, i32
  }
  func.func @transform_8(%arg0: i32, %arg1: i32) -> (i32, i32, i32) {
    %c0_i32 = arith.constant 0 : i32
    %c0_i32_0 = arith.constant 0 : i32
    %c0_i32_1 = arith.constant 0 : i32
    return %arg1, %c0_i32, %c0_i32_0 : i32, i32, i32
  }
  func.func @transform_9(%arg0: i32, %arg1: i32) -> (i32, i32, i32) {
    %c0_i32 = arith.constant 0 : i32
    %c0_i32_0 = arith.constant 0 : i32
    %c0_i32_1 = arith.constant 0 : i32
    return %arg1, %c0_i32, %c0_i32_0 : i32, i32, i32
  }
  func.func @transform_10(%arg0: i32, %arg1: i32) -> (i32, i32, i32) {
    %c0_i32 = arith.constant 0 : i32
    %c0_i32_0 = arith.constant 0 : i32
    %c0_i32_1 = arith.constant 0 : i32
    return %arg1, %c0_i32, %c0_i32_0 : i32, i32, i32
  }
  func.func @transform_11(%arg0: i32, %arg1: i32) -> (i32, i32, i32) {
    %c0_i32 = arith.constant 0 : i32
    %c0_i32_0 = arith.constant 0 : i32
    %c0_i32_1 = arith.constant 0 : i32
    return %arg1, %c0_i32, %c0_i32_0 : i32, i32, i32
  }
  func.func @transform_12(%arg0: i32, %arg1: i32) -> (i32, i32, i32) {
    %c0_i32 = arith.constant 0 : i32
    %c0_i32_0 = arith.constant 0 : i32
    %c0_i32_1 = arith.constant 0 : i32
    return %arg1, %c0_i32, %c0_i32_0 : i32, i32, i32
  }
  func.func @transform_13(%arg0: i32, %arg1: i32) -> (i32, i32, i32) {
    %c0_i32 = arith.constant 0 : i32
    %c0_i32_0 = arith.constant 0 : i32
    %c0_i32_1 = arith.constant 0 : i32
    return %arg1, %c0_i32, %c0_i32_0 : i32, i32, i32
  }
  func.func @transform_14(%arg0: i32, %arg1: i32) -> (i32, i32, i32) {
    %c0_i32 = arith.constant 0 : i32
    %c0_i32_0 = arith.constant 0 : i32
    %c0_i32_1 = arith.constant 0 : i32
    return %arg1, %c0_i32, %c0_i32_0 : i32, i32, i32
  }
  func.func @transform_15(%arg0: i32, %arg1: i32) -> (i32, i32, i32) {
    %c0_i32 = arith.constant 0 : i32
    %c0_i32_0 = arith.constant 0 : i32
    %c0_i32_1 = arith.constant 0 : i32
    return %arg1, %c0_i32, %c0_i32_0 : i32, i32, i32
  }
  func.func @transform_16(%arg0: i32, %arg1: i32) -> (i32, i32, i32) {
    %c0_i32 = arith.constant 0 : i32
    %c0_i32_0 = arith.constant 0 : i32
    %c0_i32_1 = arith.constant 0 : i32
    return %arg1, %c0_i32, %c0_i32_0 : i32, i32, i32
  }
  func.func @transform_17(%arg0: i32, %arg1: i32) -> (i32, i32, i32) {
    %c0_i32 = arith.constant 0 : i32
    %c0_i32_0 = arith.constant 0 : i32
    %c0_i32_1 = arith.constant 0 : i32
    return %arg1, %c0_i32, %c0_i32_0 : i32, i32, i32
  }
  func.func @transform_18(%arg0: i32, %arg1: i32) -> (i32, i32, i32) {
    %c0_i32 = arith.constant 0 : i32
    %c0_i32_0 = arith.constant 0 : i32
    %c0_i32_1 = arith.constant 0 : i32
    return %arg0, %c0_i32, %c0_i32_0 : i32, i32, i32
  }
}

</mosaic_0001>

<bundles_post_ra>
// kernel: point_transformer_decoder_fwd.1
= control target key start
LH: loop header
LB: loop body
LE: loop exit
PB: predicated region body
PF: predicated region fallthrough
CT: control target
= control target key end

     0   :  { %s7181_s0 = inlined_call_operand.vmem [shape: f32[2,16,128], index: 0, kind: input, shape index: {}]   ;;  %s7182_s1 = inlined_call_operand.vmem [shape: f32[2,16,128], index: 1, kind: input, shape index: {}]   ;;  %s7183_s2 = inlined_call_operand.vmem [shape: bf16[2,128,384], index: 2, kind: input, shape index: {}]   ;;  %s7184_s3 = inlined_call_operand.vmem [shape: f32[2,1,384], index: 3, kind: input, shape index: {}]   ;;  %s7185_s4 = inlined_call_operand.vmem [shape: bf16[2,128,128], index: 4, kind: input, shape index: {}]   ;;  %s7186_s5 = inlined_call_operand.vmem [shape: f32[2,1,128], index: 5, kind: input, shape index: {}]   ;;  %s7187_s6 = inlined_call_operand.vmem [shape: bf16[2,128,128], index: 6, kind: input, shape index: {}]   ;;  %s7188_s7 = inlined_call_operand.vmem [shape: f32[2,1,128], index: 7, kind: input, shape index: {}]   ;;  %s7189_s8 = inlined_call_operand.vmem [shape: bf16[2,128,128], index: 8, kind: input, shape index: {}]   ;;  %s7190_s9 = inlined_call_operand.vmem [shape: f32[2,1,128], index: 9, kind: input, shape index: {}]   ;;  %s7191_s10 = inlined_call_operand.vmem [shape: bf16[2,128,128], index: 10, kind: input, shape index: {}]   ;;  %s7192_s11 = inlined_call_operand.vmem [shape: f32[2,1,128], index: 11, kind: input, shape index: {}]   ;;  %s7193_s12 = inlined_call_operand.vmem [shape: bf16[2,128,128], index: 12, kind: input, shape index: {}]   ;;  %s7194_s13 = inlined_call_operand.vmem [shape: f32[2,1,128], index: 13, kind: input, shape index: {}]   ;;  %s7195_s14 = inlined_call_operand.vmem [shape: bf16[2,128,512], index: 14, kind: input, shape index: {}]   ;;  %s7196_s15 = inlined_call_operand.vmem [shape: f32[2,1,512], index: 15, kind: input, shape index: {}]   ;;  %s7197_s16 = inlined_call_operand.vmem [shape: bf16[2,512,128], index: 16, kind: input, shape index: {}]   ;;  %s7198_s17 = inlined_call_operand.vmem [shape: f32[2,1,128], index: 17, kind: input, shape index: {}]   ;;  %s7199_s18 = inlined_call_operand.hbm [shape: f32[2,16,128], index: 18, kind: output, shape index: {}]  }
   0x1   :  { %7206 = sst [smem:[#allocation13_spill]] %s7181_s0 }
   0x2   :  { %7207 = sst [smem:[#allocation14_spill]] %s7182_s1 }
   0x3   :  { %7208 = sst [smem:[#allocation15_spill]] %s7183_s2 }
   0x4   :  { %7209 = sst [smem:[#allocation16_spill]] %s7184_s3 }
   0x5   :  { %7210 = sst [smem:[#allocation17_spill]] %s7185_s4 }
   0x6   :  { %7211 = sst [smem:[#allocation18_spill]] %s7187_s6 }
   0x7   :  { %7212 = sst [smem:[#allocation19_spill]] %s7189_s8 }
   0x8   :  { %7213 = sst [smem:[#allocation20_spill]] %s7191_s10 }
   0x9   :  { %7214 = sst [smem:[#allocation21_spill]] %s7193_s12 }
   0xa   :  { %7215 = sst [smem:[#allocation22_spill]] %s7194_s13 }
   0xb   :  { %7216 = sst [smem:[#allocation23_spill]] %s7195_s14 }
   0xc   :  { %7217 = sst [smem:[#allocation24_spill]] %s7196_s15 }
   0xd   :  { %7218 = sst [smem:[#allocation25_spill]] %s7197_s16 }
   0xe   :  { %7219 = sst [smem:[#allocation26_spill]] %s7198_s17 }
   0xf   :  { %7220 = sst [smem:[#allocation27_spill]] %s7199_s18 }
  0x10   :  { %23 = vsyncpa [#allocation6], 0  ;;  %s5871_s27 = smov 0   ;;  %s5873_s28 = smov 0  }
  0x11   :  { %s5875_s29 = smov 0  }
  0x12 LB: > { %7221 = sst [smem:[#allocation8_spill]] %s5758_s27  ;;  %s38_s0 = sadd.s32 1, %s5762_s28  ;;  %s5766_s29 = sphi %s5875_s29, %s29_s29   ;;  %s5762_s28 = sphi %s5873_s28, %s7255_s28   ;;  %s5758_s27 = sphi %s5871_s27, %s7254_s27  }
  0x13   : > { %7222 = sst [smem:[#allocation9_spill]] %s5762_s28  ;;  %p39_p0 = scmp.ge.s32.totalorder %s38_s0, 2 }
  0x14   : > { %7223 = sst [smem:[#allocation10_spill]] %s5766_s29  ;;  %p4691_p1 = scmp.ge.s32.totalorder %s5766_s29, 1 }
  0x15   : > { %p685_p2 = scmp.lt.s32.totalorder %s5766_s29, 3  ;;  %s7257_s0 = smov (%p39_p0, %s38_s0), 0 }
  0x16   : > { %7224 = sst [smem:[#allocation11_spill]] %s7257_s0 }
  0x17   : > { %p686_p3 = pnand %p4691_p1, %p685_p2 }
  0x19   : > { %689 = sbr.rel (%p686_p3) target bundleno = 3782 (0xec6), region = 92 }
  0x1e   : > { %p821_p4 = scmp.lt.s32.totalorder %s5758_s27, 1  ;;  %s7225_s4 = sld [smem:[#allocation17_spill]] }
  0x1f   : > { %s7226_s26 = sld [smem:[#allocation15_spill]] }
  0x20   : > { %s5894_s19 = scalar_select %p821_p4, %s5758_s27, 1 }
  0x21   : > { %s7227_s3 = sld [smem:[#allocation16_spill]] }
  0x22   : > { %s5434_s1 = smul.u32 192, %s5894_s19  ;;  %s5282_s20 = sshll.u32 %s5894_s19, 6 }
  0x23   : > { %s5435_s21 = smul.u32 3, %s5894_s19  ;;  %s7228_s6 = sld [smem:[#allocation18_spill]] }
  0x24   : > { %s5902_s23 = scalar_lea.vmem %s7225_s4, %s5282_s20  ;;  %s7229_s8 = sld [smem:[#allocation19_spill]] }
  0x25   : > { %s5907_s30 = scalar_lea.vmem %s7226_s26, %s5434_s1  ;;  %s7230_s10 = sld [smem:[#allocation20_spill]] }
  0x26   : > { %s7231_s12 = sld [smem:[#allocation21_spill]]  ;;  %s5287_s0 = sshll.u32 %s5894_s19, 8 }
  0x27   : > { %s5916_s17 = scalar_lea.vmem %s7227_s3, %s5435_s21  ;;  %s7233_s14 = sld [smem:[#allocation23_spill]] }
  0x28   : > { %s4705_s21 = sshll.u32 %s5894_s19, 2  ;;  %s7235_s15 = sld [smem:[#allocation24_spill]] }
  0x29   : > { %s5921_s22 = scalar_lea.vmem %s7228_s6, %s5282_s20  ;;  %s7237_s25 = sld [smem:[#allocation26_spill]] }
  0x2a   : > { %s5930_s28 = scalar_lea.vmem %s7229_s8, %s5282_s20  ;;  %s7238_s13 = sld [smem:[#allocation8_spill]] }
  0x2b   : > { %s5939_s18 = scalar_lea.vmem %s7230_s10, %s5282_s20 }
  0x2c   : > { %s5948_s1 = scalar_lea.vmem %s7231_s12, %s5282_s20  ;;  %s7236_s20 = sld [smem:[#allocation25_spill]] }
  0x2d   : > { %s5958_s29 = scalar_lea.vmem %s7233_s14, %s5287_s0 }
  0x2e   : > { %7234 = sst [smem:[#allocation12_spill]] %s5958_s29  ;;  %s5964_s16 = scalar_lea.vmem %s7235_s15, %s4705_s21 }
  0x2f   : > { %s886_s6 = scalar_lea.vmem %s7237_s25, %s5894_s19 }
  0x30   : > { %p4708_p5 = scmp.ne.s32.totalorder %s7238_s13, 0 }
  0x31   : > { %s7239_s14 = sld [smem:[#allocation14_spill]] (!%p4708_p5) }
  0x32   : > { %s5969_s2 = scalar_lea.vmem %s7236_s20, %s5287_s0  ;;  %892 = sbr.rel (%p4708_p5) target bundleno = 330 (0x14a), region = 96 }
  0x33   : > { %s7240_s21 = sld [smem:[#allocation13_spill]] (!%p4708_p5) }
  0x37   : > { %v903_v0 = vld [vmem:[%s7239_s14 + $0x10] sm:$0xff]  ;;  %v901_v1 = vld [vmem:[%s7239_s14] sm:$0xff]  ;;  %v904_v2 = vld [vmem:[%s7239_s14 + $0x18] sm:$0xff]  ;;  %v5768_v4 = vmov 128.0  }
  0x38   : > { %909 = vadd.xlane.f32.xlu1 %v903_v0  ;;  %905 = vadd.xlane.f32.xlu0 %v901_v1  ;;  %v902_v3 = vld [vmem:[%s7239_s14 + $0x8] sm:$0xff]  ;;  %5474 = vrcp.f32 %v5768_v4 }
  0x39   : > { %v893_v33 = vld [vmem:[%s7240_s21] sm:$0xff]  ;;  %v894_v34 = vld [vmem:[%s7240_s21 + $0x8] sm:$0xff]  ;;  %v895_v35 = vld [vmem:[%s7240_s21 + $0x10] sm:$0xff] }
  0x3a   : > { %v896_v36 = vld [vmem:[%s7240_s21 + $0x18] sm:$0xff]  ;;  %897 = vst [vmem:[#allocation2 + $0x10] sm:$0xff] %v893_v33 }
  0x3b   : > { %898 = vst [vmem:[#allocation2] sm:$0xff] %v894_v34 }
  0x3c   : > { %899 = vst [vmem:[#allocation2 + $0x18] sm:$0xff] %v895_v35 }
  0x3d   : > { %900 = vst [vmem:[#allocation2 + $0x8] sm:$0xff] %v896_v36 }
  0x3e   : > { %v5475_v5 = vpop.eup %5474 }
  0x3f   : > { %v914_v6 = vmul.f32 128.0, %v5475_v5  ;;  %vm918_vm0 = vweird.f32 %v5475_v5 }
  0x40   : > { %911 = vadd.xlane.f32.xlu1 %v904_v2  ;;  %907 = vadd.xlane.f32.xlu0 %v902_v3 }
  0x41   : > { %v915_v7 = vsub.f32 1.0, %v914_v6 }
  0x43   : > { %v916_v8 = vmul.f32 %v5475_v5, %v915_v7 }
  0x45   : > { %v917_v9 = vadd.f32 %v5475_v5, %v916_v8 }
  0x47   : > { %v919_v10 = vsel %vm918_vm0, %v5475_v5, %v917_v9 }
  0xab   : > { %v910_v11 = vpop.xlane.xlu1 %909  ;;  %v906_v12 = vpop.xlane.xlu0 %905 }
  0xac   : > { %v922_v13 = vmul.f32 %v919_v10, %v910_v11  ;;  %v920_v14 = vmul.f32 %v919_v10, %v906_v12 }
  0xae   : > { %v5988_v15 = vsub.f32 %v903_v0, %v922_v13  ;;  %v5990_v16 = vsub.f32 %v901_v1, %v920_v14 }
  0xb0   : > { %v930_v17 = vmul.f32 %v5988_v15, %v5988_v15  ;;  %v928_v18 = vmul.f32 %v5990_v16, %v5990_v16 }
  0xb2   : > { %936 = vadd.xlane.f32.xlu0 %v930_v17  ;;  %932 = vadd.xlane.f32.xlu2 %v928_v18 }
  0xb3   : > { %v912_v19 = vpop.xlane.xlu1 %911  ;;  %v908_v20 = vpop.xlane.xlu0 %907 }
  0xb4   : > { %v923_v21 = vmul.f32 %v919_v10, %v912_v19  ;;  %v921_v22 = vmul.f32 %v919_v10, %v908_v20 }
  0xb6   : > { %v5996_v23 = vsub.f32 %v904_v2, %v923_v21  ;;  %v5998_v24 = vsub.f32 %v902_v3, %v921_v22 }
  0xb8   : > { %v931_v25 = vmul.f32 %v5996_v23, %v5996_v23  ;;  %v929_v26 = vmul.f32 %v5998_v24, %v5998_v24 }
  0xba   : > { %938 = vadd.xlane.f32.xlu1 %v931_v25  ;;  %934 = vadd.xlane.f32.xlu2 %v929_v26 }
 0x125   : > { %v933_v27 = vpop.xlane.xlu2 %932  ;;  %v937_v28 = vpop.xlane.xlu0 %936 }
 0x126   : > { %v940_v29 = vmul.f32 %v933_v27, %v919_v10  ;;  %v942_v30 = vmul.f32 %v937_v28, %v919_v10 }
 0x128   : > { %v944_v31 = vadd.f32 1e-06, %v940_v29  ;;  %v946_v32 = vadd.f32 1e-06, %v942_v30 }
 0x12a   : > { %5476 = vrsqrt.f32 %v944_v31  ;;  %vm974_vm3 = vweird.f32 %v946_v32  ;;  %vm954_vm5 = vweird.f32 %v944_v31 }
 0x12b   : > { %5478 = vrsqrt.f32 %v946_v32 }
 0x12d   : > { %v939_v37 = vpop.xlane.xlu1 %938  ;;  %v935_v38 = vpop.xlane.xlu2 %934 }
 0x12e   : > { %v943_v39 = vmul.f32 %v939_v37, %v919_v10  ;;  %v941_v40 = vmul.f32 %v935_v38, %v919_v10 }
 0x130   : > { %v5477_v41 = vpop.eup %5476  ;;  %v947_v42 = vadd.f32 1e-06, %v943_v39  ;;  %v945_v43 = vadd.f32 1e-06, %v941_v40 }
 0x131   : > { %v5479_v44 = vpop.eup %5478  ;;  %v949_v45 = vmul.f32 %v5477_v41, %v944_v31  ;;  %vm955_vm2 = vweird.f32 %v5477_v41 }
 0x132   : > { %v969_v46 = vmul.f32 %v5479_v44, %v946_v32  ;;  %5480 = vrsqrt.f32 %v947_v42  ;;  %vm975_vm1 = vweird.f32 %v5479_v44  ;;  %vm956_vm8 = vmor %vm954_vm5, %vm955_vm2  ;;  %vm984_vm9 = vweird.f32 %v947_v42 }
 0x133   : > { %v950_v47 = vmul.f32 %v5477_v41, %v949_v45  ;;  %5482 = vrsqrt.f32 %v945_v43  ;;  %vm976_vm6 = vmor %vm974_vm3, %vm975_vm1  ;;  %vm964_vm11 = vweird.f32 %v945_v43 }
 0x134   : > { %v970_v48 = vmul.f32 %v5479_v44, %v969_v46 }
 0x135   : > { %v951_v49 = vmul.f32 0.5, %v950_v47 }
 0x136   : > { %v971_v50 = vmul.f32 0.5, %v970_v48 }
 0x137   : > { %v952_v55 = vsub.f32 1.5, %v951_v49 }
 0x138   : > { %v5481_v51 = vpop.eup %5480  ;;  %v972_v53 = vsub.f32 1.5, %v971_v50 }
 0x139   : > { %v5483_v52 = vpop.eup %5482  ;;  %v979_v54 = vmul.f32 %v5481_v51, %v947_v42  ;;  %v953_v61 = vmul.f32 %v5477_v41, %v952_v55  ;;  %vm985_vm4 = vweird.f32 %v5481_v51 }
 0x13a   : > { %v959_v56 = vmul.f32 %v5483_v52, %v945_v43  ;;  %v973_v59 = vmul.f32 %v5479_v44, %v972_v53  ;;  %vm965_vm7 = vweird.f32 %v5483_v52  ;;  %vm986_vm10 = vmor %vm984_vm9, %vm985_vm4 }
 0x13b   : > { %v980_v57 = vmul.f32 %v5481_v51, %v979_v54  ;;  %v957_v3 = vsel %vm956_vm8, %v5477_v41, %v953_v61  ;;  %vm966_vm12 = vmor %vm964_vm11, %vm965_vm7 }
 0x13c   : > { %v960_v58 = vmul.f32 %v5483_v52, %v959_v56  ;;  %v977_v1 = vsel %vm976_vm6, %v5479_v44, %v973_v59  ;;  %v988_v9 = vmul.f32 %v957_v3, %v5990_v16 }
 0x13d   : > { %v981_v60 = vmul.f32 0.5, %v980_v57  ;;  %v990_v6 = vmul.f32 %v977_v1, %v5988_v15 }
 0x13e   : > { %v961_v62 = vmul.f32 0.5, %v960_v58 }
 0x13f   : > { %v982_v63 = vsub.f32 1.5, %v981_v60 }
 0x140   : > { %v962_v0 = vsub.f32 1.5, %v961_v62 }
 0x141   : > { %v983_v2 = vmul.f32 %v5481_v51, %v982_v63 }
 0x142   : > { %v963_v4 = vmul.f32 %v5483_v52, %v962_v0 }
 0x143   : > { %v987_v5 = vsel %vm986_vm10, %v5481_v51, %v983_v2 }
 0x144   : > { %v991_v7 = vmul.f32 %v987_v5, %v5996_v23  ;;  %v967_v8 = vsel %vm966_vm12, %v5483_v52, %v963_v4 }
 0x145   : > { %v989_v10 = vmul.f32 %v967_v8, %v5998_v24 }
 0x146   : > { %v5431_v11 = vpack.c.bf16 %v991_v7, %v990_v6 }
 0x147   : > { %v5426_v12 = vpack.c.bf16 %v989_v10, %v988_v9 }
 0x148   : > { %5433 = vst [vmem:[#allocation3 + $0x8] sm:$0xff] %v5431_v11  }
 0x149   : > { %5427 = vst [vmem:[#allocation3] sm:$0xff] %v5426_v12  }
 0x14a PF: > { %v1002_v13 = vld [vmem:[#allocation2 + $0x18] sm:$0xff]  ;;  %v1000_v14 = vld [vmem:[#allocation2 + $0x10] sm:$0xff]  ;;  %v1003_v17 = vld [vmem:[#allocation2 + $0x8] sm:$0xff]  ;;  %v5769_v15 = vmov 128.0   ;;  %vm1340_vm10 = vcmask 261120   ;;  %s5772_s26 = smov 32   ;;  %s7241_s3 = scalar_lea.vmem %s7186_s5, %s5894_s19 }
 0x14b   : > { %1008 = vadd.xlane.f32.xlu1 %v1002_v13  ;;  %1004 = vadd.xlane.f32.xlu0 %v1000_v14  ;;  %v1001_v18 = vld [vmem:[#allocation2] sm:$0xff]  ;;  %5490 = vrcp.f32 %v5769_v15  ;;  %v4795_v40 = vld [vmem:[%s5907_s30 + $0xa8] sm:$0xf]  ;;  %v5311_v41 = vld [vmem:[%s5907_s30 + $0xb0] sm:$0xf0]  ;;  %vm1387_vm11 = vcmask 130048   ;;  %s7242_s10 = scalar_lea.vmem %s7190_s9, %s5894_s19  ;;  %s7243_s12 = scalar_lea.vmem %s7188_s7, %s5894_s19 }
 0x14c   : > { %v5310_v42 = vld [vmem:[%s5907_s30 + $0xac] sm:$0xf]  ;;  %v4796_v43 = vor.u32 %v5311_v41, %v4795_v40  ;;  %v4797_v44 = vld [vmem:[%s5907_s30 + $0xb4] sm:$0xf0]  ;;  %v4803_v45 = vld [vmem:[%s5907_s30 + $0xb0] sm:$0xf]  ;;  %s7244_s15 = scalar_lea.vmem %s7192_s11, %s5894_s19 }
 0x14d   : > { %v5312_v46 = vld [vmem:[%s5907_s30 + $0xb8] sm:$0xf0]  ;;  %v4800_v47 = vor.u32 %v5310_v42, %v4797_v44  ;;  %v4783_v49 = vld [vmem:[%s5907_s30 + $0x90] sm:$0xf]  ;;  %v5307_v51 = vld [vmem:[%s5907_s30 + $0x94] sm:$0xf] }
 0x14e   : > { %v4804_v48 = vor.u32 %v5312_v46, %v4803_v45  ;;  %1261 = vmatpush.bf16.msra.mxu0 %v4796_v43  ;;  %v5308_v50 = vld [vmem:[%s5907_s30 + $0x98] sm:$0xf0]  ;;  %v4785_v53 = vld [vmem:[%s5907_s30 + $0x9c] sm:$0xf0]  ;;  %v4791_v54 = vld [vmem:[%s5907_s30 + $0x98] sm:$0xf] }
 0x14f   : > { %1280 = vmatpush.bf16.msra.mxu1 %v4800_v47  ;;  %v4784_v52 = vor.u32 %v5308_v50, %v4783_v49  ;;  %v5309_v55 = vld [vmem:[%s5907_s30 + $0xa0] sm:$0xf0]  ;;  %v4788_v56 = vor.u32 %v5307_v51, %v4785_v53  ;;  %v4771_v58 = vld [vmem:[%s5907_s30 + $0x78] sm:$0xf]  ;;  %v5304_v60 = vld [vmem:[%s5907_s30 + $0x7c] sm:$0xf] }
 0x150   : > { %1299 = vmatpush.bf16.msra.mxu2 %v4804_v48  ;;  %v4792_v57 = vor.u32 %v5309_v55, %v4791_v54  ;;  %v5305_v59 = vld [vmem:[%s5907_s30 + $0x80] sm:$0xf0]  ;;  %v4773_v62 = vld [vmem:[%s5907_s30 + $0x84] sm:$0xf0]  ;;  %v4779_v63 = vld [vmem:[%s5907_s30 + $0x80] sm:$0xf] }
 0x151   : > { %v5491_v19 = vpop.eup %5490  ;;  %v4772_v61 = vor.u32 %v5305_v59, %v4771_v58  ;;  %v5306_v0 = vld [vmem:[%s5907_s30 + $0x88] sm:$0xf0]  ;;  %v4776_v1 = vor.u32 %v5304_v60, %v4773_v62  ;;  %v4759_v3 = vld [vmem:[%s5907_s30 + $0x60] sm:$0xf]  ;;  %v5301_v5 = vld [vmem:[%s5907_s30 + $0x64] sm:$0xf] }
 0x152   : > { %v1013_v20 = vmul.f32 128.0, %v5491_v19  ;;  %vm1017_vm13 = vweird.f32 %v5491_v19  ;;  %1262 = vmatpush.bf16.msra.mxu0 %v4784_v52  ;;  %v4780_v2 = vor.u32 %v5306_v0, %v4779_v63  ;;  %v5302_v4 = vld [vmem:[%s5907_s30 + $0x68] sm:$0xf0]  ;;  %v4761_v7 = vld [vmem:[%s5907_s30 + $0x6c] sm:$0xf0]  ;;  %vm1496_vm12 = vcmask 257024  }
 0x153   : > { %1010 = vadd.xlane.f32.xlu1 %v1003_v17  ;;  %1006 = vadd.xlane.f32.xlu0 %v1001_v18  ;;  %v4760_v6 = vor.u32 %v5302_v4, %v4759_v3  ;;  %v4767_v8 = vld [vmem:[%s5907_s30 + $0x68] sm:$0xf]  ;;  %v5303_v9 = vld [vmem:[%s5907_s30 + $0x70] sm:$0xf0]  ;;  %v4764_v10 = vor.u32 %v5301_v5, %v4761_v7  ;;  %v4755_v15 = vld [vmem:[%s5907_s30 + $0x50] sm:$0xf] }
 0x154   : > { %v1014_v16 = vsub.f32 1.0, %v1013_v20  ;;  %1281 = vmatpush.bf16.msra.mxu1 %v4788_v56  ;;  %1300 = vmatpush.bf16.msra.mxu2 %v4792_v57  ;;  %v4768_v11 = vor.u32 %v5303_v9, %v4767_v8  ;;  %v4747_v12 = vld [vmem:[%s5907_s30 + $0x48] sm:$0xf]  ;;  %v4731_v40 = vld [vmem:[%s5907_s30 + $0x20] sm:$0xf]  ;;  %s7245_s20 = sld [smem:[#allocation22_spill]] }
 0x155   : > { %v5294_v41 = vld [vmem:[%s5907_s30 + $0x28] sm:$0xf0]  ;;  %v4711_v44 = vld [vmem:[%s5907_s30] sm:$0xf]  ;;  %v5289_v46 = vld [vmem:[%s5907_s30 + $0x4] sm:$0xf] }
 0x156   : > { %v1015_v21 = vmul.f32 %v5491_v19, %v1014_v16  ;;  %1263 = vmatpush.bf16.msra.mxu0 %v4772_v61  ;;  %v4732_v43 = vor.u32 %v5294_v41, %v4731_v40  ;;  %v5290_v45 = vld [vmem:[%s5907_s30 + $0x8] sm:$0xf0]  ;;  %v4713_v48 = vld [vmem:[%s5907_s30 + $0xc] sm:$0xf0]  ;;  %v4719_v49 = vld [vmem:[%s5907_s30 + $0x8] sm:$0xf] }
 0x157   : > { %v4712_v47 = vor.u32 %v5290_v45, %v4711_v44  ;;  %v5291_v50 = vld [vmem:[%s5907_s30 + $0x10] sm:$0xf0]  ;;  %v4716_v51 = vor.u32 %v5289_v46, %v4713_v48  ;;  %s7247_s25 = sld [smem:[#allocation12_spill]] }
 0x158   : > { %v1016_v22 = vadd.f32 %v5491_v19, %v1015_v21  ;;  %1282 = vmatpush.bf16.msra.mxu1 %v4776_v1  ;;  %1301 = vmatpush.bf16.msra.mxu2 %v4780_v2  ;;  %v4735_v21 = vld [vmem:[%s5907_s30 + $0x30] sm:$0xf]  ;;  %v4720_v52 = vor.u32 %v5291_v50, %v4719_v49 }
 0x15a   : > { %v6020_v23 = vsel %vm1017_vm13, %v5491_v19, %v1016_v22  ;;  %1264 = vmatpush.bf16.msra.mxu0 %v4760_v6  ;;  %v5300_v19 = vld [vmem:[%s5907_s30 + $0x58] sm:$0xf0]  ;;  %vm1667_vm13 = vcmask 519424   ;;  %s7246_s24 = scalar_lea.vmem %s7245_s20, %s5894_s19 }
 0x15b   : > { %v4756_v16 = vor.u32 %v5300_v19, %v4755_v15  ;;  %v5296_v22 = vld [vmem:[%s5907_s30 + $0x38] sm:$0xf0] }
 0x15c   : > { %1283 = vmatpush.bf16.msra.mxu1 %v4764_v10  ;;  %1302 = vmatpush.bf16.msra.mxu2 %v4768_v11 }
 0x160   : > { %1303 = vmatpush.bf16.msra.mxu2 %v4756_v16 }
 0x1be   : > { %v1009_v24 = vpop.xlane.xlu1 %1008  ;;  %v1005_v25 = vpop.xlane.xlu0 %1004 }
 0x1bf   : > { %v1021_v26 = vmul.f32 %v6020_v23, %v1009_v24  ;;  %v1019_v27 = vmul.f32 %v6020_v23, %v1005_v25  ;;  %v5295_v24 = vld [vmem:[%s5907_s30 + $0x34] sm:$0xf]  ;;  %v4736_v25 = vor.u32 %v5296_v22, %v4735_v21 }
 0x1c1   : > { %v6024_v28 = vsub.f32 %v1002_v13, %v1021_v26  ;;  %v6026_v29 = vsub.f32 %v1000_v14, %v1019_v27  ;;  %v5299_v13 = vld [vmem:[%s5907_s30 + $0x50] sm:$0xf0]  ;;  %v5298_v14 = vld [vmem:[%s5907_s30 + $0x4c] sm:$0xf]  ;;  %v4737_v26 = vld [vmem:[%s5907_s30 + $0x3c] sm:$0xf0] }
 0x1c2   : > { %v4743_v27 = vld [vmem:[%s5907_s30 + $0x38] sm:$0xf] }
 0x1c3   : > { %v1029_v30 = vmul.f32 %v6024_v28, %v6024_v28  ;;  %v1027_v31 = vmul.f32 %v6026_v29, %v6026_v29 }
 0x1c5   : > { %1035 = vadd.xlane.f32.xlu0 %v1029_v30  ;;  %1031 = vadd.xlane.f32.xlu2 %v1027_v31  ;;  %v5297_v30 = vld [vmem:[%s5907_s30 + $0x40] sm:$0xf0]  ;;  %v4740_v31 = vor.u32 %v5295_v24, %v4737_v26 }
 0x1c6   : > { %v1011_v32 = vpop.xlane.xlu1 %1010  ;;  %v1007_v33 = vpop.xlane.xlu0 %1006 }
 0x1c7   : > { %v1022_v34 = vmul.f32 %v6020_v23, %v1011_v32  ;;  %v1020_v35 = vmul.f32 %v6020_v23, %v1007_v33  ;;  %v4744_v32 = vor.u32 %v5297_v30, %v4743_v27  ;;  %v4723_v33 = vld [vmem:[%s5907_s30 + $0x18] sm:$0xf] }
 0x1c9   : > { %v6034_v36 = vsub.f32 %v1001_v18, %v1020_v35  ;;  %v6036_v37 = vsub.f32 %v1003_v17, %v1022_v34  ;;  %v4748_v17 = vor.u32 %v5299_v13, %v4747_v12  ;;  %v4749_v18 = vld [vmem:[%s5907_s30 + $0x54] sm:$0xf0]  ;;  %1304 = vmatpush.bf16.msra.mxu2 %v4744_v32  ;;  %v5293_v34 = vld [vmem:[%s5907_s30 + $0x20] sm:$0xf0]  ;;  %v5292_v35 = vld [vmem:[%s5907_s30 + $0x1c] sm:$0xf] }
 0x1ca   : > { %v4752_v20 = vor.u32 %v5298_v14, %v4749_v18 }
 0x1cb   : > { %v1030_v38 = vmul.f32 %v6036_v37, %v6036_v37  ;;  %v1028_v39 = vmul.f32 %v6034_v36, %v6034_v36  ;;  %1265 = vmatpush.bf16.msra.mxu0 %v4748_v17 }
 0x1cc   : > { %1284 = vmatpush.bf16.msra.mxu1 %v4752_v20 }
 0x1cd   : > { %1037 = vadd.xlane.f32.xlu1 %v1030_v38  ;;  %1033 = vadd.xlane.f32.xlu2 %v1028_v39  ;;  %v4724_v38 = vor.u32 %v5293_v34, %v4723_v33  ;;  %v4725_v39 = vld [vmem:[%s5907_s30 + $0x24] sm:$0xf0]  ;;  %s5771_s30 = smov 64  }
 0x1ce   : > { %v4728_v42 = vor.u32 %v5292_v35, %v4725_v39  ;;  %1305 = vmatpush.bf16.msra.mxu2 %v4732_v43 }
 0x1cf   : > { %1266 = vmatpush.bf16.msra.mxu0 %v4736_v25 }
 0x1d0   : > { %1285 = vmatpush.bf16.msra.mxu1 %v4740_v31 }
 0x1d2   : > { %1306 = vmatpush.bf16.msra.mxu2 %v4720_v52 }
 0x1d3   : > { %1267 = vmatpush.bf16.msra.mxu0 %v4724_v38  ;;  %v1125_v38 = vld [vmem:[%s5916_s17] sm:$0x7]  ;;  %s5770_s17 = smov 96  }
 0x1d4   : > { %1286 = vmatpush.bf16.msra.mxu1 %v4728_v42  ;;  %v1127_v39 = vperm.slane %v1125_v38, 0  ;;  %v1128_v40 = vperm.slane %v1125_v38, 1 }
 0x1d7   : > { %1268 = vmatpush.bf16.msra.mxu0 %v4712_v47 }
 0x1d8   : > { %1287 = vmatpush.bf16.msra.mxu1 %v4716_v51 }
 0x238   : > { %v1032_v53 = vpop.xlane.xlu2 %1031  ;;  %v1036_v56 = vpop.xlane.xlu0 %1035 }
 0x239   : > { %v1039_v54 = vmul.f32 %v1032_v53, %v6020_v23  ;;  %v1041_v57 = vmul.f32 %v1036_v56, %v6020_v23 }
 0x23b   : > { %v1043_v55 = vadd.f32 1e-06, %v1039_v54  ;;  %v1045_v2 = vadd.f32 1e-06, %v1041_v57 }
 0x23d   : > { %5492 = vrsqrt.f32 %v1043_v55  ;;  %vm1053_vm15 = vweird.f32 %v1043_v55  ;;  %vm1073_vm6 = vweird.f32 %v1045_v2 }
 0x240   : > { %v1038_v58 = vpop.xlane.xlu1 %1037  ;;  %v1034_v59 = vpop.xlane.xlu2 %1033 }
 0x241   : > { %v1042_v60 = vmul.f32 %v1038_v58, %v6020_v23  ;;  %v1040_v61 = vmul.f32 %v1034_v59, %v6020_v23 }
 0x243   : > { %v5493_v62 = vpop.eup %5492  ;;  %v1046_v63 = vadd.f32 1e-06, %v1042_v60  ;;  %v1044_v0 = vadd.f32 1e-06, %v1040_v61 }
 0x244   : > { %v1048_v1 = vmul.f32 %v5493_v62, %v1043_v55  ;;  %vm1054_vm14 = vweird.f32 %v5493_v62 }
 0x245   : > { %5494 = vrsqrt.f32 %v1046_v63  ;;  %vm1055_vm1 = vmor %vm1053_vm15, %vm1054_vm14  ;;  %vm1063_vm2 = vweird.f32 %v1044_v0  ;;  %vm1083_vm4 = vweird.f32 %v1046_v63  ;;  %vm1838_vm14 = vcmask 781824  }
 0x246   : > { %v1049_v3 = vmul.f32 %v5493_v62, %v1048_v1  ;;  %5496 = vrsqrt.f32 %v1044_v0  ;;  %vm2009_vm15 = vcmask 1044224  }
 0x247   : > { %5498 = vrsqrt.f32 %v1045_v2 }
 0x248   : > { %v1050_v4 = vmul.f32 0.5, %v1049_v3 }
 0x24a   : > { %v1051_v7 = vsub.f32 1.5, %v1050_v4 }
 0x24b   : > { %v5495_v5 = vpop.eup %5494 }
 0x24c   : > { %v5497_v6 = vpop.eup %5496  ;;  %v1078_v10 = vmul.f32 %v5495_v5, %v1046_v63  ;;  %v1052_v12 = vmul.f32 %v5493_v62, %v1051_v7  ;;  %vm1084_vm5 = vweird.f32 %v5495_v5 }
 0x24d   : > { %v1058_v8 = vmul.f32 %v5497_v6, %v1044_v0  ;;  %v5499_v9 = vpop.eup %5498  ;;  %vm1064_vm0 = vweird.f32 %v5497_v6  ;;  %vm1085_vm8 = vmor %vm1083_vm4, %vm1084_vm5  ;;  %v1129_v0 = vperm.slane %v1125_v38, 2 }
 0x24e   : > { %v1068_v13 = vmul.f32 %v5499_v9, %v1045_v2  ;;  %v1079_v17 = vmul.f32 %v5495_v5, %v1078_v10  ;;  %v1056_v20 = vsel %vm1055_vm1, %v5493_v62, %v1052_v12  ;;  %vm1065_vm3 = vmor %vm1063_vm2, %vm1064_vm0  ;;  %vm1074_vm7 = vweird.f32 %v5499_v9 }
 0x24f   : > { %v1059_v11 = vmul.f32 %v5497_v6, %v1058_v8  ;;  %v1087_v22 = vmul.f32 %v1056_v20, %v6026_v29  ;;  %vm1075_vm9 = vmor %vm1073_vm6, %vm1074_vm7 }
 0x250   : > { %v1069_v15 = vmul.f32 %v5499_v9, %v1068_v13  ;;  %v1080_v16 = vmul.f32 0.5, %v1079_v17 }
 0x251   : > { %v1060_v14 = vmul.f32 0.5, %v1059_v11 }
 0x252   : > { %v1070_v25 = vmul.f32 0.5, %v1069_v15  ;;  %v1081_v27 = vsub.f32 1.5, %v1080_v16 }
 0x253   : > { %v1061_v18 = vsub.f32 1.5, %v1060_v14 }
 0x254   : > { %v1071_v30 = vsub.f32 1.5, %v1070_v25  ;;  %v1082_v31 = vmul.f32 %v5495_v5, %v1081_v27 }
 0x255   : > { %v1062_v19 = vmul.f32 %v5497_v6, %v1061_v18 }
 0x256   : > { %v1072_v32 = vmul.f32 %v5499_v9, %v1071_v30  ;;  %v1086_v33 = vsel %vm1085_vm8, %v5495_v5, %v1082_v31 }
 0x257   : > { %v1066_v21 = vsel %vm1065_vm3, %v5497_v6, %v1062_v19 }
 0x258   : > { %v1088_v24 = vmul.f32 %v1066_v21, %v6034_v36  ;;  %v1076_v29 = vsel %vm1075_vm9, %v5499_v9, %v1072_v32  ;;  %v1090_v36 = vmul.f32 %v1086_v33, %v6036_v37 }
 0x259   : > { %v1089_v34 = vmul.f32 %v1076_v29, %v6024_v28 }
 0x25a   : > { %v1091_v26 = vpack.c.bf16 %v1088_v24, %v1087_v22 }
 0x25b   : > { %v1092_v35 = vpack.c.bf16 %v1090_v36, %v1089_v34 }
 0x25c   : > { %1269 = vmatmul.bf16.vlgmr.msra.gmra.mxu0 %v1091_v26  ;;  %1288 = vmatmul.bf16.vlgmr.msra.gmra.mxu1 %v1091_v26 }
 0x25d   : > { %1307 = vmatmul.bf16.vlgmr.msra.gmra.mxu2 %v1091_v26 }
 0x26c   : > { %1274 = vmatmul.bf16.gmra.mxu0 %v1092_v35  ;;  %1293 = vmatmul.bf16.gmra.mxu1 %v1092_v35 }
 0x26d   : > { %1312 = vmatmul.bf16.gmra.mxu2 %v1092_v35 }
 0x2d9   : > { %v1270_v41 = vpop.f32.mrf.mxu0  ;;  %v1289_v42 = vpop.f32.mrf.mxu1 }
 0x2da   : > { %v1271_v43 = vadd.f32 %v1270_v41, %v1127_v39  ;;  %v1290_v44 = vadd.f32 %v1289_v42, %v1128_v40 }
 0x2dc   : > { %v1318_v45 = vpack.c.bf16 %v1290_v44, %v1271_v43 }
 0x2de   : > { %v1330_v37 = vrot.slane %v1318_v45, 4  ;;  %v1334_v28 = vunpack.c.l.b16 %v1318_v45 }
 0x2e0   : > { %v1308_v46 = vpop.f32.mrf.mxu2  ;;  %v1337_v54 = vunpack.c.l.b16 %v1330_v37 }
 0x2e1   : > { %v1272_v47 = vpop.f32.mrf.mxu0  ;;  %v1291_v48 = vpop.f32.mrf.mxu1  ;;  %v1309_v6 = vadd.f32 %v1308_v46, %v1129_v0 }
 0x2e2   : > { %v1273_v49 = vadd.f32 %v1272_v47, %v1127_v39  ;;  %v1292_v50 = vadd.f32 %v1291_v48, %v1128_v40 }
 0x2e3   : > { %v1319_v12 = vpack.c.bf16 %v1309_v6, %v1309_v6 }
 0x2e4   : > { %v1320_v51 = vpack.c.bf16 %v1292_v50, %v1273_v49 }
 0x2e5   : > { %v1443_v22 = vunpack.c.l.b16 %v1319_v12 }
 0x2e6   : > { %v1331_v52 = vrot.slane %v1320_v51, 4  ;;  %v1335_v53 = vunpack.c.l.b16 %v1320_v51 }
 0x2e8   : > { %v1338_v55 = vunpack.c.l.b16 %v1331_v52  ;;  %v1310_v56 = vpop.f32.mrf.mxu2  ;;  %v1336_v57 = vpack.c.b16 %v1335_v53, %v1334_v28 }
 0x2e9   : > { %v1275_v58 = vpop.f32.mrf.mxu0  ;;  %v1294_v59 = vpop.f32.mrf.mxu1  ;;  %v1311_v1 = vadd.f32 %v1310_v56, %v1129_v0 }
 0x2ea   : > { %1501 = vrot.lane.b32.xlu0 %v1336_v57, %s5770_s17  ;;  %v1339_v60 = vpack.c.b16 %v1338_v55, %v1337_v54  ;;  %v1276_v61 = vadd.f32 %v1275_v58, %v1127_v39  ;;  %v1295_v62 = vadd.f32 %v1294_v59, %v1128_v40 }
 0x2eb   : > { %v1321_v9 = vpack.c.bf16 %v1311_v1, %v1311_v1 }
 0x2ec   : > { %1503 = vrot.lane.b32.xlu2 %v1339_v60, %s5770_s17  ;;  %v1345_v63 = vsel %vm1340_vm10, %v1339_v60, 0  ;;  %v1322_v2 = vpack.c.bf16 %v1295_v62, %v1276_v61 }
 0x2ed   : > { %1354 = vmatpush.bf16.xpose.msra.mxu3 %v1345_v63  ;;  %v1444_v18 = vunpack.c.l.b16 %v1321_v9 }
 0x2ee   : > { %v1332_v10 = vrot.slane %v1322_v2, 4  ;;  %v1361_v13 = vunpack.c.l.b16 %v1322_v2 }
 0x2ef   : > { %v6105_v26 = vpack.c.b16 %v1444_v18, %v1443_v22 }
 0x2f0   : > { %v1313_v3 = vpop.f32.mrf.mxu2  ;;  %v1364_v15 = vunpack.c.l.b16 %v1332_v10 }
 0x2f1   : > { %v1277_v4 = vpop.f32.mrf.mxu0  ;;  %v1296_v5 = vpop.f32.mrf.mxu1  ;;  %v1314_v24 = vadd.f32 %v1313_v3, %v1129_v0 }
 0x2f2   : > { %v1278_v7 = vadd.f32 %v1277_v4, %v1127_v39  ;;  %v1297_v8 = vadd.f32 %v1296_v5, %v1128_v40 }
 0x2f3   : > { %v1323_v31 = vpack.c.bf16 %v1314_v24, %v1314_v24 }
 0x2f4   : > { %v1324_v11 = vpack.c.bf16 %v1297_v8, %v1278_v7  ;;  %1674 = vrot.lane.b32.xlu2 %v1339_v60, %s5771_s30  ;;  %4805 = vmatmul.msk.bf16.vlgmr.msra.gmra.mxu3 %vm1340_vm10, %v1336_v57 }
 0x2f5   : > { %v1471_v33 = vunpack.c.l.b16 %v1323_v31 }
 0x2f6   : > { %v1333_v14 = vrot.slane %v1324_v11, 4  ;;  %v1362_v17 = vunpack.c.l.b16 %v1324_v11 }
 0x2f8   : > { %v1365_v19 = vunpack.c.l.b16 %v1333_v14  ;;  %v1315_v20 = vpop.f32.mrf.mxu2  ;;  %v1363_v16 = vpack.c.b16 %v1362_v17, %v1361_v13 }
 0x2f9   : > { %v1316_v21 = vadd.f32 %v1315_v20, %v1129_v0 }
 0x2fa   : > { %1525 = vrot.lane.b32.xlu0 %v1363_v16, %s5770_s17  ;;  %v1366_v25 = vpack.c.b16 %v1365_v19, %v1364_v15 }
 0x2fb   : > { %v1325_v27 = vpack.c.bf16 %v1316_v21, %v1316_v21 }
 0x2fc   : > { %1672 = vrot.lane.b32.xlu2 %v1336_v57, %s5771_s30  ;;  %1527 = vrot.lane.b32.xlu1 %v1366_v25, %s5770_s17  ;;  %v1371_v30 = vsel %vm1340_vm10, %v1366_v25, 0 }
 0x2fd   : > { %1380 = vmatpush.bf16.xpose.msrb.mxu3 %v1371_v30  ;;  %v1472_v32 = vunpack.c.l.b16 %v1325_v27 }
 0x2ff   : > { %v6112_v29 = vpack.c.b16 %v1472_v32, %v1471_v33 }
 0x302   : > { %1845 = vrot.lane.b32.xlu0 %v1339_v60, %s5772_s26 }
 0x304   : > { %1696 = vrot.lane.b32.xlu2 %v1363_v16, %s5771_s30  ;;  %1698 = vrot.lane.b32.xlu1 %v1366_v25, %s5771_s30 }
 0x305   : > { %1457 = vmatpush.bf16.msra.mxu3 %v6105_v26 }
 0x306   : > { %4806 = vmatmul.msk.bf16.vlgmr.msrb.gmra.mxu3 %vm1340_vm10, %v1363_v16 }
 0x309   : > { %1485 = vmatpush.bf16.msrb.mxu3 %v6112_v29 }
 0x30a   : > { %1869 = vrot.lane.b32.xlu0 %v1366_v25, %s5772_s26 }
 0x30c   : > { %1867 = vrot.lane.b32.xlu2 %v1363_v16, %s5772_s26  ;;  %1843 = vrot.lane.b32.xlu1 %v1336_v57, %s5772_s26 }
 0x312   : > { %1602 = vrot.lane.b32.xlu0 %v6105_v26, %s5770_s17 }
 0x314   : > { %1627 = vrot.lane.b32.xlu2 %v6112_v29, %s5770_s17 }
 0x346   : > { %v1504_v36 = vpop.permute.xlu2 %1503 }
 0x347   : > { %v1509_v34 = vsel %vm1340_vm10, %v1504_v36, 0 }
 0x348   : > { %1518 = vmatpush.bf16.xpose.msrb.mxu1 %v1509_v34 }
 0x34e   : > { %v1675_v35 = vpop.permute.xlu2 %1674 }
 0x34f   : > { %v1680_v38 = vsel %vm1340_vm10, %v1675_v35, 0 }
 0x350   : > { %1689 = vmatpush.bf16.xpose.msrb.mxu0 %v1680_v38 }
 0x356   : > { %v1673_v39 = vpop.permute.xlu2 %1672 }
 0x357   : > { %4813 = vmatmul.msk.bf16.vlgmr.msrb.gmra.mxu0 %vm1340_vm10, %v1673_v39 }
 0x35c   : > { %v1502_v40 = vpop.permute.xlu0 %1501 }
 0x35d   : > { %4809 = vmatmul.msk.bf16.vlgmr.msrb.gmra.mxu1 %vm1340_vm10, %v1502_v40 }
 0x35e   : > { %v1697_v54 = vpop.permute.xlu2 %1696 }
 0x366   : > { %v1868_v59 = vpop.permute.xlu2 %1867 }
 0x36c   : > { %v1526_v41 = vpop.permute.xlu0 %1525 }
 0x36e   : > { %v1528_v42 = vpop.permute.xlu1 %1527  ;;  %v6159_v9 = vpop.permute.xlu2 %1627 }
 0x36f   : > { %v1533_v43 = vsel %vm1340_vm10, %v1528_v42, 0 }
 0x370   : > { %1542 = vmatpush.bf16.xpose.msra.mxu1 %v1533_v43 }
 0x374   : > { %v1846_v44 = vpop.permute.xlu0 %1845 }
 0x375   : > { %v1851_v45 = vsel %vm1340_vm10, %v1846_v44, 0 }
 0x376   : > { %v1699_v46 = vpop.permute.xlu1 %1698  ;;  %1860 = vmatpush.bf16.xpose.msra.mxu0 %v1851_v45 }
 0x377   : > { %v1704_v47 = vsel %vm1340_vm10, %v1699_v46, 0  ;;  %v1356_v48 = vpop.f32.mrf.mxu3  ;;  %4810 = vmatmul.msk.bf16.vlgmr.msra.gmra.mxu1 %vm1340_vm10, %v1526_v41 }
 0x378   : > { %1713 = vmatpush.bf16.xpose.msrb.mxu1 %v1704_v47  ;;  %v1388_v49 = vsel %vm1387_vm11, %v1356_v48, -inf }
 0x379   : > { %1389 = vmax.xlane.f32.xlu1 %v1388_v49 }
 0x37c   : > { %v1870_v50 = vpop.permute.xlu0 %1869 }
 0x37d   : > { %v1875_v37 = vsel %vm1340_vm10, %v1870_v50, 0 }
 0x37e   : > { %v1844_v51 = vpop.permute.xlu1 %1843 }
 0x37f   : > { %v1358_v28 = vpop.f32.mrf.mxu3  ;;  %4817 = vmatmul.msk.bf16.vlgmr.msra.gmra.mxu0 %vm1340_vm10, %v1844_v51 }
 0x380   : > { %1884 = vmatpush.bf16.xpose.msra.mxu1 %v1875_v37  ;;  %v1391_v52 = vsel %vm1387_vm11, %v1358_v28, -inf }
 0x381   : > { %1392 = vmax.xlane.f32.xlu0 %v1391_v52 }
 0x384   : > { %v1603_v53 = vpop.permute.xlu0 %1602 }
 0x385   : > { %1615 = vmatpush.bf16.msrb.mxu2 %v1603_v53 }
 0x387   : > { %4814 = vmatmul.msk.bf16.vlgmr.msrb.gmra.mxu1 %vm1340_vm10, %v1697_v54 }
 0x389   : > { %v1382_v55 = vpop.f32.mrf.mxu3 }
 0x38a   : > { %v1394_v56 = vsel %vm1387_vm11, %v1382_v55, -inf }
 0x38b   : > { %1395 = vmax.xlane.f32.xlu2 %v1394_v56 }
 0x391   : > { %v1384_v57 = vpop.f32.mrf.mxu3 }
 0x392   : > { %v1397_v58 = vsel %vm1387_vm11, %v1384_v57, -inf }
 0x393   : > { %1398 = vmax.xlane.f32.xlu1 %v1397_v58 }
 0x397   : > { %4818 = vmatmul.msk.bf16.vlgmr.msra.gmra.mxu1 %vm1340_vm10, %v1868_v59 }
 0x3d4   : > { %v6141_v60 = vpop.f32.mrf.mxu0 }
 0x3d5   : > { %v1720_v61 = vsel %vm1387_vm11, %v6141_v60, -inf }
 0x3d6   : > { %1721 = vmax.xlane.f32.xlu2 %v1720_v61 }
 0x3da   : > { %v6145_v62 = vpop.f32.mrf.mxu1 }
 0x3db   : > { %v1549_v63 = vsel %vm1387_vm11, %v6145_v62, -inf }
 0x3dc   : > { %v6149_v0 = vpop.f32.mrf.mxu0  ;;  %1550 = vmax.xlane.f32.xlu0 %v1549_v63 }
 0x3dd   : > { %v1723_v1 = vsel %vm1387_vm11, %v6149_v0, -inf }
 0x3de   : > { %1724 = vmax.xlane.f32.xlu1 %v1723_v1 }
 0x3e2   : > { %v6153_v2 = vpop.f32.mrf.mxu1 }
 0x3e3   : > { %v1552_v3 = vsel %vm1387_vm11, %v6153_v2, -inf }
 0x3e4   : > { %1553 = vmax.xlane.f32.xlu2 %v1552_v3 }
 0x3ec   : > { %v1390_v4 = vpop.xlane.xlu1 %1389 }
 0x3ed   : > { %v1400_v5 = vsub.f32 %v1356_v48, %v1390_v4 }
 0x3ef   : > { %v1404_v6 = vmul.f32 1.442695, %v1400_v5 }
 0x3f1   : > { %5500 = vpow2.f32 %v1404_v6 }
 0x3f4   : > { %v6157_v7 = vpop.f32.mrf.mxu1  ;;  %v1393_v8 = vpop.xlane.xlu0 %1392 }
 0x3f5   : > { %v1401_v10 = vsub.f32 %v1358_v28, %v1393_v8  ;;  %v1555_v11 = vsel %vm1387_vm11, %v6157_v7, -inf }
 0x3f6   : > { %1556 = vmax.xlane.f32.xlu1 %v1555_v11 }
 0x3f7   : > { %v6163_v12 = vpop.eup %5500  ;;  %v1406_v13 = vmul.f32 1.442695, %v1401_v10 }
 0x3f8   : > { %v1412_v14 = vsel %vm1387_vm11, %v6163_v12, 0.0 }
 0x3f9   : > { %1413 = vadd.xlane.f32.xlu2 %v1412_v14  ;;  %5502 = vpow2.f32 %v1406_v13 }
 0x3fc   : > { %v6167_v17 = vpop.f32.mrf.mxu1  ;;  %v6169_v18 = vpop.f32.mrf.mxu0 }
 0x3fd   : > { %v1558_v19 = vsel %vm1387_vm11, %v6167_v17, -inf  ;;  %v1891_v20 = vsel %vm1387_vm11, %v6169_v18, -inf }
 0x3fe   : > { %v1396_v15 = vpop.xlane.xlu2 %1395  ;;  %1559 = vmax.xlane.f32.xlu0 %v1558_v19  ;;  %1892 = vmax.xlane.f32.xlu1 %v1891_v20 }
 0x3ff   : > { %v1402_v16 = vsub.f32 %v1382_v55, %v1396_v15  ;;  %v6175_v22 = vpop.eup %5502 }
 0x400   : > { %v1415_v31 = vsel %vm1387_vm11, %v6175_v22, 0.0 }
 0x401   : > { %v1408_v21 = vmul.f32 1.442695, %v1402_v16 }
 0x403   : > { %5504 = vpow2.f32 %v1408_v21 }
 0x404   : > { %v6177_v24 = vpop.f32.mrf.mxu1  ;;  %v6179_v25 = vpop.f32.mrf.mxu0 }
 0x405   : > { %v1894_v30 = vsel %vm1387_vm11, %v6179_v25, -inf  ;;  %v1726_v38 = vsel %vm1387_vm11, %v6177_v24, -inf }
 0x406   : > { %v1399_v27 = vpop.xlane.xlu1 %1398  ;;  %1895 = vmax.xlane.f32.xlu0 %v1894_v30  ;;  %1416 = vadd.xlane.f32.xlu1 %v1415_v31 }
 0x407   : > { %v1403_v32 = vsub.f32 %v1384_v57, %v1399_v27 }
 0x409   : > { %v1410_v33 = vmul.f32 1.442695, %v1403_v32  ;;  %v6185_v36 = vpop.eup %5504 }
 0x40a   : > { %v1418_v39 = vsel %vm1387_vm11, %v6185_v36, 0.0 }
 0x40b   : > { %5506 = vpow2.f32 %v1410_v33 }
 0x40c   : > { %v6187_v34 = vpop.f32.mrf.mxu1 }
 0x40d   : > { %v1729_v35 = vsel %vm1387_vm11, %v6187_v34, -inf }
 0x40e   : > { %1730 = vmax.xlane.f32.xlu2 %v1729_v35  ;;  %1727 = vmax.xlane.f32.xlu0 %v1726_v38 }
 0x40f   : > { %1419 = vadd.xlane.f32.xlu1 %v1418_v39 }
 0x411   : > { %v6195_v40 = vpop.eup %5506 }
 0x412   : > { %v1421_v42 = vsel %vm1387_vm11, %v6195_v40, 0.0 }
 0x414   : > { %v6197_v41 = vpop.f32.mrf.mxu1 }
 0x415   : > { %v1897_v44 = vsel %vm1387_vm11, %v6197_v41, -inf }
 0x416   : > { %1422 = vadd.xlane.f32.xlu0 %v1421_v42 }
 0x41c   : > { %v6201_v43 = vpop.f32.mrf.mxu1 }
 0x41d   : > { %v1900_v45 = vsel %vm1387_vm11, %v6201_v43, -inf }
 0x41e   : > { %1898 = vmax.xlane.f32.xlu0 %v1897_v44  ;;  %1901 = vmax.xlane.f32.xlu2 %v1900_v45 }
 0x432   : > { %1773 = vrot.lane.b32.xlu0 %v6105_v26, %s5771_s30 }
 0x449   : > { %v1722_v46 = vpop.xlane.xlu2 %1721 }
 0x44a   : > { %v1732_v49 = vsub.f32 %v6141_v60, %v1722_v46 }
 0x44c   : > { %v1736_v37 = vmul.f32 1.442695, %v1732_v49 }
 0x44f   : > { %v1551_v47 = vpop.xlane.xlu0 %1550 }
 0x450   : > { %v1561_v48 = vsub.f32 %v6145_v62, %v1551_v47 }
 0x451   : > { %v1725_v51 = vpop.xlane.xlu1 %1724 }
 0x452   : > { %v1565_v50 = vmul.f32 1.442695, %v1561_v48  ;;  %v1733_v54 = vsub.f32 %v6149_v0, %v1725_v51 }
 0x454   : > { %5508 = vpow2.f32 %v1565_v50  ;;  %v1738_v57 = vmul.f32 1.442695, %v1733_v54 }
 0x455   : > { %5510 = vpow2.f32 %v1736_v37 }
 0x457   : > { %v1554_v28 = vpop.xlane.xlu2 %1553 }
 0x458   : > { %v1562_v52 = vsub.f32 %v6153_v2, %v1554_v28 }
 0x45a   : > { %v6212_v53 = vpop.eup %5508  ;;  %v1567_v55 = vmul.f32 1.442695, %v1562_v52 }
 0x45b   : > { %v1573_v56 = vsel %vm1387_vm11, %v6212_v53, 0.0  ;;  %v6217_v58 = vpop.eup %5510 }
 0x45c   : > { %5512 = vpow2.f32 %v1567_v55  ;;  %1574 = vadd.xlane.f32.xlu2 %v1573_v56  ;;  %v1744_v61 = vsel %vm1387_vm11, %v6217_v58, 0.0 }
 0x45d   : > { %5514 = vpow2.f32 %v1738_v57 }
 0x462   : > { %v6219_v59 = vpop.eup %5512 }
 0x463   : > { %v1576_v60 = vsel %vm1387_vm11, %v6219_v59, 0.0  ;;  %v6225_v62 = vpop.eup %5514 }
 0x464   : > { %1577 = vadd.xlane.f32.xlu1 %v1576_v60  ;;  %1745 = vadd.xlane.f32.xlu2 %v1744_v61  ;;  %v1747_v1 = vsel %vm1387_vm11, %v6225_v62, 0.0 }
 0x469   : > { %v1557_v63 = vpop.xlane.xlu1 %1556 }
 0x46a   : > { %v1563_v0 = vsub.f32 %v6157_v7, %v1557_v63 }
 0x46c   : > { %v1569_v2 = vmul.f32 1.442695, %v1563_v0  ;;  %1748 = vadd.xlane.f32.xlu1 %v1747_v1  ;;  %v1414_v3 = vpop.xlane.xlu2 %1413 }
 0x46e   : > { %5516 = vpow2.f32 %v1569_v2 }
 0x46f   : > { %5518 = vrcp.f32 %v1414_v3 }
 0x471   : > { %v1893_v4 = vpop.xlane.xlu1 %1892  ;;  %v1560_v5 = vpop.xlane.xlu0 %1559 }
 0x472   : > { %v1564_v6 = vsub.f32 %v6167_v17, %v1560_v5  ;;  %v1903_v42 = vsub.f32 %v6169_v18, %v1893_v4 }
 0x474   : > { %v6231_v8 = vpop.eup %5516  ;;  %v1571_v10 = vmul.f32 1.442695, %v1564_v6  ;;  %v1907_v46 = vmul.f32 1.442695, %v1903_v42 }
 0x475   : > { %v1579_v11 = vsel %vm1387_vm11, %v6231_v8, 0.0  ;;  %v5519_v14 = vpop.eup %5518 }
 0x476   : > { %1580 = vadd.xlane.f32.xlu2 %v1579_v11  ;;  %5520 = vpow2.f32 %v1571_v10  ;;  %v1428_v19 = vmul.f32 %v5519_v14, %v6163_v12 }
 0x478   : > { %v1432_v16 = vpack.c.bf16 %v1428_v19, %v1428_v19 }
 0x479   : > { %v1417_v7 = vpop.xlane.xlu1 %1416  ;;  %v1896_v13 = vpop.xlane.xlu0 %1895 }
 0x47a   : > { %5522 = vrcp.f32 %v1417_v7  ;;  %v1438_v12 = vunpack.c.l.b16 %v1432_v16  ;;  %v1904_v48 = vsub.f32 %v6179_v25, %v1896_v13 }
 0x47c   : > { %v6235_v15 = vpop.eup %5520  ;;  %v1909_v37 = vmul.f32 1.442695, %v1904_v48 }
 0x47d   : > { %v1582_v17 = vsel %vm1387_vm11, %v6235_v15, 0.0 }
 0x47e   : > { %1583 = vadd.xlane.f32.xlu1 %v1582_v17 }
 0x480   : > { %v5523_v20 = vpop.eup %5522 }
 0x481   : > { %v1429_v21 = vmul.f32 %v5523_v20, %v6175_v22  ;;  %v1731_v27 = vpop.xlane.xlu2 %1730  ;;  %v1728_v30 = vpop.xlane.xlu0 %1727 }
 0x482   : > { %v1735_v31 = vsub.f32 %v6187_v34, %v1731_v27  ;;  %v1420_v32 = vpop.xlane.xlu1 %1419  ;;  %v1734_v33 = vsub.f32 %v6177_v24, %v1728_v30 }
 0x483   : > { %v1433_v35 = vpack.c.bf16 %v1429_v21, %v1429_v21  ;;  %5524 = vrcp.f32 %v1420_v32 }
 0x484   : > { %v1742_v38 = vmul.f32 1.442695, %v1735_v31  ;;  %v1740_v39 = vmul.f32 1.442695, %v1734_v33 }
 0x485   : > { %v1439_v44 = vunpack.c.l.b16 %v1433_v35 }
 0x486   : > { %5526 = vpow2.f32 %v1742_v38 }
 0x487   : > { %v1440_v45 = vpack.c.b16 %v1439_v44, %v1438_v12  ;;  %5528 = vpow2.f32 %v1740_v39 }
 0x489   : > { %4807 = vmatmul.msk.bf16.vlgmr.msra.gmra.mxu3 %vm1387_vm11, %v1440_v45  ;;  %v1423_v22 = vpop.xlane.xlu0 %1422  ;;  %v5525_v47 = vpop.eup %5524 }
 0x48a   : > { %1640 = vmatpush.bf16.msra.mxu3 %v6159_v9  ;;  %5530 = vrcp.f32 %v1423_v22  ;;  %v1430_v18 = vmul.f32 %v5525_v47, %v6185_v36 }
 0x48b   : > { %5532 = vpow2.f32 %v1907_v46 }
 0x48c   : > { %v6246_v24 = vpop.eup %5526  ;;  %v1434_v51 = vpack.c.bf16 %v1430_v18, %v1430_v18  ;;  %5534 = vpow2.f32 %v1909_v37 }
 0x48d   : > { %v6248_v34 = vpop.eup %5528  ;;  %v1753_v49 = vsel %vm1387_vm11, %v6246_v24, 0.0 }
 0x48e   : > { %1754 = vadd.xlane.f32.xlu0 %v1753_v49  ;;  %1798 = vrot.lane.b32.xlu2 %v6112_v29, %s5771_s30  ;;  %v1750_v9 = vsel %vm1387_vm11, %v6248_v34, 0.0  ;;  %v1466_v56 = vunpack.c.l.b16 %v1434_v51 }
 0x48f   : > { %1751 = vadd.xlane.f32.xlu1 %v1750_v9 }
 0x490   : > { %v5531_v50 = vpop.eup %5530 }
 0x491   : > { %v1431_v28 = vmul.f32 %v5531_v50, %v6195_v40  ;;  %v1902_v52 = vpop.xlane.xlu2 %1901  ;;  %v6260_v36 = vpop.eup %5532 }
 0x492   : > { %v1906_v25 = vsub.f32 %v6201_v43, %v1902_v52  ;;  %v1915_v60 = vsel %vm1387_vm11, %v6260_v36, 0.0  ;;  %v6265_v63 = vpop.eup %5534  ;;  %v1899_v43 = vpop.xlane.xlu0 %1898 }
 0x493   : > { %v1435_v54 = vpack.c.bf16 %v1431_v28, %v1431_v28  ;;  %v1918_v1 = vsel %vm1387_vm11, %v6265_v63, 0.0  ;;  %v1905_v3 = vsub.f32 %v6197_v41, %v1899_v43 }
 0x494   : > { %v1913_v55 = vmul.f32 1.442695, %v1906_v25 }
 0x495   : > { %v1467_v57 = vunpack.c.l.b16 %v1435_v54  ;;  %v1911_v4 = vmul.f32 1.442695, %v1905_v3 }
 0x496   : > { %5536 = vpow2.f32 %v1913_v55 }
 0x497   : > { %v1468_v61 = vpack.c.b16 %v1467_v57, %v1466_v56  ;;  %1916 = vadd.xlane.f32.xlu1 %v1915_v60  ;;  %5538 = vpow2.f32 %v1911_v4 }
 0x499   : > { %4808 = vmatmul.msk.bf16.vlgmr.msrb.gmra.mxu3 %vm1387_vm11, %v1468_v61 }
 0x49c   : > { %v6267_v40 = vpop.eup %5536 }
 0x49d   : > { %v1924_v0 = vsel %vm1387_vm11, %v6267_v40, 0.0  ;;  %v6274_v5 = vpop.eup %5538 }
 0x49e   : > { %1925 = vadd.xlane.f32.xlu0 %v1924_v0  ;;  %v1921_v6 = vsel %vm1387_vm11, %v6274_v5, 0.0 }
 0x49f   : > { %1919 = vadd.xlane.f32.xlu1 %v1918_v1 }
 0x4a4   : > { %v1774_v2 = vpop.permute.xlu0 %1773 }
 0x4a5   : > { %1786 = vmatpush.bf16.msra.mxu2 %v1774_v2 }
 0x4b7   : > { %1922 = vadd.xlane.f32.xlu2 %v1921_v6 }
 0x4b8   : > { %1944 = vrot.lane.b32.xlu1 %v6105_v26, %s5772_s26 }
 0x4c0   : > { %1969 = vrot.lane.b32.xlu1 %v6112_v29, %s5772_s26 }
 0x4cf   : > { %v1575_v10 = vpop.xlane.xlu2 %1574 }
 0x4d0   : > { %5540 = vrcp.f32 %v1575_v10 }
 0x4d6   : > { %v5541_v7 = vpop.eup %5540 }
 0x4d7   : > { %v1578_v11 = vpop.xlane.xlu1 %1577  ;;  %v1589_v41 = vmul.f32 %v5541_v7, %v6212_v53  ;;  %v1746_v17 = vpop.xlane.xlu2 %1745 }
 0x4d8   : > { %5542 = vrcp.f32 %v1578_v11 }
 0x4d9   : > { %v1593_v14 = vpack.c.bf16 %v1589_v41, %v1589_v41 }
 0x4db   : > { %v1599_v26 = vunpack.c.l.b16 %v1593_v14 }
 0x4de   : > { %v5543_v13 = vpop.eup %5542 }
 0x4df   : > { %v1590_v19 = vmul.f32 %v5543_v13, %v6219_v59  ;;  %v1749_v20 = vpop.xlane.xlu1 %1748 }
 0x4e0   : > { %5544 = vrcp.f32 %v1749_v20 }
 0x4e1   : > { %v1594_v16 = vpack.c.bf16 %v1590_v19, %v1590_v19  ;;  %5546 = vrcp.f32 %v1746_v17 }
 0x4e3   : > { %v1600_v21 = vunpack.c.l.b16 %v1594_v16 }
 0x4e5   : > { %v1601_v27 = vpack.c.b16 %v1600_v21, %v1599_v26 }
 0x4e6   : > { %v5545_v29 = vpop.eup %5544 }
 0x4e7   : > { %4811 = vmatmul.msk.bf16.vlgmr.msrb.gmra.mxu2 %vm1387_vm11, %v1601_v27  ;;  %v5547_v30 = vpop.eup %5546  ;;  %v1761_v31 = vmul.f32 %v5545_v29, %v6225_v62 }
 0x4e8   : > { %v1760_v53 = vmul.f32 %v5547_v30, %v6217_v58 }
 0x4e9   : > { %v1581_v32 = vpop.xlane.xlu2 %1580  ;;  %v1765_v33 = vpack.c.bf16 %v1761_v31, %v1761_v31 }
 0x4ea   : > { %5548 = vrcp.f32 %v1581_v32  ;;  %v1764_v59 = vpack.c.bf16 %v1760_v53, %v1760_v53 }
 0x4eb   : > { %v1771_v35 = vunpack.c.l.b16 %v1765_v33 }
 0x4ec   : > { %v1770_v42 = vunpack.c.l.b16 %v1764_v59 }
 0x4ee   : > { %v1772_v44 = vpack.c.b16 %v1771_v35, %v1770_v42 }
 0x4f0   : > { %v5549_v12 = vpop.eup %5548 }
 0x4f1   : > { %v1799_v38 = vpop.permute.xlu2 %1798  ;;  %v1584_v39 = vpop.xlane.xlu1 %1583  ;;  %v1591_v45 = vmul.f32 %v5549_v12, %v6231_v8 }
 0x4f2   : > { %1811 = vmatpush.bf16.msrb.mxu3 %v1799_v38  ;;  %5550 = vrcp.f32 %v1584_v39 }
 0x4f3   : > { %v1595_v62 = vpack.c.bf16 %v1591_v45, %v1591_v45 }
 0x4f5   : > { %v1624_v47 = vunpack.c.l.b16 %v1595_v62 }
 0x4f7   : > { %4815 = vmatmul.msk.bf16.vlgmr.msra.gmra.mxu2 %vm1387_vm11, %v1772_v44 }
 0x4f8   : > { %v5551_v46 = vpop.eup %5550 }
 0x4f9   : > { %v1592_v22 = vmul.f32 %v5551_v46, %v6235_v15 }
 0x4fb   : > { %v1596_v58 = vpack.c.bf16 %v1592_v22, %v1592_v22 }
 0x4fd   : > { %v1625_v48 = vunpack.c.l.b16 %v1596_v58 }
 0x4ff   : > { %v1626_v18 = vpack.c.b16 %v1625_v48, %v1624_v47 }
 0x501   : > { %v1755_v49 = vpop.xlane.xlu0 %1754  ;;  %4812 = vmatmul.msk.bf16.vlgmr.msra.gmra.mxu3 %vm1387_vm11, %v1626_v18 }
 0x502   : > { %v1752_v9 = vpop.xlane.xlu1 %1751  ;;  %5552 = vrcp.f32 %v1755_v49 }
 0x503   : > { %5554 = vrcp.f32 %v1752_v9 }
 0x508   : > { %v5553_v50 = vpop.eup %5552 }
 0x509   : > { %v5555_v37 = vpop.eup %5554  ;;  %v1763_v8 = vmul.f32 %v5553_v50, %v6246_v24 }
 0x50a   : > { %v1762_v51 = vmul.f32 %v5555_v37, %v6248_v34  ;;  %v1917_v28 = vpop.xlane.xlu1 %1916 }
 0x50b   : > { %v1767_v52 = vpack.c.bf16 %v1763_v8, %v1763_v8  ;;  %v5322_v8 = vld [vmem:[%s5902_s23 + $0x38] sm:$0xff] }
 0x50c   : > { %v1766_v25 = vpack.c.bf16 %v1762_v51, %v1762_v51  ;;  %v1459_v15 = vpop.f32.mrf.mxu3  ;;  %2094 = vmatpush.bf16.msrb.mxu0 %v5322_v8  ;;  %v5332_v8 = vld [vmem:[%s5921_s22 + $0x38] sm:$0xff] }
 0x50d   : > { %v1796_v54 = vunpack.c.l.b16 %v1767_v52  ;;  %v1492_v55 = vpack.c.bf16 %v1459_v15, %v1459_v15  ;;  %2279 = vmatpush.bf16.msrb.mxu1 %v5332_v8 }
 0x50e   : > { %v1795_v56 = vunpack.c.l.b16 %v1766_v25 }
 0x50f   : > { %1497 = vst.msk [vmem:[#allocation4] sm:$0xf] %vm1496_vm12, %v1492_v55  ;;  %v5320_v55 = vld [vmem:[%s5902_s23 + $0x28] sm:$0xff] }
 0x510   : > { %v1797_v57 = vpack.c.b16 %v1796_v54, %v1795_v56  ;;  %v5321_v54 = vld [vmem:[%s5902_s23 + $0x30] sm:$0xff]  ;;  %v5319_v56 = vld [vmem:[%s5902_s23 + $0x20] sm:$0xff] }
 0x511   : > { %v1926_v4 = vpop.xlane.xlu0 %1925  ;;  %2095 = vmatpush.bf16.msrb.mxu0 %v5321_v54  ;;  %v6393_v54 = vld [vmem:[#allocation3 + $0x8] sm:$0xff] }
 0x512   : > { %4816 = vmatmul.msk.bf16.vlgmr.msrb.gmra.mxu3 %vm1387_vm11, %v1797_v57  ;;  %v1920_v60 = vpop.xlane.xlu1 %1919  ;;  %v5318_v57 = vld [vmem:[%s5902_s23 + $0x18] sm:$0xff] }
 0x513   : > { %5556 = vrcp.f32 %v1920_v60  ;;  %v5317_v60 = vld [vmem:[%s5902_s23 + $0x10] sm:$0xff] }
 0x514   : > { %v1461_v61 = vpop.f32.mrf.mxu3  ;;  %5558 = vrcp.f32 %v1917_v28 }
 0x515   : > { %v1493_v43 = vpack.c.bf16 %v1461_v61, %v1461_v61  ;;  %5560 = vrcp.f32 %v1926_v4  ;;  %2096 = vmatpush.bf16.msrb.mxu0 %v5320_v55  ;;  %v5316_v61 = vld [vmem:[%s5902_s23 + $0x8] sm:$0xff]  ;;  %v5327_v55 = vld [vmem:[%s5921_s22 + $0x10] sm:$0xff] }
 0x517   : > { %1498 = vst.msk [vmem:[#allocation4 + $0x4] sm:$0xf] %vm1496_vm12, %v1493_v43  ;;  %v5315_v43 = vld [vmem:[%s5902_s23] sm:$0xff] }
 0x519   : > { %v5557_v34 = vpop.eup %5556  ;;  %2097 = vmatpush.bf16.msrb.mxu0 %v5319_v56  ;;  %v5326_v56 = vld [vmem:[%s5921_s22 + $0x8] sm:$0xff] }
 0x51a   : > { %v5559_v1 = vpop.eup %5558  ;;  %v1932_v2 = vmul.f32 %v5557_v34, %v6265_v63 }
 0x51b   : > { %v1931_v3 = vmul.f32 %v5559_v1, %v6260_v36  ;;  %v5561_v17 = vpop.eup %5560 }
 0x51c   : > { %v1487_v24 = vpop.f32.mrf.mxu3  ;;  %v1936_v6 = vpack.c.bf16 %v1932_v2, %v1932_v2  ;;  %v1934_v63 = vmul.f32 %v5561_v17, %v6267_v40  ;;  %v5709_v17 = vld [vmem:[#allocation2] sm:$0xff] }
 0x51d   : > { %v1494_v0 = vpack.c.bf16 %v1487_v24, %v1487_v24  ;;  %v1935_v7 = vpack.c.bf16 %v1931_v3, %v1931_v3  ;;  %2098 = vmatpush.bf16.msrb.mxu0 %v5318_v57  ;;  %v5325_v57 = vld [vmem:[%s5921_s22] sm:$0xff] }
 0x51e   : > { %v1942_v41 = vunpack.c.l.b16 %v1936_v6  ;;  %v1938_v16 = vpack.c.bf16 %v1934_v63, %v1934_v63 }
 0x51f   : > { %1499 = vst.msk [vmem:[#allocation4 + $0x8] sm:$0xf] %vm1496_vm12, %v1494_v0  ;;  %v1941_v13 = vunpack.c.l.b16 %v1935_v7 }
 0x520   : > { %v1967_v29 = vunpack.c.l.b16 %v1938_v16  ;;  %v5710_v16 = vld [vmem:[#allocation2 + $0x18] sm:$0xff] }
 0x521   : > { %v1943_v20 = vpack.c.b16 %v1942_v41, %v1941_v13  ;;  %2099 = vmatpush.bf16.msrb.mxu0 %v5317_v60  ;;  %v5708_v41 = vld [vmem:[#allocation2 + $0x10] sm:$0xff] }
 0x524   : > { %v1489_v10 = vpop.f32.mrf.mxu3 }
 0x525   : > { %v1495_v11 = vpack.c.bf16 %v1489_v10, %v1489_v10  ;;  %2100 = vmatpush.bf16.msrb.mxu0 %v5316_v61 }
 0x527   : > { %1500 = vst.msk [vmem:[#allocation4 + $0xc] sm:$0xf] %vm1496_vm12, %v1495_v11  ;;  %v5484_v11 = vld [vmem:[%s7241_s3] ss:$0 sm:$0xff] }
 0x529   : > { %2101 = vmatpush.bf16.msrb.mxu0 %v5315_v43 }
 0x52a   : > { %v1945_v14 = vpop.permute.xlu1 %1944  ;;  %v1923_v19 = vpop.xlane.xlu2 %1922 }
 0x52b   : > { %5562 = vrcp.f32 %v1923_v19  ;;  %1957 = vmatpush.bf16.msrb.mxu2 %v1945_v14 }
 0x52e   : > { %4819 = vmatmul.msk.bf16.vlgmr.msrb.gmra.mxu2 %vm1387_vm11, %v1943_v20 }
 0x531   : > { %v5563_v36 = vpop.eup %5562 }
 0x532   : > { %v1933_v26 = vmul.f32 %v5563_v36, %v6274_v5  ;;  %v1970_v21 = vpop.permute.xlu1 %1969 }
 0x533   : > { %1982 = vmatpush.bf16.msra.mxu3 %v1970_v21 }
 0x534   : > { %v1937_v27 = vpack.c.bf16 %v1933_v26, %v1933_v26 }
 0x536   : > { %v1966_v30 = vunpack.c.l.b16 %v1937_v27 }
 0x538   : > { %v1968_v31 = vpack.c.b16 %v1967_v29, %v1966_v30  ;;  %v5711_v29 = vld [vmem:[#allocation2 + $0x8] sm:$0xff] }
 0x53a   : > { %4820 = vmatmul.msk.bf16.vlgmr.msra.gmra.mxu3 %vm1387_vm11, %v1968_v31 }
 0x56a   : > { %v1617_v32 = vpop.f32.mrf.mxu2 }
 0x56b   : > { %v1647_v53 = vpack.c.bf16 %v1617_v32, %v1617_v32  ;;  %v5340_v32 = vld [vmem:[%s5930_s28 + $0x38] sm:$0xff] }
 0x56c   : > { %2382 = vmatpush.bf16.msra.mxu2 %v5340_v32 }
 0x56d   : > { %1655 = vrot.lane.b32.xlu0 %v1647_v53, %s5772_s26 }
 0x572   : > { %v1619_v33 = vpop.f32.mrf.mxu2 }
 0x573   : > { %v1648_v40 = vpack.c.bf16 %v1619_v33, %v1619_v33 }
 0x575   : > { %1657 = vrot.lane.b32.xlu1 %v1648_v40, %s5772_s26  ;;  %v5339_v40 = vld [vmem:[%s5930_s28 + $0x30] sm:$0xff] }
 0x576   : > { %2383 = vmatpush.bf16.msra.mxu2 %v5339_v40 }
 0x57a   : > { %v1788_v59 = vpop.f32.mrf.mxu2 }
 0x57b   : > { %v1818_v35 = vpack.c.bf16 %v1788_v59, %v1788_v59 }
 0x57d   : > { %1826 = vrot.lane.b32.xlu1 %v1818_v35, %s5771_s30 }
 0x582   : > { %v1790_v5 = vpop.f32.mrf.mxu2 }
 0x583   : > { %v1819_v38 = vpack.c.bf16 %v1790_v5, %v1790_v5  ;;  %v5338_v5 = vld [vmem:[%s5930_s28 + $0x28] sm:$0xff] }
 0x584   : > { %v1642_v39 = vpop.f32.mrf.mxu3  ;;  %2384 = vmatpush.bf16.msra.mxu2 %v5338_v5  ;;  %v5345_v5 = vld [vmem:[%s5939_s18 + $0x20] sm:$0xff] }
 0x585   : > { %1828 = vrot.lane.b32.xlu2 %v1819_v38, %s5771_s30  ;;  %v1649_v12 = vpack.c.bf16 %v1642_v39, %v1642_v39 }
 0x587   : > { %1659 = vrot.lane.b32.xlu1 %v1649_v12, %s5772_s26  ;;  %v5337_v12 = vld [vmem:[%s5930_s28 + $0x20] sm:$0xff] }
 0x588   : > { %2385 = vmatpush.bf16.msra.mxu2 %v5337_v12 }
 0x58c   : > { %v1644_v42 = vpop.f32.mrf.mxu3 }
 0x58d   : > { %v1650_v49 = vpack.c.bf16 %v1644_v42, %v1644_v42 }
 0x595   : > { %v1813_v44 = vpop.f32.mrf.mxu3 }
 0x596   : > { %v1820_v58 = vpack.c.bf16 %v1813_v44, %v1813_v44 }
 0x59d   : > { %v1815_v62 = vpop.f32.mrf.mxu3 }
 0x59e   : > { %v1821_v37 = vpack.c.bf16 %v1815_v62, %v1815_v62 }
 0x5b1   : > { %v1959_v45 = vpop.f32.mrf.mxu2 }
 0x5b2   : > { %v1989_v46 = vpack.c.bf16 %v1959_v45, %v1959_v45  ;;  %v5336_v45 = vld [vmem:[%s5930_s28 + $0x18] sm:$0xff] }
 0x5b3   : > { %2386 = vmatpush.bf16.msra.mxu2 %v5336_v45 }
 0x5b4   : > { %1997 = vrot.lane.b32.xlu1 %v1989_v46, %s5770_s17 }
 0x5b9   : > { %v1961_v22 = vpop.f32.mrf.mxu2 }
 0x5ba   : > { %v1990_v47 = vpack.c.bf16 %v1961_v22, %v1961_v22  ;;  %v5335_v22 = vld [vmem:[%s5930_s28 + $0x10] sm:$0xff] }
 0x5bb   : > { %2387 = vmatpush.bf16.msra.mxu2 %v5335_v22 }
 0x5bc   : > { %1999 = vrot.lane.b32.xlu0 %v1990_v47, %s5770_s17  ;;  %1830 = vrot.lane.b32.xlu1 %v1820_v58, %s5771_s30 }
 0x5bd   : > { %v1984_v48 = vpop.f32.mrf.mxu3 }
 0x5be   : > { %v1991_v18 = vpack.c.bf16 %v1984_v48, %v1984_v48  ;;  %v5334_v48 = vld [vmem:[%s5930_s28 + $0x8] sm:$0xff] }
 0x5bf   : > { %2388 = vmatpush.bf16.msra.mxu2 %v5334_v48 }
 0x5c0   : > { %2001 = vrot.lane.b32.xlu2 %v1991_v18, %s5770_s17 }
 0x5c4   : > { %1661 = vrot.lane.b32.xlu0 %v1650_v49, %s5772_s26 }
 0x5c5   : > { %v1986_v9 = vpop.f32.mrf.mxu3 }
 0x5c6   : > { %v1992_v50 = vpack.c.bf16 %v1986_v9, %v1986_v9 }
 0x5c8   : > { %2003 = vrot.lane.b32.xlu1 %v1992_v50, %s5770_s17 }
 0x5cc   : > { %1832 = vrot.lane.b32.xlu0 %v1821_v37, %s5771_s30  ;;  %v5333_v37 = vld [vmem:[%s5930_s28] sm:$0xff] }
 0x5cd   : > { %2389 = vmatpush.bf16.msra.mxu2 %v5333_v37 }
 0x5df   : > { %v1656_v51 = vpop.permute.xlu0 %1655  ;;  %v1829_v52 = vpop.permute.xlu2 %1828 }
 0x5e0   : > { %1668 = vst.msk [vmem:[#allocation4] sm:$0xf] %vm1667_vm13, %v1656_v51  ;;  %v6386_v51 = vld [vmem:[#allocation3] sm:$0xff] }
 0x5e1   : > { %2390 = vmatmul.bf16.vlgmr.msra.gmra.mxu2 %v6386_v51 }
 0x5e7   : > { %v1658_v28 = vpop.permute.xlu1 %1657 }
 0x5e8   : > { %1669 = vst.msk [vmem:[#allocation4 + $0x4] sm:$0xf] %vm1667_vm13, %v1658_v28  ;;  %v5331_v28 = vld [vmem:[%s5921_s22 + $0x30] sm:$0xff] }
 0x5e9   : > { %1840 = vst.msk [vmem:[#allocation4 + $0x4] sm:$0xf] %vm1838_vm14, %v1829_v52  ;;  %2280 = vmatpush.bf16.msrb.mxu1 %v5331_v28  ;;  %v5330_v52 = vld [vmem:[%s5921_s22 + $0x28] sm:$0xff] }
 0x5ed   : > { %2281 = vmatpush.bf16.msrb.mxu1 %v5330_v52  ;;  %v5341_v52 = vld [vmem:[%s5939_s18] sm:$0xff] }
 0x5ef   : > { %v1827_v25 = vpop.permute.xlu1 %1826 }
 0x5f0   : > { %1839 = vst.msk [vmem:[#allocation4] sm:$0xf] %vm1838_vm14, %v1827_v25  ;;  %v5329_v25 = vld [vmem:[%s5921_s22 + $0x20] sm:$0xff] }
 0x5f1   : > { %2282 = vmatpush.bf16.msrb.mxu1 %v5329_v25  ;;  %2395 = vmatmul.bf16.gmra.mxu2 %v6393_v54 }
 0x5f9   : > { %v1660_v15 = vpop.permute.xlu1 %1659 }
 0x5fa   : > { %1670 = vst.msk [vmem:[#allocation4 + $0x8] sm:$0xf] %vm1667_vm13, %v1660_v15  ;;  %v5328_v15 = vld [vmem:[%s5921_s22 + $0x18] sm:$0xff] }
 0x5fb   : > { %2283 = vmatpush.bf16.msrb.mxu1 %v5328_v15 }
 0x5ff   : > { %2284 = vmatpush.bf16.msrb.mxu1 %v5327_v55 }
 0x603   : > { %2285 = vmatpush.bf16.msrb.mxu1 %v5326_v56 }
 0x607   : > { %2286 = vmatpush.bf16.msrb.mxu1 %v5325_v57  ;;  %v5485_v57 = vld [vmem:[%s7242_s10] ss:$0 sm:$0xff] }
 0x61a   : > { %v2002_v1 = vpop.permute.xlu2 %2001 }
 0x626   : > { %v1998_v24 = vpop.permute.xlu1 %1997 }
 0x627   : > { %2010 = vst.msk [vmem:[#allocation4] sm:$0xf] %vm2009_vm15, %v1998_v24 }
 0x62e   : > { %v1831_v34 = vpop.permute.xlu1 %1830  ;;  %v2000_v0 = vpop.permute.xlu0 %1999 }
 0x62f   : > { %1841 = vst.msk [vmem:[#allocation4 + $0x8] sm:$0xf] %vm1838_vm14, %v1831_v34 }
 0x630   : > { %2012 = vst.msk [vmem:[#allocation4 + $0x8] sm:$0xf] %vm2009_vm15, %v2002_v1 }
 0x631   : > { %2011 = vst.msk [vmem:[#allocation4 + $0x4] sm:$0xf] %vm2009_vm15, %v2000_v0 }
 0x636   : > { %v1662_v2 = vpop.permute.xlu0 %1661 }
 0x637   : > { %1671 = vst.msk [vmem:[#allocation4 + $0xc] sm:$0xf] %vm1667_vm13, %v1662_v2 }
 0x638   : > { %v5313_v3 = vld [vmem:[#allocation4] sm:$0xff] }
 0x639   : > { %2102 = vmatmul.bf16.vlgmr.msrb.gmra.mxu0 %v5313_v3 }
 0x63a   : > { %v2004_v6 = vpop.permute.xlu1 %2003 }
 0x63e   : > { %v1833_v4 = vpop.permute.xlu0 %1832 }
 0x63f   : > { %1842 = vst.msk [vmem:[#allocation4 + $0xc] sm:$0xf] %vm1838_vm14, %v1833_v4 }
 0x640   : > { %2013 = vst.msk [vmem:[#allocation4 + $0xc] sm:$0xf] %vm2009_vm15, %v2004_v6 }
 0x647   : > { %v5314_v10 = vld [vmem:[#allocation4 + $0x8] sm:$0xff] }
 0x649   : > { %2107 = vmatmul.bf16.gmra.mxu0 %v5314_v10 }
 0x6b6   : > { %v2103_v7 = vpop.f32.mrf.mxu0 }
 0x6b7   : > { %v2113_v13 = vadd.f32 %v5708_v41, %v2103_v7  ;;  %v5348_v41 = vld [vmem:[%s5939_s18 + $0x38] sm:$0xff] }
 0x6b8   : > { %2473 = vmatpush.bf16.msrb.mxu3 %v5348_v41 }
 0x6b9   : > { %v6341_v14 = vadd.f32 %v5484_v11, %v2113_v13 }
 0x6bb   : > { %2125 = vadd.xlane.f32.xlu0 %v6341_v14 }
 0x6be   : > { %v2105_v19 = vpop.f32.mrf.mxu0 }
 0x6bf   : > { %v2114_v20 = vadd.f32 %v5709_v17, %v2105_v19  ;;  %v5347_v17 = vld [vmem:[%s5939_s18 + $0x30] sm:$0xff] }
 0x6c0   : > { %2474 = vmatpush.bf16.msrb.mxu3 %v5347_v17  ;;  %v5486_v17 = vld [vmem:[%s7243_s12] ss:$0 sm:$0xff] }
 0x6c1   : > { %v6344_v63 = vadd.f32 %v5484_v11, %v2114_v20 }
 0x6c3   : > { %2127 = vadd.xlane.f32.xlu2 %v6344_v63 }
 0x6c6   : > { %v2108_v36 = vpop.f32.mrf.mxu0 }
 0x6c7   : > { %v2115_v26 = vadd.f32 %v5710_v16, %v2108_v36 }
 0x6c9   : > { %v6347_v21 = vadd.f32 %v5484_v11, %v2115_v26 }
 0x6cb   : > { %2129 = vadd.xlane.f32.xlu1 %v6347_v21 }
 0x6ce   : > { %v2110_v27 = vpop.f32.mrf.mxu0 }
 0x6cf   : > { %v2116_v30 = vadd.f32 %v5711_v29, %v2110_v27  ;;  %v5346_v29 = vld [vmem:[%s5939_s18 + $0x28] sm:$0xff] }
 0x6d0   : > { %2475 = vmatpush.bf16.msrb.mxu3 %v5346_v29 }
 0x6d1   : > { %v6350_v31 = vadd.f32 %v5484_v11, %v2116_v30 }
 0x6d3   : > { %2131 = vadd.xlane.f32.xlu0 %v6350_v31 }
 0x6d4   : > { %2476 = vmatpush.bf16.msrb.mxu3 %v5345_v5 }
 0x72e   : > { %v2126_v53 = vpop.xlane.xlu0 %2125 }
 0x72f   : > { %v2133_v33 = vmul.f32 %v2126_v53, %v6020_v23 }
 0x731   : > { %v6357_v59 = vsub.f32 %v6341_v14, %v2133_v33 }
 0x733   : > { %v2141_v35 = vmul.f32 %v6357_v59, %v6357_v59 }
 0x735   : > { %2145 = vadd.xlane.f32.xlu2 %v2141_v35 }
 0x736   : > { %v2128_v38 = vpop.xlane.xlu2 %2127 }
 0x737   : > { %v2134_v39 = vmul.f32 %v2128_v38, %v6020_v23 }
 0x739   : > { %v6365_v42 = vsub.f32 %v6344_v63, %v2134_v39 }
 0x73b   : > { %v2142_v44 = vmul.f32 %v6365_v42, %v6365_v42 }
 0x73d   : > { %2147 = vadd.xlane.f32.xlu1 %v2142_v44 }
 0x73e   : > { %v2130_v46 = vpop.xlane.xlu1 %2129 }
 0x73f   : > { %v2135_v62 = vmul.f32 %v2130_v46, %v6020_v23 }
 0x741   : > { %v6373_v58 = vsub.f32 %v6347_v21, %v2135_v62  ;;  %v5344_v62 = vld [vmem:[%s5939_s18 + $0x18] sm:$0xff] }
 0x742   : > { %2477 = vmatpush.bf16.msrb.mxu3 %v5344_v62 }
 0x743   : > { %v2143_v47 = vmul.f32 %v6373_v58, %v6373_v58 }
 0x745   : > { %2149 = vadd.xlane.f32.xlu0 %v2143_v47 }
 0x746   : > { %v2132_v18 = vpop.xlane.xlu0 %2131 }
 0x747   : > { %v2136_v49 = vmul.f32 %v2132_v18, %v6020_v23  ;;  %v5343_v18 = vld [vmem:[%s5939_s18 + $0x10] sm:$0xff] }
 0x748   : > { %2478 = vmatpush.bf16.msrb.mxu3 %v5343_v18 }
 0x749   : > { %v6380_v9 = vsub.f32 %v6350_v31, %v2136_v49 }
 0x74b   : > { %v2144_v50 = vmul.f32 %v6380_v9, %v6380_v9 }
 0x74d   : > { %2151 = vadd.xlane.f32.xlu2 %v2144_v50 }
 0x7a8   : > { %v2146_v60 = vpop.xlane.xlu2 %2145 }
 0x7a9   : > { %v2153_v61 = vmul.f32 %v2146_v60, %v6020_v23  ;;  %v2391_v60 = vpop.f32.mrf.mxu2 }
 0x7ab   : > { %v2157_v43 = vadd.f32 1e-06, %v2153_v61  ;;  %v2392_v61 = vadd.f32 %v5485_v57, %v2391_v60 }
 0x7ad   : > { %5564 = vrsqrt.f32 %v2157_v43  ;;  %vm2167_vm1 = vweird.f32 %v2157_v43 }
 0x7b0   : > { %v2148_v24 = vpop.xlane.xlu1 %2147 }
 0x7b1   : > { %v2154_v34 = vmul.f32 %v2148_v24, %v6020_v23  ;;  %v2393_v24 = vpop.f32.mrf.mxu2 }
 0x7b3   : > { %v5565_v0 = vpop.eup %5564  ;;  %v2158_v1 = vadd.f32 1e-06, %v2154_v34  ;;  %v2394_v34 = vadd.f32 %v5485_v57, %v2393_v24 }
 0x7b4   : > { %v2162_v2 = vmul.f32 %v5565_v0, %v2157_v43  ;;  %vm2168_vm0 = vweird.f32 %v5565_v0  ;;  %v2401_v43 = vpack.c.bf16 %v2392_v61, %v2392_v61 }
 0x7b5   : > { %5566 = vrsqrt.f32 %v2158_v1  ;;  %vm2169_vm3 = vmor %vm2167_vm1, %vm2168_vm0  ;;  %vm2177_vm4 = vweird.f32 %v2158_v1 }
 0x7b6   : > { %v2163_v3 = vmul.f32 %v5565_v0, %v2162_v2 }
 0x7b8   : > { %v2164_v4 = vmul.f32 0.5, %v2163_v3  ;;  %v2150_v6 = vpop.xlane.xlu0 %2149 }
 0x7b9   : > { %v2155_v10 = vmul.f32 %v2150_v6, %v6020_v23  ;;  %v2396_v2 = vpop.f32.mrf.mxu2 }
 0x7ba   : > { %v2165_v13 = vsub.f32 1.5, %v2164_v4 }
 0x7bb   : > { %v5567_v11 = vpop.eup %5566  ;;  %v2159_v7 = vadd.f32 1e-06, %v2155_v10 }
 0x7bc   : > { %v2172_v19 = vmul.f32 %v5567_v11, %v2158_v1  ;;  %v2166_v36 = vmul.f32 %v5565_v0, %v2165_v13  ;;  %vm2178_vm2 = vweird.f32 %v5567_v11 }
 0x7bd   : > { %5568 = vrsqrt.f32 %v2159_v7  ;;  %vm2179_vm5 = vmor %vm2177_vm4, %vm2178_vm2  ;;  %vm2187_vm7 = vweird.f32 %v2159_v7 }
 0x7be   : > { %v2173_v20 = vmul.f32 %v5567_v11, %v2172_v19  ;;  %v2170_v33 = vsel %vm2169_vm3, %v5565_v0, %v2166_v36  ;;  %v2402_v0 = vpack.c.bf16 %v2394_v34, %v2394_v34 }
 0x7bf   : > { %v2201_v12 = vmul.f32 %v2170_v33, %v6357_v59  ;;  %v5342_v59 = vld [vmem:[%s5939_s18 + $0x8] sm:$0xff] }
 0x7c0   : > { %v2174_v16 = vmul.f32 0.5, %v2173_v20  ;;  %v2152_v26 = vpop.xlane.xlu2 %2151  ;;  %2479 = vmatpush.bf16.msrb.mxu3 %v5342_v59 }
 0x7c1   : > { %v2156_v27 = vmul.f32 %v2152_v26, %v6020_v23  ;;  %v2398_v4 = vpop.f32.mrf.mxu2 }
 0x7c2   : > { %v2175_v30 = vsub.f32 1.5, %v2174_v16  ;;  %v2399_v6 = vadd.f32 %v5485_v57, %v2398_v4 }
 0x7c3   : > { %v5569_v32 = vpop.eup %5568  ;;  %v2160_v53 = vadd.f32 1e-06, %v2156_v27 }
 0x7c4   : > { %v2176_v40 = vmul.f32 %v5567_v11, %v2175_v30  ;;  %v2182_v35 = vmul.f32 %v5569_v32, %v2159_v7  ;;  %vm2188_vm6 = vweird.f32 %v5569_v32  ;;  %2480 = vmatpush.bf16.msrb.mxu3 %v5341_v52 }
 0x7c5   : > { %5570 = vrsqrt.f32 %v2160_v53  ;;  %vm2189_vm9 = vmor %vm2187_vm7, %vm2188_vm6  ;;  %vm2197_vm0 = vweird.f32 %v2160_v53 }
 0x7c6   : > { %v2180_v38 = vsel %vm2179_vm5, %v5567_v11, %v2176_v40  ;;  %v2183_v39 = vmul.f32 %v5569_v32, %v2182_v35  ;;  %v2404_v11 = vpack.c.bf16 %v2399_v6, %v2399_v6  ;;  %v5487_v40 = vld [vmem:[%s7244_s15] ss:$0 sm:$0xff] }
 0x7c7   : > { %v2202_v44 = vmul.f32 %v2180_v38, %v6365_v42  ;;  %2481 = vmatmul.bf16.vlgmr.msrb.gmra.mxu3 %v6386_v51 }
 0x7c8   : > { %v2184_v45 = vmul.f32 0.5, %v2183_v39  ;;  %v2534_v7 = vunpack.c.l.b16 %v2404_v11 }
 0x7c9   : > { %v2205_v46 = vpack.c.bf16 %v2202_v44, %v2201_v12 }
 0x7ca   : > { %v2185_v47 = vsub.f32 1.5, %v2184_v45 }
 0x7cb   : > { %v5571_v22 = vpop.eup %5570  ;;  %2287 = vmatmul.bf16.vlgmr.msrb.gmra.mxu1 %v2205_v46 }
 0x7cc   : > { %v2192_v48 = vmul.f32 %v5571_v22, %v2160_v53  ;;  %v2186_v37 = vmul.f32 %v5569_v32, %v2185_v47  ;;  %vm2198_vm8 = vweird.f32 %v5571_v22 }
 0x7cd   : > { %vm2199_vm1 = vmor %vm2197_vm0, %vm2198_vm8 }
 0x7ce   : > { %v2193_v49 = vmul.f32 %v5571_v22, %v2192_v48  ;;  %v2190_v8 = vsel %vm2189_vm9, %v5569_v32, %v2186_v37 }
 0x7cf   : > { %v2203_v15 = vmul.f32 %v2190_v8, %v6373_v58  ;;  %v2503_v58 = vunpack.c.l.b16 %v2401_v43 }
 0x7d0   : > { %v2194_v50 = vmul.f32 0.5, %v2193_v49 }
 0x7d2   : > { %v2195_v42 = vsub.f32 1.5, %v2194_v50 }
 0x7d4   : > { %v2196_v28 = vmul.f32 %v5571_v22, %v2195_v42 }
 0x7d6   : > { %v2200_v25 = vsel %vm2199_vm1, %v5571_v22, %v2196_v28 }
 0x7d7   : > { %v2204_v55 = vmul.f32 %v2200_v25, %v6380_v9  ;;  %2486 = vmatmul.bf16.gmra.mxu3 %v6393_v54  ;;  %v2504_v9 = vunpack.c.l.b16 %v2402_v0  ;;  %v2397_v54 = vadd.f32 %v5485_v57, %v2396_v2 }
 0x7d9   : > { %v2206_v56 = vpack.c.bf16 %v2204_v55, %v2203_v15  ;;  %v2505_v1 = vpack.c.b16 %v2504_v9, %v2503_v58  ;;  %v2403_v3 = vpack.c.bf16 %v2397_v54, %v2397_v54 }
 0x7db   : > { %2292 = vmatmul.bf16.gmra.mxu1 %v2206_v56  ;;  %2670 = vrot.lane.b32.xlu1 %v2505_v1, %s5770_s17  ;;  %v2510_v51 = vsel %vm1340_vm10, %v2505_v1, 0  ;;  %v2533_v10 = vunpack.c.l.b16 %v2403_v3 }
 0x7dc   : > { %2519 = vmatpush.bf16.xpose.msra.mxu0 %v2510_v51 }
 0x7dd   : > { %v2535_v41 = vpack.c.b16 %v2534_v7, %v2533_v10 }
 0x7df   : > { %2694 = vrot.lane.b32.xlu2 %v2535_v41, %s5770_s17  ;;  %v2540_v13 = vsel %vm1340_vm10, %v2535_v41, 0 }
 0x7e0   : > { %2549 = vmatpush.bf16.xpose.msra.mxu1 %v2540_v13 }
 0x839   : > { %v2695_v42 = vpop.permute.xlu2 %2694 }
 0x83a   : > { %v2700_v8 = vsel %vm1340_vm10, %v2695_v42, 0 }
 0x83b   : > { %2709 = vmatpush.bf16.xpose.msrb.mxu1 %v2700_v8 }
 0x848   : > { %v2288_v19 = vpop.f32.mrf.mxu1 }
 0x849   : > { %v2289_v20 = vadd.f32 %v5486_v17, %v2288_v19 }
 0x84a   : > { %v2482_v35 = vpop.f32.mrf.mxu3 }
 0x84b   : > { %v2298_v16 = vpack.c.bf16 %v2289_v20, %v2289_v20  ;;  %v2483_v12 = vadd.f32 %v5487_v40, %v2482_v35 }
 0x84d   : > { %v2498_v29 = vunpack.c.l.b16 %v2298_v16  ;;  %v2492_v62 = vpack.c.bf16 %v2483_v12, %v2483_v12  ;;  %v2671_v25 = vpop.permute.xlu1 %2670 }
 0x84e   : > { %v2676_v15 = vsel %vm1340_vm10, %v2671_v25, 0 }
 0x84f   : > { %v2611_v18 = vunpack.c.l.b16 %v2492_v62  ;;  %2685 = vmatpush.bf16.xpose.msrb.mxu0 %v2676_v15 }
 0x850   : > { %v2290_v36 = vpop.f32.mrf.mxu1 }
 0x851   : > { %v2291_v26 = vadd.f32 %v5486_v17, %v2290_v36 }
 0x852   : > { %v2484_v47 = vpop.f32.mrf.mxu3 }
 0x853   : > { %v2299_v27 = vpack.c.bf16 %v2291_v26, %v2291_v26  ;;  %v2485_v48 = vadd.f32 %v5487_v40, %v2484_v47 }
 0x855   : > { %v2499_v30 = vunpack.c.l.b16 %v2299_v27  ;;  %v2493_v49 = vpack.c.bf16 %v2485_v48, %v2485_v48 }
 0x857   : > { %v2500_v32 = vpack.c.b16 %v2499_v30, %v2498_v29  ;;  %v2612_v50 = vunpack.c.l.b16 %v2493_v49 }
 0x858   : > { %v2293_v53 = vpop.f32.mrf.mxu1 }
 0x859   : > { %2668 = vrot.lane.b32.xlu0 %v2500_v32, %s5770_s17  ;;  %4965 = vmatmul.msk.bf16.vlgmr.msra.gmra.mxu0 %vm1340_vm10, %v2500_v32  ;;  %v2294_v33 = vadd.f32 %v5486_v17, %v2293_v53  ;;  %v6444_v37 = vpack.c.b16 %v2612_v50, %v2611_v18 }
 0x85a   : > { %2838 = vrot.lane.b32.xlu2 %v2500_v32, %s5771_s30  ;;  %v2487_v59 = vpop.f32.mrf.mxu3 }
 0x85b   : > { %v2300_v38 = vpack.c.bf16 %v2294_v33, %v2294_v33  ;;  %2625 = vmatpush.bf16.msrb.mxu2 %v6444_v37  ;;  %v2488_v28 = vadd.f32 %v5487_v40, %v2487_v59 }
 0x85d   : > { %v2528_v45 = vunpack.c.l.b16 %v2300_v38  ;;  %v2494_v52 = vpack.c.bf16 %v2488_v28, %v2488_v28 }
 0x85f   : > { %v2639_v57 = vunpack.c.l.b16 %v2494_v52 }
 0x860   : > { %v2295_v5 = vpop.f32.mrf.mxu1 }
 0x861   : > { %2840 = vrot.lane.b32.xlu0 %v2505_v1, %s5771_s30  ;;  %v2296_v39 = vadd.f32 %v5486_v17, %v2295_v5 }
 0x862   : > { %v2489_v55 = vpop.f32.mrf.mxu3 }
 0x863   : > { %v2301_v44 = vpack.c.bf16 %v2296_v39, %v2296_v39  ;;  %v2490_v56 = vadd.f32 %v5487_v40, %v2489_v55 }
 0x865   : > { %v2529_v46 = vunpack.c.l.b16 %v2301_v44  ;;  %v2495_v60 = vpack.c.bf16 %v2490_v56, %v2490_v56 }
 0x867   : > { %v2530_v22 = vpack.c.b16 %v2529_v46, %v2528_v45  ;;  %v2640_v61 = vunpack.c.l.b16 %v2495_v60 }
 0x869   : > { %2864 = vrot.lane.b32.xlu0 %v2535_v41, %s5771_s30  ;;  %2862 = vrot.lane.b32.xlu2 %v2530_v22, %s5771_s30  ;;  %v6455_v43 = vpack.c.b16 %v2640_v61, %v2639_v57 }
 0x86a   : > { %2692 = vrot.lane.b32.xlu1 %v2530_v22, %s5770_s17  ;;  %4966 = vmatmul.msk.bf16.vlgmr.msra.gmra.mxu1 %vm1340_vm10, %v2530_v22 }
 0x86b   : > { %2653 = vmatpush.bf16.msra.mxu3 %v6455_v43 }
 0x871   : > { %3008 = vrot.lane.b32.xlu0 %v2500_v32, %s5772_s26  ;;  %3032 = vrot.lane.b32.xlu2 %v2530_v22, %s5772_s26 }
 0x872   : > { %3010 = vrot.lane.b32.xlu1 %v2505_v1, %s5772_s26 }
 0x879   : > { %2794 = vrot.lane.b32.xlu2 %v6455_v43, %s5770_s17 }
 0x87a   : > { %3034 = vrot.lane.b32.xlu1 %v2535_v41, %s5772_s26 }
 0x882   : > { %2769 = vrot.lane.b32.xlu1 %v6444_v37, %s5770_s17 }
 0x8b4   : > { %v2839_v1 = vpop.permute.xlu2 %2838 }
 0x8c3   : > { %v2863_v41 = vpop.permute.xlu2 %2862 }
 0x8cb   : > { %v2669_v24 = vpop.permute.xlu0 %2668  ;;  %v3033_v26 = vpop.permute.xlu2 %3032 }
 0x8cc   : > { %4969 = vmatmul.msk.bf16.vlgmr.msrb.gmra.mxu0 %vm1340_vm10, %v2669_v24 }
 0x8d3   : > { %v2841_v34 = vpop.permute.xlu0 %2840  ;;  %v2795_v27 = vpop.permute.xlu2 %2794 }
 0x8d4   : > { %v2846_v58 = vsel %vm1340_vm10, %v2841_v34, 0  ;;  %2807 = vmatpush.bf16.msrb.mxu3 %v2795_v27 }
 0x8d5   : > { %2855 = vmatpush.bf16.xpose.msra.mxu0 %v2846_v58 }
 0x8d6   : > { %v2521_v0 = vpop.f32.mrf.mxu0 }
 0x8d7   : > { %v2556_v9 = vsel %vm1387_vm11, %v2521_v0, -inf }
 0x8d8   : > { %2557 = vmax.xlane.f32.xlu0 %v2556_v9 }
 0x8db   : > { %v2865_v2 = vpop.permute.xlu0 %2864 }
 0x8dc   : > { %v2870_v51 = vsel %vm1340_vm10, %v2865_v2, 0  ;;  %v2693_v54 = vpop.permute.xlu1 %2692  ;;  %4973 = vmatmul.msk.bf16.vlgmr.msra.gmra.mxu0 %vm1340_vm10, %v2839_v1 }
 0x8dd   : > { %4970 = vmatmul.msk.bf16.vlgmr.msrb.gmra.mxu1 %vm1340_vm10, %v2693_v54 }
 0x8de   : > { %v2523_v3 = vpop.f32.mrf.mxu0  ;;  %2879 = vmatpush.bf16.xpose.msra.mxu1 %v2870_v51 }
 0x8df   : > { %v2559_v4 = vsel %vm1387_vm11, %v2523_v3, -inf }
 0x8e0   : > { %2560 = vmax.xlane.f32.xlu1 %v2559_v4 }
 0x8e3   : > { %v3009_v13 = vpop.permute.xlu0 %3008 }
 0x8e4   : > { %v3011_v6 = vpop.permute.xlu1 %3010 }
 0x8e5   : > { %v3016_v10 = vsel %vm1340_vm10, %v3011_v6, 0 }
 0x8e6   : > { %3025 = vmatpush.bf16.xpose.msrb.mxu0 %v3016_v10 }
 0x8e7   : > { %v2551_v11 = vpop.f32.mrf.mxu1 }
 0x8e8   : > { %v2562_v7 = vsel %vm1387_vm11, %v2551_v11, -inf }
 0x8e9   : > { %2563 = vmax.xlane.f32.xlu2 %v2562_v7 }
 0x8ec   : > { %v3035_v19 = vpop.permute.xlu1 %3034 }
 0x8ed   : > { %v3040_v17 = vsel %vm1340_vm10, %v3035_v19, 0  ;;  %4974 = vmatmul.msk.bf16.vlgmr.msra.gmra.mxu1 %vm1340_vm10, %v2863_v41  ;;  %4977 = vmatmul.msk.bf16.vlgmr.msrb.gmra.mxu0 %vm1340_vm10, %v3009_v13 }
 0x8ee   : > { %3049 = vmatpush.bf16.xpose.msrb.mxu1 %v3040_v17 }
 0x8ef   : > { %v2553_v20 = vpop.f32.mrf.mxu1 }
 0x8f0   : > { %v2565_v36 = vsel %vm1387_vm11, %v2553_v20, -inf }
 0x8f1   : > { %2566 = vmax.xlane.f32.xlu0 %v2565_v36 }
 0x8f4   : > { %v2770_v16 = vpop.permute.xlu1 %2769 }
 0x8f5   : > { %2782 = vmatpush.bf16.msra.mxu2 %v2770_v16 }
 0x8fd   : > { %4978 = vmatmul.msk.bf16.vlgmr.msrb.gmra.mxu1 %vm1340_vm10, %v3033_v26 }
 0x949   : > { %v6474_v29 = vpop.f32.mrf.mxu0 }
 0x94a   : > { %v2716_v30 = vsel %vm1387_vm11, %v6474_v29, -inf }
 0x94b   : > { %2717 = vmax.xlane.f32.xlu1 %v2716_v30  ;;  %v2558_v32 = vpop.xlane.xlu0 %2557 }
 0x94c   : > { %v2568_v53 = vsub.f32 %v2521_v0, %v2558_v32 }
 0x94e   : > { %v2572_v33 = vmul.f32 1.442695, %v2568_v53 }
 0x950   : > { %5572 = vpow2.f32 %v2572_v33 }
 0x951   : > { %v6478_v40 = vpop.f32.mrf.mxu0 }
 0x952   : > { %v2719_v35 = vsel %vm1387_vm11, %v6478_v40, -inf }
 0x953   : > { %v2561_v5 = vpop.xlane.xlu1 %2560  ;;  %2720 = vmax.xlane.f32.xlu2 %v2719_v35 }
 0x954   : > { %v2569_v38 = vsub.f32 %v2523_v3, %v2561_v5 }
 0x956   : > { %v2574_v39 = vmul.f32 1.442695, %v2569_v38  ;;  %v6482_v12 = vpop.eup %5572 }
 0x957   : > { %v2580_v45 = vsel %vm1387_vm11, %v6482_v12, 0.0 }
 0x958   : > { %5574 = vpow2.f32 %v2574_v39 }
 0x959   : > { %v6488_v46 = vpop.f32.mrf.mxu0 }
 0x95a   : > { %v6484_v44 = vpop.f32.mrf.mxu1  ;;  %v2886_v49 = vsel %vm1387_vm11, %v6488_v46, -inf }
 0x95b   : > { %2581 = vadd.xlane.f32.xlu2 %v2580_v45  ;;  %v2722_v62 = vsel %vm1387_vm11, %v6484_v44, -inf }
 0x95c   : > { %2723 = vmax.xlane.f32.xlu0 %v2722_v62  ;;  %v2564_v22 = vpop.xlane.xlu2 %2563 }
 0x95d   : > { %v2570_v48 = vsub.f32 %v2551_v11, %v2564_v22 }
 0x95e   : > { %v6492_v47 = vpop.eup %5574 }
 0x95f   : > { %v2583_v50 = vsel %vm1387_vm11, %v6492_v47, 0.0  ;;  %v2576_v52 = vmul.f32 1.442695, %v2570_v48 }
 0x961   : > { %v6502_v8 = vpop.f32.mrf.mxu0  ;;  %5576 = vpow2.f32 %v2576_v52 }
 0x962   : > { %v6494_v18 = vpop.f32.mrf.mxu1  ;;  %v2889_v55 = vsel %vm1387_vm11, %v6502_v8, -inf }
 0x963   : > { %2887 = vmax.xlane.f32.xlu2 %v2886_v49  ;;  %v2725_v59 = vsel %vm1387_vm11, %v6494_v18, -inf }
 0x964   : > { %2584 = vadd.xlane.f32.xlu0 %v2583_v50  ;;  %2726 = vmax.xlane.f32.xlu1 %v2725_v59  ;;  %v2567_v42 = vpop.xlane.xlu0 %2566 }
 0x965   : > { %v2571_v28 = vsub.f32 %v2553_v20, %v2567_v42 }
 0x967   : > { %v2578_v25 = vmul.f32 1.442695, %v2571_v28  ;;  %v6512_v60 = vpop.eup %5576 }
 0x968   : > { %v2586_v34 = vsel %vm1387_vm11, %v6512_v60, 0.0 }
 0x969   : > { %5578 = vpow2.f32 %v2578_v25 }
 0x96a   : > { %v6504_v15 = vpop.f32.mrf.mxu1  ;;  %v6510_v57 = vpop.f32.mrf.mxu0 }
 0x96b   : > { %v2892_v56 = vsel %vm1387_vm11, %v6504_v15, -inf  ;;  %v3056_v2 = vsel %vm1387_vm11, %v6510_v57, -inf }
 0x96c   : > { %2890 = vmax.xlane.f32.xlu0 %v2889_v55  ;;  %2893 = vmax.xlane.f32.xlu1 %v2892_v56 }
 0x96f   : > { %v6514_v61 = vpop.eup %5578 }
 0x970   : > { %v2589_v0 = vsel %vm1387_vm11, %v6514_v61, 0.0 }
 0x972   : > { %v6516_v24 = vpop.f32.mrf.mxu1  ;;  %v6524_v9 = vpop.f32.mrf.mxu0 }
 0x973   : > { %v2895_v58 = vsel %vm1387_vm11, %v6516_v24, -inf  ;;  %v3059_v51 = vsel %vm1387_vm11, %v6524_v9, -inf }
 0x974   : > { %2587 = vadd.xlane.f32.xlu0 %v2586_v34  ;;  %2896 = vmax.xlane.f32.xlu2 %v2895_v58 }
 0x975   : > { %2590 = vadd.xlane.f32.xlu1 %v2589_v0 }
 0x97a   : > { %v6526_v1 = vpop.f32.mrf.mxu1 }
 0x97b   : > { %v3062_v4 = vsel %vm1387_vm11, %v6526_v1, -inf }
 0x97c   : > { %3057 = vmax.xlane.f32.xlu0 %v3056_v2 }
 0x97d   : > { %3060 = vmax.xlane.f32.xlu1 %v3059_v51 }
 0x982   : > { %v6532_v54 = vpop.f32.mrf.mxu1 }
 0x983   : > { %v3065_v3 = vsel %vm1387_vm11, %v6532_v54, -inf }
 0x984   : > { %3066 = vmax.xlane.f32.xlu2 %v3065_v3 }
 0x985   : > { %3063 = vmax.xlane.f32.xlu1 %v3062_v4 }
 0x99e   : > { %2964 = vrot.lane.b32.xlu1 %v6455_v43, %s5771_s30 }
 0x9be   : > { %v2718_v6 = vpop.xlane.xlu1 %2717 }
 0x9bf   : > { %v2728_v10 = vsub.f32 %v6474_v29, %v2718_v6 }
 0x9c1   : > { %v2732_v11 = vmul.f32 1.442695, %v2728_v10 }
 0x9c3   : > { %5580 = vpow2.f32 %v2732_v11 }
 0x9c6   : > { %v2721_v7 = vpop.xlane.xlu2 %2720 }
 0x9c7   : > { %v2729_v41 = vsub.f32 %v6478_v40, %v2721_v7 }
 0x9c9   : > { %v6542_v13 = vpop.eup %5580  ;;  %v2734_v19 = vmul.f32 1.442695, %v2729_v41 }
 0x9ca   : > { %v2740_v17 = vsel %vm1387_vm11, %v6542_v13, 0.0 }
 0x9cb   : > { %5582 = vpow2.f32 %v2734_v19  ;;  %2741 = vadd.xlane.f32.xlu2 %v2740_v17 }
 0x9ce   : > { %v2582_v20 = vpop.xlane.xlu2 %2581 }
 0x9cf   : > { %v2724_v36 = vpop.xlane.xlu0 %2723  ;;  %5584 = vrcp.f32 %v2582_v20 }
 0x9d0   : > { %v2730_v16 = vsub.f32 %v6484_v44, %v2724_v36 }
 0x9d1   : > { %v6547_v26 = vpop.eup %5582 }
 0x9d2   : > { %v2736_v27 = vmul.f32 1.442695, %v2730_v16  ;;  %v2743_v29 = vsel %vm1387_vm11, %v6547_v26, 0.0 }
 0x9d3   : > { %2744 = vadd.xlane.f32.xlu0 %v2743_v29 }
 0x9d4   : > { %5586 = vpow2.f32 %v2736_v27 }
 0x9d5   : > { %v5585_v40 = vpop.eup %5584 }
 0x9d6   : > { %v2888_v30 = vpop.xlane.xlu2 %2887  ;;  %v2596_v44 = vmul.f32 %v5585_v40, %v6482_v12 }
 0x9d7   : > { %v2898_v32 = vsub.f32 %v6488_v46, %v2888_v30  ;;  %v2727_v53 = vpop.xlane.xlu1 %2726  ;;  %v2585_v33 = vpop.xlane.xlu0 %2584 }
 0x9d8   : > { %v2731_v35 = vsub.f32 %v6494_v18, %v2727_v53  ;;  %5588 = vrcp.f32 %v2585_v33  ;;  %v2600_v46 = vpack.c.bf16 %v2596_v44, %v2596_v44 }
 0x9d9   : > { %v2902_v5 = vmul.f32 1.442695, %v2898_v32 }
 0x9da   : > { %v6553_v38 = vpop.eup %5586  ;;  %v2738_v39 = vmul.f32 1.442695, %v2731_v35  ;;  %v2606_v55 = vunpack.c.l.b16 %v2600_v46 }
 0x9db   : > { %5590 = vpow2.f32 %v2902_v5  ;;  %v2746_v45 = vsel %vm1387_vm11, %v6553_v38, 0.0 }
 0x9dc   : > { %5592 = vpow2.f32 %v2738_v39  ;;  %2747 = vadd.xlane.f32.xlu2 %v2746_v45 }
 0x9de   : > { %v5589_v62 = vpop.eup %5588 }
 0x9df   : > { %v2597_v22 = vmul.f32 %v5589_v62, %v6492_v47  ;;  %v2894_v48 = vpop.xlane.xlu1 %2893  ;;  %v2891_v49 = vpop.xlane.xlu0 %2890 }
 0x9e0   : > { %v2900_v18 = vsub.f32 %v6504_v15, %v2894_v48  ;;  %v2899_v50 = vsub.f32 %v6502_v8, %v2891_v49 }
 0x9e1   : > { %v6561_v59 = vpop.eup %5590  ;;  %v2601_v42 = vpack.c.bf16 %v2597_v22, %v2597_v22 }
 0x9e2   : > { %v6563_v12 = vpop.eup %5592  ;;  %v2906_v28 = vmul.f32 1.442695, %v2900_v18  ;;  %v2904_v52 = vmul.f32 1.442695, %v2899_v50  ;;  %v2910_v25 = vsel %vm1387_vm11, %v6561_v59, 0.0 }
 0x9e3   : > { %v2607_v56 = vunpack.c.l.b16 %v2601_v42  ;;  %v2749_v47 = vsel %vm1387_vm11, %v6563_v12, 0.0 }
 0x9e4   : > { %5594 = vpow2.f32 %v2906_v28  ;;  %2750 = vadd.xlane.f32.xlu0 %v2749_v47  ;;  %2911 = vadd.xlane.f32.xlu2 %v2910_v25 }
 0x9e5   : > { %v2608_v15 = vpack.c.b16 %v2607_v56, %v2606_v55  ;;  %5596 = vpow2.f32 %v2904_v52 }
 0x9e7   : > { %4967 = vmatmul.msk.bf16.vlgmr.msrb.gmra.mxu2 %vm1387_vm11, %v2608_v15  ;;  %v2588_v8 = vpop.xlane.xlu0 %2587  ;;  %v2897_v33 = vpop.xlane.xlu2 %2896 }
 0x9e8   : > { %v2591_v34 = vpop.xlane.xlu1 %2590  ;;  %5598 = vrcp.f32 %v2588_v8  ;;  %v2901_v40 = vsub.f32 %v6516_v24, %v2897_v33 }
 0x9e9   : > { %5600 = vrcp.f32 %v2591_v34 }
 0x9ea   : > { %v6570_v58 = vpop.eup %5594  ;;  %v2908_v35 = vmul.f32 1.442695, %v2901_v40 }
 0x9eb   : > { %v6572_v0 = vpop.eup %5596  ;;  %v2916_v2 = vsel %vm1387_vm11, %v6570_v58, 0.0 }
 0x9ec   : > { %2917 = vadd.xlane.f32.xlu1 %v2916_v2  ;;  %v2913_v51 = vsel %vm1387_vm11, %v6572_v0, 0.0 }
 0x9ed   : > { %2914 = vadd.xlane.f32.xlu0 %v2913_v51 }
 0x9ee   : > { %v5599_v3 = vpop.eup %5598 }
 0x9ef   : > { %v5601_v4 = vpop.eup %5600  ;;  %v2598_v6 = vmul.f32 %v5599_v3, %v6512_v60  ;;  %v3058_v10 = vpop.xlane.xlu0 %3057 }
 0x9f0   : > { %v2599_v11 = vmul.f32 %v5601_v4, %v6514_v61  ;;  %v3061_v7 = vpop.xlane.xlu1 %3060  ;;  %v3068_v41 = vsub.f32 %v6510_v57, %v3058_v10 }
 0x9f1   : > { %v2602_v19 = vpack.c.bf16 %v2598_v6, %v2598_v6  ;;  %v3069_v17 = vsub.f32 %v6524_v9, %v3061_v7 }
 0x9f2   : > { %v2603_v20 = vpack.c.bf16 %v2599_v11, %v2599_v11  ;;  %v3072_v36 = vmul.f32 1.442695, %v3068_v41 }
 0x9f3   : > { %v2634_v16 = vunpack.c.l.b16 %v2602_v19  ;;  %v3074_v27 = vmul.f32 1.442695, %v3069_v17 }
 0x9f4   : > { %v2635_v29 = vunpack.c.l.b16 %v2603_v20  ;;  %5602 = vpow2.f32 %v3072_v36 }
 0x9f5   : > { %5604 = vpow2.f32 %v3074_v27 }
 0x9f6   : > { %v2636_v30 = vpack.c.b16 %v2635_v29, %v2634_v16  ;;  %5606 = vpow2.f32 %v2908_v35 }
 0x9f7   : > { %v3067_v44 = vpop.xlane.xlu2 %3066 }
 0x9f8   : > { %4968 = vmatmul.msk.bf16.vlgmr.msra.gmra.mxu3 %vm1387_vm11, %v2636_v30  ;;  %v3064_v9 = vpop.xlane.xlu1 %3063  ;;  %v3071_v62 = vsub.f32 %v6532_v54, %v3067_v44 }
 0x9f9   : > { %v3070_v5 = vsub.f32 %v6526_v1, %v3064_v9 }
 0x9fa   : > { %v6583_v60 = vpop.eup %5602  ;;  %v3078_v46 = vmul.f32 1.442695, %v3071_v62 }
 0x9fb   : > { %v6585_v32 = vpop.eup %5604  ;;  %v3080_v57 = vsel %vm1387_vm11, %v6583_v60, 0.0  ;;  %v3076_v39 = vmul.f32 1.442695, %v3070_v5 }
 0x9fc   : > { %v3083_v61 = vsel %vm1387_vm11, %v6585_v32, 0.0  ;;  %3081 = vadd.xlane.f32.xlu2 %v3080_v57  ;;  %v6599_v45 = vpop.eup %5606 }
 0x9fd   : > { %3084 = vadd.xlane.f32.xlu1 %v3083_v61  ;;  %5608 = vpow2.f32 %v3076_v39 }
 0x9fe   : > { %5610 = vpow2.f32 %v3078_v46 }
 0xa01   : > { %2939 = vrot.lane.b32.xlu0 %v6444_v37, %s5771_s30 }
 0xa03   : > { %v6604_v22 = vpop.eup %5608 }
 0xa04   : > { %v6608_v24 = vpop.eup %5610 }
 0xa05   : > { %v3089_v1 = vsel %vm1387_vm11, %v6608_v24, 0.0 }
 0xa10   : > { %v2965_v53 = vpop.permute.xlu1 %2964 }
 0xa11   : > { %2977 = vmatpush.bf16.msra.mxu3 %v2965_v53 }
 0xa14   : > { %3109 = vrot.lane.b32.xlu2 %v6444_v37, %s5772_s26  ;;  %v2919_v37 = vsel %vm1387_vm11, %v6599_v45, 0.0 }
 0xa16   : > { %3134 = vrot.lane.b32.xlu1 %v6455_v43, %s5772_s26  ;;  %v3086_v43 = vsel %vm1387_vm11, %v6604_v22, 0.0 }
 0xa2b   : > { %2920 = vadd.xlane.f32.xlu0 %v2919_v37 }
 0xa33   : > { %3087 = vadd.xlane.f32.xlu0 %v3086_v43 }
 0xa3b   : > { %3090 = vadd.xlane.f32.xlu0 %v3089_v1 }
 0xa3e   : > { %v2742_v54 = vpop.xlane.xlu2 %2741 }
 0xa3f   : > { %5612 = vrcp.f32 %v2742_v54 }
 0xa45   : > { %v5613_v49 = vpop.eup %5612 }
 0xa46   : > { %v2745_v48 = vpop.xlane.xlu0 %2744  ;;  %v2756_v18 = vmul.f32 %v5613_v49, %v6542_v13 }
 0xa47   : > { %5614 = vrcp.f32 %v2745_v48 }
 0xa48   : > { %v2760_v42 = vpack.c.bf16 %v2756_v18, %v2756_v18 }
 0xa4a   : > { %v2766_v55 = vunpack.c.l.b16 %v2760_v42 }
 0xa4d   : > { %v5615_v50 = vpop.eup %5614 }
 0xa4e   : > { %v2757_v28 = vmul.f32 %v5615_v50, %v6547_v26 }
 0xa4f   : > { %v2748_v25 = vpop.xlane.xlu2 %2747 }
 0xa50   : > { %v2761_v52 = vpack.c.bf16 %v2757_v28, %v2757_v28  ;;  %5616 = vrcp.f32 %v2748_v25 }
 0xa52   : > { %v2767_v56 = vunpack.c.l.b16 %v2761_v52 }
 0xa54   : > { %v2768_v47 = vpack.c.b16 %v2767_v56, %v2766_v55 }
 0xa56   : > { %4971 = vmatmul.msk.bf16.vlgmr.msra.gmra.mxu2 %vm1387_vm11, %v2768_v47  ;;  %v5617_v8 = vpop.eup %5616 }
 0xa57   : > { %v2751_v15 = vpop.xlane.xlu0 %2750  ;;  %v2758_v34 = vmul.f32 %v5617_v8, %v6553_v38  ;;  %v2912_v51 = vpop.xlane.xlu2 %2911 }
 0xa58   : > { %5618 = vrcp.f32 %v2751_v15 }
 0xa59   : > { %v2762_v13 = vpack.c.bf16 %v2758_v34, %v2758_v34 }
 0xa5b   : > { %v2791_v6 = vunpack.c.l.b16 %v2762_v13 }
 0xa5e   : > { %v5619_v2 = vpop.eup %5618 }
 0xa5f   : > { %v2759_v3 = vmul.f32 %v5619_v2, %v6563_v12  ;;  %v2918_v19 = vpop.xlane.xlu1 %2917 }
 0xa60   : > { %v2915_v4 = vpop.xlane.xlu0 %2914 }
 0xa61   : > { %5620 = vrcp.f32 %v2915_v4  ;;  %v2763_v26 = vpack.c.bf16 %v2759_v3, %v2759_v3 }
 0xa62   : > { %5622 = vrcp.f32 %v2912_v51 }
 0xa63   : > { %v2792_v10 = vunpack.c.l.b16 %v2763_v26 }
 0xa65   : > { %v2793_v11 = vpack.c.b16 %v2792_v10, %v2791_v6 }
 0xa67   : > { %v5621_v7 = vpop.eup %5620  ;;  %4972 = vmatmul.msk.bf16.vlgmr.msrb.gmra.mxu3 %vm1387_vm11, %v2793_v11 }
 0xa68   : > { %v5623_v41 = vpop.eup %5622  ;;  %v2927_v17 = vmul.f32 %v5621_v7, %v6572_v0 }
 0xa69   : > { %v2926_v20 = vmul.f32 %v5623_v41, %v6561_v59 }
 0xa6a   : > { %v2627_v38 = vpop.f32.mrf.mxu2  ;;  %v2931_v16 = vpack.c.bf16 %v2927_v17, %v2927_v17 }
 0xa6b   : > { %v2660_v36 = vpack.c.bf16 %v2627_v38, %v2627_v38  ;;  %v2930_v12 = vpack.c.bf16 %v2926_v20, %v2926_v20 }
 0xa6c   : > { %v2937_v30 = vunpack.c.l.b16 %v2931_v16 }
 0xa6d   : > { %2664 = vst.msk [vmem:[#allocation4] sm:$0xf] %vm1496_vm12, %v2660_v36  ;;  %v2936_v61 = vunpack.c.l.b16 %v2930_v12 }
 0xa6f   : > { %v3082_v27 = vpop.xlane.xlu2 %3081  ;;  %v2938_v33 = vpack.c.b16 %v2937_v30, %v2936_v61 }
 0xa70   : > { %v3085_v29 = vpop.xlane.xlu1 %3084  ;;  %5624 = vrcp.f32 %v3082_v27 }
 0xa71   : > { %5626 = vrcp.f32 %v3085_v29 }
 0xa72   : > { %v2629_v57 = vpop.f32.mrf.mxu2  ;;  %5628 = vrcp.f32 %v2918_v19 }
 0xa73   : > { %v2661_v9 = vpack.c.bf16 %v2629_v57, %v2629_v57  ;;  %v2940_v53 = vpop.permute.xlu0 %2939 }
 0xa74   : > { %2952 = vmatpush.bf16.msrb.mxu2 %v2940_v53 }
 0xa75   : > { %2665 = vst.msk [vmem:[#allocation4 + $0x4] sm:$0xf] %vm1496_vm12, %v2661_v9 }
 0xa76   : > { %v5625_v0 = vpop.eup %5624 }
 0xa77   : > { %v5627_v59 = vpop.eup %5626  ;;  %4975 = vmatmul.msk.bf16.vlgmr.msrb.gmra.mxu2 %vm1387_vm11, %v2938_v33  ;;  %v3110_v40 = vpop.permute.xlu2 %3109  ;;  %v3096_v5 = vmul.f32 %v5625_v0, %v6583_v60 }
 0xa78   : > { %3122 = vmatpush.bf16.msra.mxu2 %v3110_v40  ;;  %v3097_v35 = vmul.f32 %v5627_v59, %v6585_v32  ;;  %v5629_v60 = vpop.eup %5628  ;;  %v5358_v40 = vld [vmem:[%s5948_s1 + $0x38] sm:$0xff] }
 0xa79   : > { %v3100_v37 = vpack.c.bf16 %v3096_v5, %v3096_v5  ;;  %v2928_v18 = vmul.f32 %v5629_v60, %v6570_v58  ;;  %3258 = vmatpush.bf16.msra.mxu0 %v5358_v40  ;;  %v5385_v40 = vld [vmem:[%s7247_s25 + $0xcc] sm:$0xf0] }
 0xa7a   : > { %v3101_v62 = vpack.c.bf16 %v3097_v35, %v3097_v35  ;;  %v5357_v35 = vld [vmem:[%s5948_s1 + $0x30] sm:$0xff] }
 0xa7b   : > { %v2655_v39 = vpop.f32.mrf.mxu3  ;;  %v3106_v43 = vunpack.c.l.b16 %v3100_v37  ;;  %v2932_v42 = vpack.c.bf16 %v2928_v18, %v2928_v18  ;;  %v5354_v37 = vld [vmem:[%s5948_s1 + $0x18] sm:$0xff] }
 0xa7c   : > { %v2662_v44 = vpack.c.bf16 %v2655_v39, %v2655_v39  ;;  %v3107_v46 = vunpack.c.l.b16 %v3101_v62  ;;  %v5355_v62 = vld [vmem:[%s5948_s1 + $0x20] sm:$0xff] }
 0xa7d   : > { %v2961_v55 = vunpack.c.l.b16 %v2932_v42  ;;  %3259 = vmatpush.bf16.msra.mxu0 %v5357_v35  ;;  %v5383_v35 = vld [vmem:[%s7247_s25 + $0xc4] sm:$0xf] }
 0xa7e   : > { %2666 = vst.msk [vmem:[#allocation4 + $0x8] sm:$0xf] %vm1496_vm12, %v2662_v44  ;;  %v3108_v48 = vpack.c.b16 %v3107_v46, %v3106_v43  ;;  %v5356_v44 = vld [vmem:[%s5948_s1 + $0x28] sm:$0xff]  ;;  %v5353_v46 = vld [vmem:[%s5948_s1 + $0x10] sm:$0xff] }
 0xa81   : > { %3260 = vmatpush.bf16.msra.mxu0 %v5356_v44  ;;  %v5127_v44 = vld [vmem:[%s7247_s25 + $0xc8] sm:$0xf] }
 0xa83   : > { %v2657_v1 = vpop.f32.mrf.mxu3 }
 0xa84   : > { %v2663_v54 = vpack.c.bf16 %v2657_v1, %v2657_v1  ;;  %v5352_v1 = vld [vmem:[%s5948_s1 + $0x8] sm:$0xff] }
 0xa85   : > { %3261 = vmatpush.bf16.msra.mxu0 %v5355_v62  ;;  %v5386_v62 = vld [vmem:[%s7247_s25 + $0xd4] sm:$0xf0] }
 0xa86   : > { %2667 = vst.msk [vmem:[#allocation4 + $0xc] sm:$0xf] %vm1496_vm12, %v2663_v54  ;;  %v5351_v54 = vld [vmem:[%s5948_s1] sm:$0xff] }
 0xa87   : > { %4979 = vmatmul.msk.bf16.vlgmr.msra.gmra.mxu2 %vm1387_vm11, %v3108_v48 }
 0xa88   : > { %v3135_v49 = vpop.permute.xlu1 %3134 }
 0xa89   : > { %3147 = vmatpush.bf16.msrb.mxu3 %v3135_v49  ;;  %3262 = vmatpush.bf16.msra.mxu0 %v5354_v37 }
 0xa8d   : > { %3263 = vmatpush.bf16.msra.mxu0 %v5353_v46  ;;  %v5128_v46 = vor.u32 %v5386_v62, %v5127_v44  ;;  %v5039_v44 = vld [vmem:[%s7247_s25 + $0x20] sm:$0xf]  ;;  %v5365_v62 = vld [vmem:[%s7247_s25 + $0x2c] sm:$0xf0] }
 0xa91   : > { %3264 = vmatpush.bf16.msra.mxu0 %v5352_v1  ;;  %v5129_v1 = vld [vmem:[%s7247_s25 + $0xd8] sm:$0xf0] }
 0xa95   : > { %3265 = vmatpush.bf16.msra.mxu0 %v5351_v54 }
 0xa9e   : > { %v2921_v32 = vpop.xlane.xlu0 %2920 }
 0xa9f   : > { %5630 = vrcp.f32 %v2921_v32 }
 0xaa5   : > { %v5631_v50 = vpop.eup %5630 }
 0xaa6   : > { %v2929_v28 = vmul.f32 %v5631_v50, %v6599_v45  ;;  %v3088_v52 = vpop.xlane.xlu0 %3087 }
 0xaa7   : > { %5632 = vrcp.f32 %v3088_v52 }
 0xaa8   : > { %v2933_v25 = vpack.c.bf16 %v2929_v28, %v2929_v28 }
 0xaaa   : > { %v2962_v56 = vunpack.c.l.b16 %v2933_v25 }
 0xaac   : > { %v2963_v47 = vpack.c.b16 %v2962_v56, %v2961_v55  ;;  %v5488_v55 = vld [vmem:[%s7246_s24] ss:$0 sm:$0xff] }
 0xaad   : > { %v5633_v8 = vpop.eup %5632 }
 0xaae   : > { %4976 = vmatmul.msk.bf16.vlgmr.msra.gmra.mxu3 %vm1387_vm11, %v2963_v47  ;;  %v3091_v15 = vpop.xlane.xlu0 %3090  ;;  %v3098_v34 = vmul.f32 %v5633_v8, %v6604_v22 }
 0xaaf   : > { %5634 = vrcp.f32 %v3091_v15 }
 0xab0   : > { %v3102_v51 = vpack.c.bf16 %v3098_v34, %v3098_v34 }
 0xab2   : > { %v3131_v3 = vunpack.c.l.b16 %v3102_v51 }
 0xab5   : > { %v5635_v2 = vpop.eup %5634 }
 0xab6   : > { %v3099_v58 = vmul.f32 %v5635_v2, %v6608_v24 }
 0xab8   : > { %v3103_v13 = vpack.c.bf16 %v3099_v58, %v3099_v58 }
 0xaba   : > { %v3132_v45 = vunpack.c.l.b16 %v3103_v13 }
 0xabc   : > { %v3133_v4 = vpack.c.b16 %v3132_v45, %v3131_v3 }
 0xabe   : > { %4980 = vmatmul.msk.bf16.vlgmr.msrb.gmra.mxu3 %vm1387_vm11, %v3133_v4 }
 0xad9   : > { %v2784_v26 = vpop.f32.mrf.mxu2 }
 0xada   : > { %v2814_v6 = vpack.c.bf16 %v2784_v26, %v2784_v26 }
 0xadc   : > { %2822 = vrot.lane.b32.xlu0 %v2814_v6, %s5772_s26 }
 0xae1   : > { %v2786_v10 = vpop.f32.mrf.mxu2 }
 0xae2   : > { %v2815_v11 = vpack.c.bf16 %v2786_v10, %v2786_v10 }
 0xae4   : > { %2824 = vrot.lane.b32.xlu1 %v2815_v11, %s5772_s26 }
 0xaea   : > { %v2809_v19 = vpop.f32.mrf.mxu3 }
 0xaeb   : > { %v2816_v38 = vpack.c.bf16 %v2809_v19, %v2809_v19 }
 0xaf2   : > { %v2811_v36 = vpop.f32.mrf.mxu3 }
 0xaf3   : > { %v2817_v12 = vpack.c.bf16 %v2811_v36, %v2811_v36  ;;  %v5135_v36 = vld [vmem:[%s7247_s25 + $0xe0] sm:$0xf] }
 0xafa   : > { %v2954_v7 = vpop.f32.mrf.mxu2 }
 0xafb   : > { %v2984_v22 = vpack.c.bf16 %v2954_v7, %v2954_v7 }
 0xafd   : > { %2992 = vrot.lane.b32.xlu2 %v2984_v22, %s5771_s30 }
 0xb02   : > { %v2956_v41 = vpop.f32.mrf.mxu2 }
 0xb03   : > { %v2985_v24 = vpack.c.bf16 %v2956_v41, %v2956_v41 }
 0xb05   : > { %2994 = vrot.lane.b32.xlu1 %v2985_v24, %s5771_s30 }
 0xb0a   : > { %v3124_v17 = vpop.f32.mrf.mxu2 }
 0xb0b   : > { %v3154_v20 = vpack.c.bf16 %v3124_v17, %v3124_v17 }
 0xb0d   : > { %3162 = vrot.lane.b32.xlu2 %v3154_v20, %s5770_s17  ;;  %2826 = vrot.lane.b32.xlu1 %v2816_v38, %s5772_s26 }
 0xb12   : > { %v3126_v16 = vpop.f32.mrf.mxu2 }
 0xb13   : > { %v3155_v27 = vpack.c.bf16 %v3126_v16, %v3126_v16  ;;  %v5389_v16 = vld [vmem:[%s7247_s25 + $0xec] sm:$0xf0] }
 0xb15   : > { %2828 = vrot.lane.b32.xlu2 %v2817_v12, %s5772_s26  ;;  %3164 = vrot.lane.b32.xlu0 %v3155_v27, %s5770_s17  ;;  %v5387_v12 = vld [vmem:[%s7247_s25 + $0xe4] sm:$0xf]  ;;  %v5136_v27 = vor.u32 %v5389_v16, %v5135_v36 }
 0xb17   : > { %3573 = vmatpush.bf16.msra.mxu1 %v5136_v27  ;;  %v5081_v27 = vld [vmem:[%s7247_s25 + $0x78] sm:$0xf0] }
 0xb31   : > { %v2979_v29 = vpop.f32.mrf.mxu3 }
 0xb32   : > { %v2986_v30 = vpack.c.bf16 %v2979_v29, %v2979_v29  ;;  %v5137_v29 = vld [vmem:[%s7247_s25 + $0xf0] sm:$0xf0] }
 0xb34   : > { %2996 = vrot.lane.b32.xlu0 %v2986_v30, %s5771_s30  ;;  %v5143_v30 = vld [vmem:[%s7247_s25 + $0xe8] sm:$0xf] }
 0xb39   : > { %v2981_v57 = vpop.f32.mrf.mxu3 }
 0xb3a   : > { %v2987_v61 = vpack.c.bf16 %v2981_v57, %v2981_v57  ;;  %v5390_v57 = vld [vmem:[%s7247_s25 + $0xf4] sm:$0xf0] }
 0xb3c   : > { %2998 = vrot.lane.b32.xlu1 %v2987_v61, %s5771_s30  ;;  %v5140_v61 = vor.u32 %v5387_v12, %v5137_v29  ;;  %v5372_v12 = vld [vmem:[%s7247_s25 + $0x6c] sm:$0xf] }
 0xb3d   : > { %v5084_v29 = vor.u32 %v5372_v12, %v5081_v27 }
 0xb3e   : > { %3592 = vmatpush.bf16.msrb.mxu2 %v5140_v61  ;;  %v5367_v61 = vld [vmem:[%s7247_s25 + $0x44] sm:$0xf] }
 0xb41   : > { %v3149_v9 = vpop.f32.mrf.mxu3 }
 0xb42   : > { %v3156_v53 = vpack.c.bf16 %v3149_v9, %v3149_v9  ;;  %v5144_v9 = vor.u32 %v5390_v57, %v5143_v30  ;;  %v5055_v30 = vld [vmem:[%s7247_s25 + $0x40] sm:$0xf]  ;;  %v5369_v57 = vld [vmem:[%s7247_s25 + $0x4c] sm:$0xf0] }
 0xb44   : > { %3166 = vrot.lane.b32.xlu2 %v3156_v53, %s5770_s17  ;;  %v5388_v53 = vld [vmem:[%s7247_s25 + $0xec] sm:$0xf]  ;;  %3611 = vmatpush.bf16.msra.mxu3 %v5144_v9  ;;  %v5056_v9 = vor.u32 %v5369_v57, %v5055_v30 }
 0xb48   : > { %3612 = vmatpush.bf16.msra.mxu3 %v5128_v46  ;;  %v5040_v46 = vor.u32 %v5365_v62, %v5039_v44 }
 0xb49   : > { %v3151_v33 = vpop.f32.mrf.mxu3 }
 0xb4a   : > { %v3157_v0 = vpack.c.bf16 %v3151_v33, %v3151_v33  ;;  %v5145_v33 = vld [vmem:[%s7247_s25 + $0xf8] sm:$0xf0] }
 0xb4c   : > { %3168 = vrot.lane.b32.xlu0 %v3157_v0, %s5770_s17  ;;  %v5148_v0 = vor.u32 %v5388_v53, %v5145_v33  ;;  %v5057_v53 = vld [vmem:[%s7247_s25 + $0x50] sm:$0xf0]  ;;  %v5063_v33 = vld [vmem:[%s7247_s25 + $0x48] sm:$0xf] }
 0xb4e   : > { %v2823_v59 = vpop.permute.xlu0 %2822  ;;  %3630 = vmatpush.bf16.msrb.mxu0 %v5148_v0  ;;  %v5370_v0 = vld [vmem:[%s7247_s25 + $0x54] sm:$0xf0] }
 0xb4f   : > { %2834 = vst.msk [vmem:[#allocation4] sm:$0xf] %vm1667_vm13, %v2823_v59  ;;  %v5119_v59 = vld [vmem:[%s7247_s25 + $0xc0] sm:$0xf] }
 0xb56   : > { %v2825_v5 = vpop.permute.xlu1 %2824 }
 0xb57   : > { %2835 = vst.msk [vmem:[#allocation4 + $0x4] sm:$0xf] %vm1667_vm13, %v2825_v5  ;;  %v2993_v39 = vpop.permute.xlu2 %2992  ;;  %v5120_v5 = vor.u32 %v5385_v40, %v5119_v59  ;;  %v5060_v59 = vor.u32 %v5367_v61, %v5057_v53  ;;  %v5064_v40 = vor.u32 %v5370_v0, %v5063_v33 }
 0xb58   : > { %3004 = vst.msk [vmem:[#allocation4] sm:$0xf] %vm1838_vm14, %v2993_v39  ;;  %v5121_v39 = vld [vmem:[%s7247_s25 + $0xd0] sm:$0xf0] }
 0xb59   : > { %v5124_v37 = vor.u32 %v5383_v35, %v5121_v39  ;;  %3574 = vmatpush.bf16.msra.mxu1 %v5120_v5  ;;  %v5368_v35 = vld [vmem:[%s7247_s25 + $0x4c] sm:$0xf]  ;;  %v5065_v5 = vld [vmem:[%s7247_s25 + $0x58] sm:$0xf0] }
 0xb5a   : > { %v5068_v39 = vor.u32 %v5368_v35, %v5065_v5 }
 0xb5b   : > { %3593 = vmatpush.bf16.msrb.mxu2 %v5124_v37  ;;  %v5363_v37 = vld [vmem:[%s7247_s25 + $0x24] sm:$0xf] }
 0xb67   : > { %v3163_v43 = vpop.permute.xlu2 %3162 }
 0xb68   : > { %3174 = vst.msk [vmem:[#allocation4] sm:$0xf] %vm2009_vm15, %v3163_v43  ;;  %v5384_v43 = vld [vmem:[%s7247_s25 + $0xcc] sm:$0xf] }
 0xb69   : > { %v5132_v54 = vor.u32 %v5384_v43, %v5129_v1  ;;  %v5041_v43 = vld [vmem:[%s7247_s25 + $0x30] sm:$0xf0]  ;;  %v5047_v1 = vld [vmem:[%s7247_s25 + $0x28] sm:$0xf] }
 0xb6b   : > { %3631 = vmatpush.bf16.msrb.mxu0 %v5132_v54  ;;  %v5366_v54 = vld [vmem:[%s7247_s25 + $0x34] sm:$0xf0] }
 0xb6f   : > { %v2829_v48 = vpop.permute.xlu2 %2828 }
 0xb70   : > { %2837 = vst.msk [vmem:[#allocation4 + $0xc] sm:$0xf] %vm1667_vm13, %v2829_v48  ;;  %v5103_v48 = vld [vmem:[%s7247_s25 + $0xa0] sm:$0xf] }
 0xb77   : > { %v2995_v49 = vpop.permute.xlu1 %2994 }
 0xb78   : > { %3005 = vst.msk [vmem:[#allocation4 + $0x4] sm:$0xf] %vm1838_vm14, %v2995_v49  ;;  %v5381_v49 = vld [vmem:[%s7247_s25 + $0xac] sm:$0xf0] }
 0xb7f   : > { %v2827_v32 = vpop.permute.xlu1 %2826 }
 0xb80   : > { %2836 = vst.msk [vmem:[#allocation4 + $0x8] sm:$0xf] %vm1667_vm13, %v2827_v32  ;;  %v5379_v32 = vld [vmem:[%s7247_s25 + $0xa4] sm:$0xf] }
 0xb87   : > { %v3165_v60 = vpop.permute.xlu0 %3164 }
 0xb88   : > { %3175 = vst.msk [vmem:[#allocation4 + $0x4] sm:$0xf] %vm2009_vm15, %v3165_v60  ;;  %v5104_v60 = vor.u32 %v5381_v49, %v5103_v48  ;;  %v5044_v48 = vor.u32 %v5363_v37, %v5041_v43  ;;  %v5048_v49 = vor.u32 %v5366_v54, %v5047_v1 }
 0xb8a   : > { %3575 = vmatpush.bf16.msra.mxu1 %v5104_v60  ;;  %v5049_v60 = vld [vmem:[%s7247_s25 + $0x38] sm:$0xf0] }
 0xb8f   : > { %v5349_v18 = vld [vmem:[#allocation4] sm:$0xff] }
 0xb90   : > { %3266 = vmatmul.bf16.vlgmr.msra.gmra.mxu0 %v5349_v18  ;;  %v5105_v18 = vld [vmem:[%s7247_s25 + $0xb0] sm:$0xf0] }
 0xb9e   : > { %v3167_v42 = vpop.permute.xlu2 %3166 }
 0xba6   : > { %v2997_v50 = vpop.permute.xlu0 %2996 }
 0xba7   : > { %3006 = vst.msk [vmem:[#allocation4 + $0x8] sm:$0xf] %vm1838_vm14, %v2997_v50  ;;  %v5111_v50 = vld [vmem:[%s7247_s25 + $0xa8] sm:$0xf] }
 0xba8   : > { %3176 = vst.msk [vmem:[#allocation4 + $0x8] sm:$0xf] %vm2009_vm15, %v3167_v42  ;;  %v5382_v42 = vld [vmem:[%s7247_s25 + $0xb4] sm:$0xf0] }
 0xbae   : > { %v2999_v28 = vpop.permute.xlu1 %2998 }
 0xbaf   : > { %3007 = vst.msk [vmem:[#allocation4 + $0xc] sm:$0xf] %vm1838_vm14, %v2999_v28  ;;  %v5108_v28 = vor.u32 %v5379_v32, %v5105_v18  ;;  %v5364_v32 = vld [vmem:[%s7247_s25 + $0x2c] sm:$0xf] }
 0xbb0   : > { %v5052_v18 = vor.u32 %v5364_v32, %v5049_v60 }
 0xbb1   : > { %3594 = vmatpush.bf16.msrb.mxu2 %v5108_v28  ;;  %v5359_v28 = vld [vmem:[%s7247_s25 + $0x4] sm:$0xf] }
 0xbbe   : > { %v3169_v52 = vpop.permute.xlu0 %3168 }
 0xbbf   : > { %3177 = vst.msk [vmem:[#allocation4 + $0xc] sm:$0xf] %vm2009_vm15, %v3169_v52  ;;  %v5112_v52 = vor.u32 %v5382_v42, %v5111_v50  ;;  %v5023_v50 = vld [vmem:[%s7247_s25] sm:$0xf]  ;;  %v5361_v42 = vld [vmem:[%s7247_s25 + $0xc] sm:$0xf0] }
 0xbc1   : > { %3613 = vmatpush.bf16.msra.mxu3 %v5112_v52  ;;  %v5024_v52 = vor.u32 %v5361_v42, %v5023_v50  ;;  %v3403_v50 = vld [vmem:[%s5964_s16] sm:$0xf] }
 0xbc2   : > { %v6784_v42 = vperm.slane %v3403_v50, 0 }
 0xbc6   : > { %v5350_v25 = vld [vmem:[#allocation4 + $0x8] sm:$0xff] }
 0xbc7   : > { %3271 = vmatmul.bf16.gmra.mxu0 %v5350_v25  ;;  %v5380_v25 = vld [vmem:[%s7247_s25 + $0xac] sm:$0xf] }
 0xc0d   : > { %v3267_v56 = vpop.f32.mrf.mxu0 }
 0xc0e   : > { %v3277_v47 = vadd.f32 %v3267_v56, %v6341_v14 }
 0xc10   : > { %v6672_v15 = vadd.f32 %v5488_v55, %v3277_v47  ;;  %v5087_v47 = vld [vmem:[%s7247_s25 + $0x80] sm:$0xf] }
 0xc12   : > { %3289 = vadd.xlane.f32.xlu1 %v6672_v15 }
 0xc15   : > { %v3269_v8 = vpop.f32.mrf.mxu0 }
 0xc16   : > { %v3278_v34 = vadd.f32 %v3269_v8, %v6344_v63  ;;  %v5377_v8 = vld [vmem:[%s7247_s25 + $0x8c] sm:$0xf0] }
 0xc18   : > { %v6676_v2 = vadd.f32 %v5488_v55, %v3278_v34  ;;  %v5375_v34 = vld [vmem:[%s7247_s25 + $0x84] sm:$0xf] }
 0xc1a   : > { %3291 = vadd.xlane.f32.xlu2 %v6676_v2 }
 0xc44   : > { %v3272_v51 = vpop.f32.mrf.mxu0 }
 0xc45   : > { %v3279_v58 = vadd.f32 %v3272_v51, %v6347_v21  ;;  %v5088_v51 = vor.u32 %v5377_v8, %v5087_v47 }
 0xc47   : > { %v6680_v13 = vadd.f32 %v5488_v55, %v3279_v58  ;;  %v5089_v58 = vld [vmem:[%s7247_s25 + $0x90] sm:$0xf0]  ;;  %3576 = vmatpush.bf16.msra.mxu1 %v5088_v51  ;;  %v5033_v51 = vld [vmem:[%s7247_s25 + $0x18] sm:$0xf0] }
 0xc49   : > { %3293 = vadd.xlane.f32.xlu0 %v6680_v13 }
 0xc4c   : > { %v3274_v3 = vpop.f32.mrf.mxu0 }
 0xc4d   : > { %v3280_v14 = vadd.f32 %v3274_v3, %v6350_v31  ;;  %v5095_v3 = vld [vmem:[%s7247_s25 + $0x88] sm:$0xf] }
 0xc4f   : > { %v6684_v45 = vadd.f32 %v5488_v55, %v3280_v14  ;;  %v5113_v55 = vld [vmem:[%s7247_s25 + $0xb8] sm:$0xf0]  ;;  %v5378_v14 = vld [vmem:[%s7247_s25 + $0x94] sm:$0xf0] }
 0xc50   : > { %v5116_v56 = vor.u32 %v5380_v25, %v5113_v55  ;;  %v5025_v25 = vld [vmem:[%s7247_s25 + $0x10] sm:$0xf0]  ;;  %v5031_v55 = vld [vmem:[%s7247_s25 + $0x8] sm:$0xf] }
 0xc51   : > { %3295 = vadd.xlane.f32.xlu2 %v6684_v45  ;;  %v5028_v47 = vor.u32 %v5359_v28, %v5025_v25  ;;  %v6786_v28 = vperm.slane %v3403_v50, 3 }
 0xc52   : > { %3632 = vmatpush.bf16.msrb.mxu0 %v5116_v56  ;;  %v5362_v56 = vld [vmem:[%s7247_s25 + $0x14] sm:$0xf0] }
 0xc53   : > { %v5032_v8 = vor.u32 %v5362_v56, %v5031_v55 }
 0xc85   : > { %v3290_v4 = vpop.xlane.xlu1 %3289 }
 0xc86   : > { %v3297_v63 = vmul.f32 %v3290_v4, %v6020_v23  ;;  %v5092_v4 = vor.u32 %v5375_v34, %v5089_v58  ;;  %v5360_v34 = vld [vmem:[%s7247_s25 + $0xc] sm:$0xf] }
 0xc88   : > { %v6689_v26 = vsub.f32 %v6672_v15, %v3297_v63  ;;  %v5096_v63 = vor.u32 %v5378_v14, %v5095_v3  ;;  %3595 = vmatpush.bf16.msrb.mxu2 %v5092_v4  ;;  %v5036_v3 = vor.u32 %v5360_v34, %v5033_v51 }
 0xc8a   : > { %v3305_v21 = vmul.f32 %v6689_v26, %v6689_v26  ;;  %3614 = vmatpush.bf16.msra.mxu3 %v5096_v63 }
 0xc8c   : > { %3309 = vadd.xlane.f32.xlu1 %v3305_v21  ;;  %v5376_v21 = vld [vmem:[%s7247_s25 + $0x8c] sm:$0xf] }
 0xc8d   : > { %v3292_v6 = vpop.xlane.xlu2 %3291 }
 0xc8e   : > { %v3298_v10 = vmul.f32 %v3292_v6, %v6020_v23  ;;  %v5097_v6 = vld [vmem:[%s7247_s25 + $0x98] sm:$0xf0] }
 0xc90   : > { %v6695_v31 = vsub.f32 %v6676_v2, %v3298_v10  ;;  %v5100_v10 = vor.u32 %v5376_v21, %v5097_v6 }
 0xc92   : > { %v3306_v11 = vmul.f32 %v6695_v31, %v6695_v31  ;;  %3633 = vmatpush.bf16.msrb.mxu0 %v5100_v10 }
 0xc94   : > { %3311 = vadd.xlane.f32.xlu0 %v3306_v11  ;;  %v5071_v11 = vld [vmem:[%s7247_s25 + $0x60] sm:$0xf] }
 0xc96   : > { %3634 = vmatpush.bf16.msrb.mxu0 %v5084_v29 }
 0xc9a   : > { %3635 = vmatpush.bf16.msrb.mxu0 %v5068_v39 }
 0xc9e   : > { %3636 = vmatpush.bf16.msrb.mxu0 %v5052_v18 }
 0xca2   : > { %3637 = vmatpush.bf16.msrb.mxu0 %v5036_v3 }
 0xcbc   : > { %v3294_v7 = vpop.xlane.xlu0 %3293 }
 0xcbd   : > { %v3299_v22 = vmul.f32 %v3294_v7, %v6020_v23  ;;  %v5373_v7 = vld [vmem:[%s7247_s25 + $0x6c] sm:$0xf0] }
 0xcbf   : > { %v6701_v41 = vsub.f32 %v6680_v13, %v3299_v22  ;;  %v5371_v22 = vld [vmem:[%s7247_s25 + $0x64] sm:$0xf] }
 0xcc1   : > { %v3307_v24 = vmul.f32 %v6701_v41, %v6701_v41 }
 0xcc3   : > { %3313 = vadd.xlane.f32.xlu2 %v3307_v24  ;;  %v5072_v24 = vor.u32 %v5373_v7, %v5071_v11 }
 0xcc4   : > { %v3296_v19 = vpop.xlane.xlu2 %3295 }
 0xcc5   : > { %v3300_v17 = vmul.f32 %v3296_v19, %v6020_v23  ;;  %v5073_v19 = vld [vmem:[%s7247_s25 + $0x70] sm:$0xf0]  ;;  %3577 = vmatpush.bf16.msra.mxu1 %v5072_v24 }
 0xcc6   : > { %v5076_v36 = vor.u32 %v5371_v22, %v5073_v19 }
 0xcc7   : > { %v6707_v38 = vsub.f32 %v6684_v45, %v3300_v17  ;;  %v5079_v17 = vld [vmem:[%s7247_s25 + $0x68] sm:$0xf] }
 0xcc8   : > { %3596 = vmatpush.bf16.msrb.mxu2 %v5076_v36 }
 0xcc9   : > { %v3308_v20 = vmul.f32 %v6707_v38, %v6707_v38  ;;  %3578 = vmatpush.bf16.msra.mxu1 %v5056_v9 }
 0xccb   : > { %3315 = vadd.xlane.f32.xlu1 %v3308_v20  ;;  %v5374_v20 = vld [vmem:[%s7247_s25 + $0x74] sm:$0xf0] }
 0xccc   : > { %v5080_v16 = vor.u32 %v5374_v20, %v5079_v17  ;;  %3597 = vmatpush.bf16.msrb.mxu2 %v5060_v59 }
 0xccd   : > { %3579 = vmatpush.bf16.msra.mxu1 %v5040_v46 }
 0xcce   : > { %3615 = vmatpush.bf16.msra.mxu3 %v5080_v16 }
 0xcd0   : > { %3598 = vmatpush.bf16.msrb.mxu2 %v5044_v48 }
 0xcd1   : > { %3580 = vmatpush.bf16.msra.mxu1 %v5024_v52 }
 0xcd2   : > { %3616 = vmatpush.bf16.msra.mxu3 %v5064_v40 }
 0xcd4   : > { %3599 = vmatpush.bf16.msrb.mxu2 %v5028_v47 }
 0xcd6   : > { %3617 = vmatpush.bf16.msra.mxu3 %v5048_v49 }
 0xcda   : > { %3618 = vmatpush.bf16.msra.mxu3 %v5032_v8  ;;  %v6802_v8 = vperm.slane %v3403_v50, 2 }
 0xcff   : > { %v3310_v58 = vpop.xlane.xlu1 %3309 }
 0xd00   : > { %v3317_v14 = vmul.f32 %v3310_v58, %v6020_v23 }
 0xd02   : > { %v3321_v4 = vadd.f32 1e-06, %v3317_v14 }
 0xd04   : > { %5636 = vrsqrt.f32 %v3321_v4  ;;  %vm3331_vm11 = vweird.f32 %v3321_v4 }
 0xd07   : > { %v3312_v63 = vpop.xlane.xlu0 %3311 }
 0xd08   : > { %v3318_v21 = vmul.f32 %v3312_v63, %v6020_v23 }
 0xd0a   : > { %v5637_v6 = vpop.eup %5636  ;;  %v3322_v10 = vadd.f32 1e-06, %v3318_v21 }
 0xd0b   : > { %v3326_v11 = vmul.f32 %v5637_v6, %v3321_v4  ;;  %vm3332_vm10 = vweird.f32 %v5637_v6 }
 0xd0c   : > { %5638 = vrsqrt.f32 %v3322_v10  ;;  %vm3333_vm13 = vmor %vm3331_vm11, %vm3332_vm10  ;;  %vm3341_vm14 = vweird.f32 %v3322_v10 }
 0xd0d   : > { %v3327_v7 = vmul.f32 %v5637_v6, %v3326_v11 }
 0xd0f   : > { %v3328_v22 = vmul.f32 0.5, %v3327_v7 }
 0xd11   : > { %v3329_v19 = vsub.f32 1.5, %v3328_v22 }
 0xd12   : > { %v5639_v24 = vpop.eup %5638 }
 0xd13   : > { %v3336_v17 = vmul.f32 %v5639_v24, %v3322_v10  ;;  %v3330_v36 = vmul.f32 %v5637_v6, %v3329_v19  ;;  %vm3342_vm12 = vweird.f32 %v5639_v24 }
 0xd14   : > { %vm3343_vm15 = vmor %vm3341_vm14, %vm3342_vm12 }
 0xd15   : > { %v3337_v20 = vmul.f32 %v5639_v24, %v3336_v17  ;;  %v3334_v27 = vsel %vm3333_vm13, %v5637_v6, %v3330_v36  ;;  %v5398_v36 = vld [vmem:[%s5969_s2 + $0x38] sm:$0xff] }
 0xd16   : > { %v3365_v57 = vmul.f32 %v3334_v27, %v6689_v26  ;;  %4329 = vmatpush.bf16.msrb.mxu1 %v5398_v36 }
 0xd17   : > { %v3338_v16 = vmul.f32 0.5, %v3337_v20 }
 0xd19   : > { %v3339_v12 = vsub.f32 1.5, %v3338_v16 }
 0xd1b   : > { %v3340_v29 = vmul.f32 %v5639_v24, %v3339_v12 }
 0xd1d   : > { %v3344_v30 = vsel %vm3343_vm15, %v5639_v24, %v3340_v29  ;;  %v5422_v29 = vld [vmem:[%s5969_s2 + $0xf8] sm:$0xff] }
 0xd1e   : > { %v3366_v61 = vmul.f32 %v3344_v30, %v6695_v31  ;;  %4386 = vmatpush.bf16.msra.mxu0 %v5422_v29 }
 0xd20   : > { %v3369_v9 = vpack.c.bf16 %v3366_v61, %v3365_v57 }
 0xd22   : > { %3581 = vmatmul.bf16.vlgmr.msra.gmra.mxu1 %v3369_v9  ;;  %3600 = vmatmul.bf16.vlgmr.msrb.gmra.mxu2 %v3369_v9 }
 0xd23   : > { %3619 = vmatmul.bf16.vlgmr.msra.gmra.mxu3 %v3369_v9  ;;  %3638 = vmatmul.bf16.vlgmr.msrb.gmra.mxu0 %v3369_v9 }
 0xd36   : > { %v3314_v53 = vpop.xlane.xlu2 %3313 }
 0xd37   : > { %v3319_v33 = vmul.f32 %v3314_v53, %v6020_v23 }
 0xd39   : > { %v3323_v0 = vadd.f32 1e-06, %v3319_v33 }
 0xd3b   : > { %5640 = vrsqrt.f32 %v3323_v0  ;;  %vm3351_vm3 = vweird.f32 %v3323_v0 }
 0xd3e   : > { %v3316_v59 = vpop.xlane.xlu1 %3315 }
 0xd3f   : > { %v3320_v40 = vmul.f32 %v3316_v59, %v6020_v23 }
 0xd41   : > { %v5641_v35 = vpop.eup %5640  ;;  %v3324_v5 = vadd.f32 1e-06, %v3320_v40  ;;  %v5397_v40 = vld [vmem:[%s5969_s2 + $0x30] sm:$0xff] }
 0xd42   : > { %v3346_v39 = vmul.f32 %v5641_v35, %v3323_v0  ;;  %vm3352_vm2 = vweird.f32 %v5641_v35  ;;  %4330 = vmatpush.bf16.msrb.mxu1 %v5397_v40  ;;  %v5404_v40 = vld [vmem:[%s5969_s2 + $0x68] sm:$0xff] }
 0xd43   : > { %5642 = vrsqrt.f32 %v3324_v5  ;;  %vm3353_vm5 = vmor %vm3351_vm3, %vm3352_vm2  ;;  %vm3361_vm6 = vweird.f32 %v3324_v5 }
 0xd44   : > { %v3347_v26 = vmul.f32 %v5641_v35, %v3346_v39 }
 0xd46   : > { %v3348_v44 = vmul.f32 0.5, %v3347_v26 }
 0xd48   : > { %v3349_v62 = vsub.f32 1.5, %v3348_v44 }
 0xd49   : > { %v5643_v31 = vpop.eup %5642 }
 0xd4a   : > { %v3356_v37 = vmul.f32 %v5643_v31, %v3324_v5  ;;  %v3350_v43 = vmul.f32 %v5641_v35, %v3349_v62  ;;  %vm3362_vm4 = vweird.f32 %v5643_v31 }
 0xd4b   : > { %vm3363_vm7 = vmor %vm3361_vm6, %vm3362_vm4 }
 0xd4c   : > { %v3357_v46 = vmul.f32 %v5643_v31, %v3356_v37  ;;  %v3354_v48 = vsel %vm3353_vm5, %v5641_v35, %v3350_v43  ;;  %v5421_v35 = vld [vmem:[%s5969_s2 + $0xf0] sm:$0xff] }
 0xd4d   : > { %v3367_v32 = vmul.f32 %v3354_v48, %v6701_v41  ;;  %4387 = vmatpush.bf16.msra.mxu0 %v5421_v35 }
 0xd4e   : > { %v3358_v1 = vmul.f32 0.5, %v3357_v46 }
 0xd50   : > { %v3359_v54 = vsub.f32 1.5, %v3358_v1 }
 0xd52   : > { %v3360_v23 = vmul.f32 %v5643_v31, %v3359_v54  ;;  %v5406_v54 = vld [vmem:[%s5969_s2 + $0x78] sm:$0xff] }
 0xd53   : > { %4348 = vmatpush.bf16.msra.mxu2 %v5406_v54 }
 0xd54   : > { %v3364_v49 = vsel %vm3363_vm7, %v5643_v31, %v3360_v23 }
 0xd55   : > { %v3368_v60 = vmul.f32 %v3364_v49, %v6707_v38  ;;  %v6797_v38 = vperm.slane %v3403_v50, 1 }
 0xd57   : > { %v3370_v18 = vpack.c.bf16 %v3368_v60, %v3367_v32  ;;  %v5414_v60 = vld [vmem:[%s5969_s2 + $0xb8] sm:$0xff] }
 0xd58   : > { %4367 = vmatpush.bf16.msrb.mxu3 %v5414_v60 }
 0xd59   : > { %3586 = vmatmul.bf16.gmra.mxu1 %v3370_v18  ;;  %3605 = vmatmul.bf16.gmra.mxu2 %v3370_v18 }
 0xd5a   : > { %3624 = vmatmul.bf16.gmra.mxu3 %v3370_v18  ;;  %3643 = vmatmul.bf16.gmra.mxu0 %v3370_v18 }
 0xd9f   : > { %v3582_v52 = vpop.f32.mrf.mxu1 }
 0xda0   : > { %v6789_v25 = vadd.f32 %v3582_v52, %v6784_v42  ;;  %v3639_v55 = vpop.f32.mrf.mxu0  ;;  %v5396_v52 = vld [vmem:[%s5969_s2 + $0x28] sm:$0xff] }
 0xda1   : > { %v6792_v56 = vadd.f32 %v3639_v55, %v6786_v28  ;;  %v5420_v55 = vld [vmem:[%s5969_s2 + $0xe8] sm:$0xff]  ;;  %4331 = vmatpush.bf16.msrb.mxu1 %v5396_v52  ;;  %v5418_v52 = vld [vmem:[%s5969_s2 + $0xd8] sm:$0xff] }
 0xda2   : > { %v6795_v41 = vmul.f32 0.70710677, %v6789_v25  ;;  %4388 = vmatpush.bf16.msra.mxu0 %v5420_v55 }
 0xda3   : > { %v6800_v47 = vmul.f32 0.70710677, %v6792_v56 }
 0xda4   : > { %v3681_v34 = vand.u32 2147483647, %v6795_v41  ;;  %vm3985_vm8 = vcmp.lt.f32.partialorder %v6795_v41, 0.0 }
 0xda5   : > { %v3684_v51 = vand.u32 2147483647, %v6800_v47  ;;  %v3601_v58 = vpop.f32.mrf.mxu2  ;;  %vm3988_vm9 = vcmp.lt.f32.partialorder %v6800_v47, 0.0 }
 0xda6   : > { %v3697_v3 = vmul.f32 0.3275911, %v3681_v34  ;;  %v6807_v14 = vadd.f32 %v3601_v58, %v6797_v38  ;;  %v3620_v4 = vpop.f32.mrf.mxu3  ;;  %v3889_v11 = vsub.f32 0.0, %v3681_v34 }
 0xda7   : > { %v3700_v63 = vmul.f32 0.3275911, %v3684_v51  ;;  %v6810_v21 = vadd.f32 %v3620_v4, %v6802_v8  ;;  %v3584_v24 = vpop.f32.mrf.mxu1  ;;  %v3892_v16 = vsub.f32 0.0, %v3684_v51  ;;  %v5405_v4 = vld [vmem:[%s5969_s2 + $0x70] sm:$0xff] }
 0xda8   : > { %v3713_v6 = vadd.f32 1.0, %v3697_v3  ;;  %v6813_v10 = vmul.f32 0.70710677, %v6807_v14  ;;  %v3641_v17 = vpop.f32.mrf.mxu0  ;;  %v6824_v27 = vadd.f32 %v3584_v24, %v6784_v42  ;;  %v3905_v30 = vmul.f32 %v3889_v11, %v3681_v34  ;;  %4349 = vmatpush.bf16.msra.mxu2 %v5405_v4 }
 0xda9   : > { %v3716_v7 = vadd.f32 1.0, %v3700_v63  ;;  %v6816_v22 = vmul.f32 0.70710677, %v6810_v21  ;;  %v6829_v61 = vadd.f32 %v3641_v17, %v6786_v28  ;;  %v3908_v39 = vmul.f32 %v3892_v16, %v3684_v51  ;;  %v5413_v63 = vld [vmem:[%s5969_s2 + $0xb0] sm:$0xff] }
 0xdaa   : > { %5644 = vrcp.f32 %v3713_v6  ;;  %v3682_v19 = vand.u32 2147483647, %v6813_v10  ;;  %v6832_v53 = vmul.f32 0.70710677, %v6824_v27  ;;  %v3921_v62 = vmul.f32 1.442695, %v3905_v30  ;;  %4368 = vmatpush.bf16.msrb.mxu3 %v5413_v63 }
 0xdab   : > { %5646 = vrcp.f32 %v3716_v7  ;;  %v6820_v20 = vand.u32 2147483647, %v6816_v22  ;;  %v6835_v59 = vmul.f32 0.70710677, %v6829_v61  ;;  %v3927_v51 = vmul.f32 1.442695, %v3908_v39 }
 0xdac   : > { %v3698_v12 = vmul.f32 0.3275911, %v3682_v19  ;;  %v3890_v33 = vsub.f32 0.0, %v3682_v19  ;;  %v6842_v26 = vand.u32 2147483647, %v6832_v53  ;;  %v5395_v30 = vld [vmem:[%s5969_s2 + $0x20] sm:$0xff]  ;;  %4350 = vmatpush.bf16.msra.mxu2 %v5404_v40 }
 0xdad   : > { %v3699_v57 = vmul.f32 0.3275911, %v6820_v20  ;;  %v6848_v37 = vand.u32 2147483647, %v6835_v59  ;;  %v3603_v1 = vpop.f32.mrf.mxu2  ;;  %v3891_v7 = vsub.f32 0.0, %v6820_v20  ;;  %4332 = vmatpush.bf16.msrb.mxu1 %v5395_v30  ;;  %vm3989_vm0 = vcmp.lt.f32.partialorder %v6832_v53, 0.0 }
 0xdae   : > { %v3714_v9 = vadd.f32 1.0, %v3698_v12  ;;  %v3701_v43 = vmul.f32 0.3275911, %v6842_v26  ;;  %v3906_v23 = vmul.f32 %v3890_v33, %v3682_v19  ;;  %v3622_v32 = vpop.f32.mrf.mxu3  ;;  %v6859_v3 = vadd.f32 %v3603_v1, %v6797_v38 }
 0xdaf   : > { %v3715_v0 = vadd.f32 1.0, %v3699_v57  ;;  %v3704_v49 = vmul.f32 0.3275911, %v6848_v37  ;;  %v6868_v24 = vadd.f32 %v3622_v32, %v6802_v8  ;;  %v3907_v54 = vmul.f32 %v3891_v7, %v6820_v20 }
 0xdb0   : > { %v6839_v5 = vpop.eup %5644  ;;  %5648 = vrcp.f32 %v3714_v9  ;;  %v3717_v50 = vadd.f32 1.0, %v3701_v43  ;;  %v6873_v16 = vmul.f32 1.442695, %v3906_v23  ;;  %v6879_v33 = vmul.f32 0.70710677, %v6859_v3  ;;  %v5394_v23 = vld [vmem:[%s5969_s2 + $0x18] sm:$0xff] }
 0xdb1   : > { %v6844_v44 = vpop.eup %5646  ;;  %v3745_v31 = vmul.f32 1.0614054, %v6839_v5  ;;  %5650 = vrcp.f32 %v3715_v0  ;;  %v3720_v58 = vadd.f32 1.0, %v3704_v49  ;;  %v5419_v0 = vld [vmem:[%s5969_s2 + $0xe0] sm:$0xff]  ;;  %4333 = vmatpush.bf16.msrb.mxu1 %v5394_v23  ;;  %vm3992_vm1 = vcmp.lt.f32.partialorder %v6835_v59, 0.0 }
 0xdb2   : > { %v3748_v46 = vmul.f32 1.0614054, %v6844_v44  ;;  %5652 = vrcp.f32 %v3717_v50  ;;  %4389 = vmatpush.bf16.msra.mxu0 %v5419_v0  ;;  %v5411_v0 = vld [vmem:[%s5969_s2 + $0xa0] sm:$0xff]  ;;  %vm3986_vm10 = vcmp.lt.f32.partialorder %v6813_v10, 0.0  ;;  %vm3987_vm11 = vcmp.lt.f32.partialorder %v6816_v22, 0.0 }
 0xdb3   : > { %v3761_v48 = vadd.f32 -1.4531521, %v3745_v31  ;;  %5654 = vrcp.f32 %v3720_v58  ;;  %v3893_v31 = vsub.f32 0.0, %v6842_v26  ;;  %vm3990_vm12 = vcmp.lt.f32.partialorder %v6879_v33, 0.0 }
 0xdb4   : > { %v3764_v18 = vadd.f32 -1.4531521, %v3748_v46  ;;  %5656 = vpow2.f32 %v3921_v62  ;;  %v6886_v62 = vmul.f32 0.70710677, %v6868_v24  ;;  %v5412_v46 = vld [vmem:[%s5969_s2 + $0xa8] sm:$0xff]  ;;  %v3650_v22 = vmul.f32 0.5, %v6807_v14 }
 0xdb5   : > { %v3777_v34 = vmul.f32 %v6839_v5, %v3761_v48  ;;  %5658 = vpow2.f32 %v3927_v51  ;;  %v6892_v48 = vand.u32 2147483647, %v6879_v33  ;;  %4369 = vmatpush.bf16.msrb.mxu3 %v5412_v46  ;;  %v3909_v7 = vmul.f32 %v3893_v31, %v6842_v26  ;;  %v5393_v31 = vld [vmem:[%s5969_s2 + $0x10] sm:$0xff] }
 0xdb6   : > { %v6863_v6 = vpop.eup %5648  ;;  %v3780_v11 = vmul.f32 %v6844_v44, %v3764_v18  ;;  %v3896_v18 = vsub.f32 0.0, %v6848_v37  ;;  %v6900_v50 = vand.u32 2147483647, %v6886_v62  ;;  %4390 = vmatpush.bf16.msra.mxu0 %v5418_v52  ;;  %v5417_v46 = vld [vmem:[%s5969_s2 + $0xd0] sm:$0xff]  ;;  %4334 = vmatpush.bf16.msrb.mxu1 %v5393_v31  ;;  %vm3991_vm13 = vcmp.lt.f32.partialorder %v6886_v62, 0.0 }
 0xdb7   : > { %v6870_v19 = vpop.eup %5650  ;;  %v3793_v17 = vadd.f32 1.4214138, %v3777_v34  ;;  %v3746_v36 = vmul.f32 1.0614054, %v6863_v6  ;;  %v3702_v58 = vmul.f32 0.3275911, %v6892_v48 }
 0xdb8   : > { %v3796_v12 = vadd.f32 1.4214138, %v3780_v11  ;;  %v3747_v29 = vmul.f32 1.0614054, %v6870_v19  ;;  %v6895_v49 = vpop.eup %5652 }
 0xdb9   : > { %v3809_v57 = vmul.f32 %v6839_v5, %v3793_v17  ;;  %v3762_v9 = vadd.f32 -1.4531521, %v3746_v36  ;;  %v6903_v55 = vpop.eup %5654  ;;  %v3749_v51 = vmul.f32 1.0614054, %v6895_v49  ;;  %v5403_v36 = vld [vmem:[%s5969_s2 + $0x60] sm:$0xff]  ;;  %4370 = vmatpush.bf16.msrb.mxu3 %v5411_v0 }
 0xdba   : > { %v3812_v35 = vmul.f32 %v6844_v44, %v3796_v12  ;;  %v3763_v39 = vadd.f32 -1.4531521, %v3747_v29  ;;  %v5657_v4 = vpop.eup %5656  ;;  %v3752_v17 = vmul.f32 1.0614054, %v6903_v55  ;;  %4351 = vmatpush.bf16.msra.mxu2 %v5403_v36  ;;  %4391 = vmatpush.bf16.msra.mxu0 %v5417_v46 }
 0xdbb   : > { %v3825_v43 = vadd.f32 -0.28449672, %v3809_v57  ;;  %v3778_v1 = vmul.f32 %v6863_v6, %v3762_v9  ;;  %v5659_v12 = vpop.eup %5658  ;;  %v3765_v57 = vadd.f32 -1.4531521, %v3749_v51  ;;  %v3718_v9 = vadd.f32 1.0, %v3702_v58  ;;  %v5392_v58 = vld [vmem:[%s5969_s2 + $0x8] sm:$0xff] }
 0xdbc   : > { %v3828_v32 = vadd.f32 -0.28449672, %v3812_v35  ;;  %v3779_v60 = vmul.f32 %v6870_v19, %v3763_v39  ;;  %v3768_v26 = vadd.f32 -1.4531521, %v3752_v17  ;;  %v3912_v39 = vmul.f32 %v3896_v18, %v6848_v37  ;;  %4335 = vmatpush.bf16.msrb.mxu1 %v5392_v58 }
 0xdbd   : > { %v3841_v20 = vmul.f32 %v6839_v5, %v3825_v43  ;;  %v3794_v34 = vadd.f32 1.4214138, %v3778_v1  ;;  %v3781_v23 = vmul.f32 %v6895_v49, %v3765_v57  ;;  %5660 = vrcp.f32 %v3718_v9  ;;  %v5401_v57 = vld [vmem:[%s5969_s2 + $0x50] sm:$0xff] }
 0xdbe   : > { %v3844_v63 = vmul.f32 %v6844_v44, %v3828_v32  ;;  %v3795_v11 = vadd.f32 1.4214138, %v3779_v60  ;;  %v5402_v32 = vld [vmem:[%s5969_s2 + $0x58] sm:$0xff]  ;;  %v3703_v51 = vmul.f32 0.3275911, %v6900_v50  ;;  %5662 = vpow2.f32 %v6873_v16  ;;  %v5409_v9 = vld [vmem:[%s5969_s2 + $0x90] sm:$0xff] }
 0xdbf   : > { %v3857_v29 = vadd.f32 0.2548296, %v3841_v20  ;;  %v3810_v30 = vmul.f32 %v6863_v6, %v3794_v34  ;;  %v5410_v60 = vld [vmem:[%s5969_s2 + $0x98] sm:$0xff]  ;;  %v3784_v34 = vmul.f32 %v6903_v55, %v3768_v26  ;;  %v3925_v17 = vmul.f32 1.442695, %v3907_v54  ;;  %4352 = vmatpush.bf16.msra.mxu2 %v5402_v32  ;;  %v5391_v26 = vld [vmem:[%s5969_s2] sm:$0xff] }
 0xdc0   : > { %v3860_v40 = vadd.f32 0.2548296, %v3844_v63  ;;  %v3811_v35 = vmul.f32 %v6870_v19, %v3795_v11  ;;  %v5416_v63 = vld [vmem:[%s5969_s2 + $0xc8] sm:$0xff]  ;;  %4371 = vmatpush.bf16.msrb.mxu3 %v5410_v60  ;;  %4336 = vmatpush.bf16.msrb.mxu1 %v5391_v26 }
 0xdc1   : > { %v3873_v43 = vmul.f32 %v6839_v5, %v3857_v29  ;;  %v3826_v1 = vadd.f32 -0.28449672, %v3810_v30  ;;  %v3797_v5 = vadd.f32 1.4214138, %v3781_v23  ;;  %v3800_v36 = vadd.f32 1.4214138, %v3784_v34  ;;  %4392 = vmatpush.bf16.msra.mxu0 %v5416_v63 }
 0xdc2   : > { %v3876_v52 = vmul.f32 %v6844_v44, %v3860_v40  ;;  %v3827_v20 = vadd.f32 -0.28449672, %v3811_v35  ;;  %v3929_v44 = vmul.f32 1.442695, %v3909_v7  ;;  %v3935_v29 = vmul.f32 1.442695, %v3912_v39 }
 0xdc3   : > { %v6924_v37 = vmul.f32 %v5657_v4, %v3873_v43  ;;  %v3842_v18 = vmul.f32 %v6863_v6, %v3826_v1  ;;  %v3813_v4 = vmul.f32 %v6895_v49, %v3797_v5  ;;  %v3719_v30 = vadd.f32 1.0, %v3703_v51  ;;  %v6940_v40 = vpop.eup %5660  ;;  %v5415_v39 = vld [vmem:[%s5969_s2 + $0xc0] sm:$0xff]  ;;  %4353 = vmatpush.bf16.msra.mxu2 %v5401_v57  ;;  %v5400_v60 = vld [vmem:[%s5969_s2 + $0x48] sm:$0xff] }
 0xdc4   : > { %v6930_v11 = vmul.f32 %v5659_v12, %v3876_v52  ;;  %v3843_v12 = vmul.f32 %v6870_v19, %v3827_v20  ;;  %v3816_v54 = vmul.f32 %v6903_v55, %v3800_v36  ;;  %v3894_v7 = vsub.f32 0.0, %v6892_v48  ;;  %4372 = vmatpush.bf16.msrb.mxu3 %v5409_v9  ;;  %v5408_v52 = vld [vmem:[%s5969_s2 + $0x88] sm:$0xff] }
 0xdc5   : > { %v3969_v0 = vsub.f32 1.0, %v6924_v37  ;;  %v3858_v16 = vadd.f32 0.2548296, %v3842_v18  ;;  %v3829_v35 = vadd.f32 -0.28449672, %v3813_v4  ;;  %5664 = vrcp.f32 %v3719_v30  ;;  %v5663_v18 = vpop.eup %5662  ;;  %4393 = vmatpush.bf16.msra.mxu0 %v5415_v39 }
 0xdc6   : > { %v3972_v31 = vsub.f32 1.0, %v6930_v11  ;;  %5666 = vpow2.f32 %v3929_v44  ;;  %v3832_v46 = vadd.f32 -0.28449672, %v3816_v54  ;;  %v3750_v43 = vmul.f32 1.0614054, %v6940_v40 }
 0xdc7   : > { %v6947_v1 = vmul.f32 0.5, %v6789_v25  ;;  %v6950_v23 = vmul.f32 0.5, %v6792_v56  ;;  %v3845_v32 = vmul.f32 %v6895_v49, %v3829_v35  ;;  %5668 = vpow2.f32 %v3935_v29  ;;  %4354 = vmatpush.bf16.msra.mxu2 %v5400_v60  ;;  %v5407_v29 = vld [vmem:[%s5969_s2 + $0x80] sm:$0xff] }
 0xdc8   : > { %v4001_v20 = vsub.f32 0.0, %v3969_v0  ;;  %v3859_v34 = vadd.f32 0.2548296, %v3843_v12  ;;  %v3848_v37 = vmul.f32 %v6903_v55, %v3832_v46  ;;  %5670 = vpow2.f32 %v3925_v17  ;;  %4373 = vmatpush.bf16.msrb.mxu3 %v5408_v52 }
 0xdc9   : > { %v3861_v25 = vadd.f32 0.2548296, %v3845_v32  ;;  %v3766_v56 = vadd.f32 -1.4531521, %v3750_v43  ;;  %v3910_v5 = vmul.f32 %v3894_v7, %v6892_v48  ;;  %v4004_v51 = vsub.f32 0.0, %v3972_v31  ;;  %v5399_v48 = vld [vmem:[%s5969_s2 + $0x40] sm:$0xff] }
 0xdca   : > { %v3874_v58 = vmul.f32 %v6863_v6, %v3858_v16  ;;  %v3864_v63 = vadd.f32 0.2548296, %v3848_v37  ;;  %v3653_v44 = vmul.f32 0.5, %v6824_v27  ;;  %v3895_v4 = vsub.f32 0.0, %v6900_v50 }
 0xdcb   : > { %v6960_v11 = vpop.eup %5664  ;;  %v3877_v17 = vmul.f32 %v6895_v49, %v3861_v25  ;;  %v3782_v36 = vmul.f32 %v6940_v40, %v3766_v56  ;;  %v4017_v57 = vsel %vm3985_vm8, %v4001_v20, %v3969_v0  ;;  %v3875_v6 = vmul.f32 %v6870_v19, %v3859_v34  ;;  %4355 = vmatpush.bf16.msra.mxu2 %v5399_v48 }
 0xdcc   : > { %v5667_v30 = vpop.eup %5666  ;;  %v3880_v9 = vmul.f32 %v6903_v55, %v3864_v63  ;;  %v3751_v12 = vmul.f32 1.0614054, %v6960_v11  ;;  %v3656_v49 = vmul.f32 0.5, %v6829_v61  ;;  %v3931_v16 = vmul.f32 1.442695, %v3910_v5  ;;  %4374 = vmatpush.bf16.msrb.mxu3 %v5407_v29 }
 0xdcd   : > { %v5669_v27 = vpop.eup %5668  ;;  %v3957_v54 = vmul.f32 %v5667_v30, %v3877_v17  ;;  %v3798_v7 = vadd.f32 1.4214138, %v3782_v36  ;;  %v4020_v35 = vsel %vm3988_vm9, %v4004_v51, %v3972_v31  ;;  %v3954_v26 = vmul.f32 %v5663_v18, %v3874_v58 }
 0xdce   : > { %v3960_v39 = vmul.f32 %v5669_v27, %v3880_v9  ;;  %v3767_v46 = vadd.f32 -1.4531521, %v3751_v12  ;;  %v5671_v41 = vpop.eup %5670  ;;  %v4033_v0 = vadd.f32 1.0, %v4017_v57  ;;  %v3911_v43 = vmul.f32 %v3895_v4, %v6900_v50 }
 0xdcf   : > { %v3973_v19 = vsub.f32 1.0, %v3957_v54  ;;  %v3814_v55 = vmul.f32 %v6940_v40, %v3798_v7  ;;  %v6978_v32 = vmul.f32 %v5671_v41, %v3875_v6  ;;  %v4036_v31 = vadd.f32 1.0, %v4020_v35 }
 0xdd0   : > { %v3976_v61 = vsub.f32 1.0, %v3960_v39  ;;  %v3783_v47 = vmul.f32 %v6960_v11, %v3767_v46  ;;  %v3970_v20 = vsub.f32 1.0, %v3954_v26  ;;  %5672 = vpow2.f32 %v3931_v16 }
 0xdd1   : > { %v4005_v60 = vsub.f32 0.0, %v3973_v19  ;;  %v3830_v52 = vadd.f32 -0.28449672, %v3814_v55  ;;  %v4049_v18 = vmul.f32 %v4033_v0, %v6947_v1  ;;  %v3933_v56 = vmul.f32 1.442695, %v3911_v43 }
 0xdd2   : > { %v4008_v34 = vsub.f32 0.0, %v3976_v61  ;;  %v3799_v37 = vadd.f32 1.4214138, %v3783_v47  ;;  %v3971_v53 = vsub.f32 1.0, %v6978_v32  ;;  %v4052_v59 = vmul.f32 %v4036_v31, %v6950_v23 }
 0xdd3   : > { %v4021_v50 = vsel %vm3989_vm0, %v4005_v60, %v3973_v19  ;;  %v3846_v25 = vmul.f32 %v6940_v40, %v3830_v52  ;;  %v4002_v1 = vsub.f32 0.0, %v3970_v20  ;;  %5674 = vpow2.f32 %v3933_v56 }
 0xdd4   : > { %v4037_v5 = vadd.f32 1.0, %v4021_v50  ;;  %v4024_v51 = vsel %vm3992_vm1, %v4008_v34, %v3976_v61  ;;  %v3815_v58 = vmul.f32 %v6960_v11, %v3799_v37 }
 0xdd5   : > { %v4040_v17 = vadd.f32 1.0, %v4024_v51  ;;  %v3862_v36 = vadd.f32 0.2548296, %v3846_v25 }
 0xdd6   : > { %v3587_v63 = vpop.f32.mrf.mxu1  ;;  %v4053_v29 = vmul.f32 %v4037_v5, %v3653_v44  ;;  %v3831_v30 = vadd.f32 -0.28449672, %v3815_v58  ;;  %v5673_v23 = vpop.eup %5672 }
 0xdd7   : > { %v6989_v4 = vadd.f32 %v3587_v63, %v6784_v42  ;;  %v3644_v48 = vpop.f32.mrf.mxu0  ;;  %v4056_v6 = vmul.f32 %v4040_v17, %v3656_v49  ;;  %v3878_v9 = vmul.f32 %v6940_v40, %v3862_v36  ;;  %v4018_v49 = vsel %vm3986_vm10, %v4002_v1, %v3970_v20 }
 0xdd8   : > { %v6992_v57 = vadd.f32 %v3644_v48, %v6786_v28  ;;  %v4065_v27 = vpack.c.bf16 %v4053_v29, %v4049_v18  ;;  %v3847_v54 = vmul.f32 %v6960_v11, %v3831_v30  ;;  %v4003_v40 = vsub.f32 0.0, %v3971_v53 }
 0xdd9   : > { %v6996_v12 = vmul.f32 0.70710677, %v6989_v4  ;;  %v4068_v44 = vpack.c.bf16 %v4056_v6, %v4052_v59  ;;  %v3958_v16 = vmul.f32 %v5673_v23, %v3878_v9  ;;  %v5675_v32 = vpop.eup %5674  ;;  %v4034_v61 = vadd.f32 1.0, %v4018_v49 }
 0xdda   : > { %v7000_v7 = vmul.f32 0.70710677, %v6992_v57  ;;  %v3863_v26 = vadd.f32 0.2548296, %v3847_v54  ;;  %4337 = vmatmul.bf16.vlgmr.msrb.gmra.mxu1 %v4065_v27  ;;  %v4019_v52 = vsel %vm3987_vm11, %v4003_v40, %v3971_v53  ;;  %v3654_v18 = vmul.f32 0.5, %v6859_v3 }
 0xddb   : > { %v7004_v35 = vand.u32 2147483647, %v6996_v12  ;;  %v3974_v41 = vsub.f32 1.0, %v3958_v16  ;;  %4394 = vmatmul.bf16.vlgmr.msra.gmra.mxu0 %v4068_v44  ;;  %v4035_v56 = vadd.f32 1.0, %v4019_v52  ;;  %v4050_v51 = vmul.f32 %v4034_v61, %v3650_v22 }
 0xddc   : > { %v7007_v39 = vand.u32 2147483647, %v7000_v7  ;;  %v3606_v46 = vpop.f32.mrf.mxu2  ;;  %v3879_v55 = vmul.f32 %v6960_v11, %v3863_v26  ;;  %v3651_v17 = vmul.f32 0.5, %v6810_v21  ;;  %v3655_v30 = vmul.f32 0.5, %v6868_v24 }
 0xddd   : > { %v3705_v0 = vmul.f32 0.3275911, %v7004_v35  ;;  %v7011_v19 = vadd.f32 %v3606_v46, %v6797_v38  ;;  %v3625_v10 = vpop.f32.mrf.mxu3  ;;  %v4006_v47 = vsub.f32 0.0, %v3974_v41  ;;  %v3897_v44 = vsub.f32 0.0, %v7004_v35 }
 0xdde   : > { %v3708_v43 = vmul.f32 0.3275911, %v7007_v39  ;;  %v7018_v60 = vadd.f32 %v3625_v10, %v6802_v8  ;;  %v3959_v20 = vmul.f32 %v5675_v32, %v3879_v55  ;;  %v3589_v11 = vpop.f32.mrf.mxu1  ;;  %v4051_v23 = vmul.f32 %v4035_v56, %v3651_v17 }
 0xddf   : > { %v3721_v31 = vadd.f32 1.0, %v3705_v0  ;;  %v7021_v37 = vmul.f32 0.70710677, %v7011_v19  ;;  %v4022_v33 = vsel %vm3990_vm12, %v4006_v47, %v3974_v41  ;;  %v7032_v14 = vadd.f32 %v3589_v11, %v6784_v42  ;;  %v3646_v26 = vpop.f32.mrf.mxu0 }
 0xde0   : > { %v3724_v34 = vadd.f32 1.0, %v3708_v43  ;;  %v4038_v50 = vadd.f32 1.0, %v4022_v33  ;;  %v3975_v25 = vsub.f32 1.0, %v3959_v20  ;;  %v7029_v53 = vmul.f32 0.70710677, %v7018_v60 }
 0xde1   : > { %5676 = vrcp.f32 %v3721_v31  ;;  %v7026_v5 = vand.u32 2147483647, %v7021_v37  ;;  %v7041_v1 = vmul.f32 0.70710677, %v7032_v14  ;;  %v3913_v43 = vmul.f32 %v3897_v44, %v7004_v35 }
 0xde2   : > { %5678 = vrcp.f32 %v3724_v34  ;;  %v4054_v58 = vmul.f32 %v4038_v50, %v3654_v18  ;;  %v4007_v63 = vsub.f32 0.0, %v3975_v25  ;;  %v7037_v59 = vand.u32 2147483647, %v7029_v53 }
 0xde3   : > { %v3706_v3 = vmul.f32 0.3275911, %v7026_v5  ;;  %v3693_v21 = vand.u32 2147483647, %v7041_v1  ;;  %v7057_v61 = vadd.f32 %v3646_v26, %v6786_v28  ;;  %v3937_v33 = vmul.f32 1.442695, %v3913_v43 }
 0xde4   : > { %v4066_v36 = vpack.c.bf16 %v4054_v58, %v4050_v51  ;;  %v4023_v48 = vsel %vm3991_vm13, %v4007_v63, %v3975_v25  ;;  %v3707_v62 = vmul.f32 0.3275911, %v7037_v59  ;;  %v3608_v46 = vpop.f32.mrf.mxu2  ;;  %v3900_v28 = vsub.f32 0.0, %v7007_v39 }
 0xde5   : > { %v4039_v42 = vadd.f32 1.0, %v4023_v48  ;;  %v3722_v6 = vadd.f32 1.0, %v3706_v3  ;;  %v3709_v40 = vmul.f32 0.3275911, %v3693_v21  ;;  %v7060_v47 = vadd.f32 %v3608_v46, %v6797_v38  ;;  %v3627_v38 = vpop.f32.mrf.mxu3 }
 0xde6   : > { %4356 = vmatmul.bf16.vlgmr.msra.gmra.mxu2 %v4066_v36  ;;  %v3723_v24 = vadd.f32 1.0, %v3707_v62  ;;  %v7067_v35 = vmul.f32 0.70710677, %v7057_v61  ;;  %v7081_v36 = vadd.f32 %v3627_v38, %v6802_v8  ;;  %vm3993_vm14 = vcmp.lt.f32.partialorder %v6996_v12, 0.0 }
 0xde7   : > { %v7043_v29 = vpop.eup %5676  ;;  %v4055_v54 = vmul.f32 %v4039_v42, %v3655_v30  ;;  %5680 = vrcp.f32 %v3722_v6  ;;  %v3725_v55 = vadd.f32 1.0, %v3709_v40  ;;  %v7071_v11 = vmul.f32 0.70710677, %v7060_v47 }
 0xde8   : > { %v7047_v9 = vpop.eup %5678  ;;  %v3753_v27 = vmul.f32 1.0614054, %v7043_v29  ;;  %5682 = vrcp.f32 %v3723_v24  ;;  %v3696_v56 = vand.u32 2147483647, %v7067_v35  ;;  %v3916_v30 = vmul.f32 %v3900_v28, %v7007_v39 }
 0xde9   : > { %v3756_v16 = vmul.f32 1.0614054, %v7047_v9  ;;  %v4067_v41 = vpack.c.bf16 %v4055_v54, %v4051_v23  ;;  %5684 = vrcp.f32 %v3725_v55  ;;  %v3901_v6 = vsub.f32 0.0, %v3693_v21 }
 0xdea   : > { %v3769_v49 = vadd.f32 -1.4531521, %v3753_v27  ;;  %v3712_v17 = vmul.f32 0.3275911, %v3696_v56  ;;  %v7087_v62 = vand.u32 2147483647, %v7071_v11  ;;  %5686 = vpow2.f32 %v3937_v33 }
 0xdeb   : > { %v3772_v0 = vadd.f32 -1.4531521, %v3756_v16  ;;  %4375 = vmatmul.bf16.vlgmr.msrb.gmra.mxu3 %v4067_v41  ;;  %v3898_v16 = vsub.f32 0.0, %v7026_v5  ;;  %v7095_v26 = vmul.f32 0.70710677, %v7081_v36  ;;  %v3917_v46 = vmul.f32 %v3901_v6, %v3693_v21 }
 0xdec   : > { %v3785_v10 = vmul.f32 %v7043_v29, %v3769_v49  ;;  %v3728_v49 = vadd.f32 1.0, %v3712_v17  ;;  %v3710_v8 = vmul.f32 0.3275911, %v7087_v62  ;;  %v3943_v43 = vmul.f32 1.442695, %v3916_v30 }
 0xded   : > { %v3788_v32 = vmul.f32 %v7047_v9, %v3772_v0  ;;  %v7062_v52 = vpop.eup %5680  ;;  %v7102_v33 = vand.u32 2147483647, %v7095_v26  ;;  %v3945_v21 = vmul.f32 1.442695, %v3917_v46  ;;  %v3904_v28 = vsub.f32 0.0, %v3696_v56 }
 0xdee   : > { %v3801_v31 = vadd.f32 1.4214138, %v3785_v10  ;;  %v3754_v22 = vmul.f32 1.0614054, %v7062_v52  ;;  %v7073_v18 = vpop.eup %5682  ;;  %5688 = vrcp.f32 %v3728_v49  ;;  %v3726_v41 = vadd.f32 1.0, %v3710_v8 }
 0xdef   : > { %v3804_v20 = vadd.f32 1.4214138, %v3788_v32  ;;  %v3755_v58 = vmul.f32 1.0614054, %v7073_v18  ;;  %v7083_v48 = vpop.eup %5684  ;;  %v3920_v6 = vmul.f32 %v3904_v28, %v3696_v56  ;;  %vm3997_vm15 = vcmp.lt.f32.partialorder %v7041_v1, 0.0 }
 0xdf0   : > { %v3817_v34 = vmul.f32 %v7043_v29, %v3801_v31  ;;  %v3770_v25 = vadd.f32 -1.4531521, %v3754_v22  ;;  %v3757_v54 = vmul.f32 1.0614054, %v7083_v48  ;;  %5690 = vrcp.f32 %v3726_v41  ;;  %v5687_v31 = vpop.eup %5686 }
 0xdf1   : > { %v3820_v51 = vmul.f32 %v7047_v9, %v3804_v20  ;;  %v3771_v42 = vadd.f32 -1.4531521, %v3755_v58  ;;  %v3914_v20 = vmul.f32 %v3898_v16, %v7026_v5  ;;  %5692 = vpow2.f32 %v3943_v43 }
 0xdf2   : > { %v3833_v50 = vadd.f32 -0.28449672, %v3817_v34  ;;  %v3786_v3 = vmul.f32 %v7062_v52, %v3770_v25  ;;  %v3773_v40 = vadd.f32 -1.4531521, %v3757_v54  ;;  %v3711_v58 = vmul.f32 0.3275911, %v7102_v33 }
 0xdf3   : > { %v3836_v44 = vadd.f32 -0.28449672, %v3820_v51  ;;  %v3787_v39 = vmul.f32 %v7073_v18, %v3771_v42  ;;  %v3899_v42 = vsub.f32 0.0, %v7037_v59  ;;  %5694 = vpow2.f32 %v3945_v21 }
 0xdf4   : > { %v3849_v63 = vmul.f32 %v7043_v29, %v3833_v50  ;;  %v3802_v27 = vadd.f32 1.4214138, %v3786_v3  ;;  %v3789_v10 = vmul.f32 %v7083_v48, %v3773_v40  ;;  %v7105_v50 = vpop.eup %5688  ;;  %vm3996_vm2 = vcmp.lt.f32.partialorder %v7000_v7, 0.0 }
 0xdf5   : > { %v3852_v55 = vmul.f32 %v7047_v9, %v3836_v44  ;;  %v3803_v34 = vadd.f32 1.4214138, %v3787_v39  ;;  %v3760_v17 = vmul.f32 1.0614054, %v7105_v50  ;;  %v3902_v44 = vsub.f32 0.0, %v7087_v62 }
 0xdf6   : > { %v3865_v23 = vadd.f32 0.2548296, %v3849_v63  ;;  %v3818_v24 = vmul.f32 %v7062_v52, %v3802_v27  ;;  %v3805_v22 = vadd.f32 1.4214138, %v3789_v10  ;;  %v3939_v63 = vmul.f32 1.442695, %v3914_v20  ;;  %v7111_v30 = vpop.eup %5690 }
 0xdf7   : > { %v3868_v25 = vadd.f32 0.2548296, %v3852_v55  ;;  %v3819_v5 = vmul.f32 %v7073_v18, %v3803_v34  ;;  %v3776_v54 = vadd.f32 -1.4531521, %v3760_v17  ;;  %v3758_v8 = vmul.f32 1.0614054, %v7111_v30  ;;  %v5693_v41 = vpop.eup %5692 }
 0xdf8   : > { %v3881_v0 = vmul.f32 %v7043_v29, %v3865_v23  ;;  %v3834_v32 = vadd.f32 -0.28449672, %v3818_v24  ;;  %v3821_v29 = vmul.f32 %v7083_v48, %v3805_v22  ;;  %v3727_v24 = vadd.f32 1.0, %v3711_v58 }
 0xdf9   : > { %v3884_v16 = vmul.f32 %v7047_v9, %v3868_v25  ;;  %5696 = vpow2.f32 %v3939_v63  ;;  %v3835_v39 = vadd.f32 -0.28449672, %v3819_v5  ;;  %v3792_v46 = vmul.f32 %v7105_v50, %v3776_v54 }
 0xdfa   : > { %v3961_v38 = vmul.f32 %v5687_v31, %v3881_v0  ;;  %v3850_v51 = vmul.f32 %v7062_v52, %v3834_v32  ;;  %v3837_v3 = vadd.f32 -0.28449672, %v3821_v29  ;;  %v3915_v56 = vmul.f32 %v3899_v42, %v7037_v59  ;;  %v5695_v31 = vpop.eup %5694 }
 0xdfb   : > { %v3951_v0 = vmul.f32 1.442695, %v3920_v6  ;;  %v3774_v10 = vadd.f32 -1.4531521, %v3758_v8  ;;  %5698 = vrcp.f32 %v3727_v24  ;;  %v3808_v32 = vadd.f32 1.4214138, %v3792_v46 }
 0xdfc   : > { %v3977_v23 = vsub.f32 1.0, %v3961_v38  ;;  %v3853_v27 = vmul.f32 %v7083_v48, %v3837_v3  ;;  %v3866_v49 = vadd.f32 0.2548296, %v3850_v51  ;;  %v3918_v9 = vmul.f32 %v3902_v44, %v7087_v62 }
 0xdfd   : > { %v3657_v20 = vmul.f32 0.5, %v6989_v4  ;;  %v3964_v34 = vmul.f32 %v5693_v41, %v3884_v16  ;;  %v3790_v21 = vmul.f32 %v7111_v30, %v3774_v10  ;;  %v3851_v59 = vmul.f32 %v7073_v18, %v3835_v39 }
 0xdfe   : > { %v3869_v40 = vadd.f32 0.2548296, %v3853_v27  ;;  %v4009_v55 = vsub.f32 0.0, %v3977_v23  ;;  %v3882_v22 = vmul.f32 %v7062_v52, %v3866_v49  ;;  %v3824_v38 = vmul.f32 %v7105_v50, %v3808_v32 }
 0xdff   : > { %v3941_v29 = vmul.f32 1.442695, %v3915_v56  ;;  %5700 = vpow2.f32 %v3951_v0  ;;  %v3806_v62 = vadd.f32 1.4214138, %v3790_v21  ;;  %v5697_v25 = vpop.eup %5696  ;;  %v3947_v63 = vmul.f32 1.442695, %v3918_v9 }
 0xe00   : > { %v3885_v43 = vmul.f32 %v7083_v48, %v3869_v40  ;;  %v3661_v48 = vmul.f32 0.5, %v7032_v14  ;;  %v4025_v51 = vsel %vm3993_vm14, %v4009_v55, %v3977_v23  ;;  %v3840_v58 = vadd.f32 -0.28449672, %v3824_v38 }
 0xe01   : > { %v7129_v52 = vpop.eup %5698  ;;  %v3980_v5 = vsub.f32 1.0, %v3964_v34  ;;  %v3962_v3 = vmul.f32 %v5697_v25, %v3882_v22  ;;  %v3822_v12 = vmul.f32 %v7111_v30, %v3806_v62  ;;  %v3903_v17 = vsub.f32 0.0, %v7102_v33 }
 0xe02   : > { %v3965_v28 = vmul.f32 %v5695_v31, %v3885_v43  ;;  %v3867_v42 = vadd.f32 0.2548296, %v3851_v59  ;;  %v3856_v27 = vmul.f32 %v7105_v50, %v3840_v58  ;;  %v3759_v14 = vmul.f32 1.0614054, %v7129_v52 }
 0xe03   : > { %v4041_v54 = vadd.f32 1.0, %v4025_v51  ;;  %5702 = vpow2.f32 %v3941_v29  ;;  %v3838_v23 = vadd.f32 -0.28449672, %v3822_v12  ;;  %v3978_v24 = vsub.f32 1.0, %v3962_v3 }
 0xe04   : > { %v3981_v4 = vsub.f32 1.0, %v3965_v28  ;;  %v3872_v16 = vadd.f32 0.2548296, %v3856_v27  ;;  %5704 = vpow2.f32 %v3947_v63  ;;  %v3775_v49 = vadd.f32 -1.4531521, %v3759_v14 }
 0xe05   : > { %v5701_v8 = vpop.eup %5700  ;;  %v3854_v40 = vmul.f32 %v7111_v30, %v3838_v23  ;;  %v3919_v46 = vmul.f32 %v3903_v17, %v7102_v33  ;;  %v4012_v41 = vsub.f32 0.0, %v3980_v5  ;;  %v3883_v56 = vmul.f32 %v7073_v18, %v3867_v42 }
 0xe06   : > { %v4013_v6 = vsub.f32 0.0, %v3981_v4  ;;  %v3888_v0 = vmul.f32 %v7105_v50, %v3872_v16  ;;  %v3791_v10 = vmul.f32 %v7129_v52, %v3775_v49  ;;  %v4057_v1 = vmul.f32 %v4041_v54, %v3657_v20 }
 0xe07   : > { %v3870_v43 = vadd.f32 0.2548296, %v3854_v40  ;;  %v4010_v34 = vsub.f32 0.0, %v3978_v24  ;;  %v3949_v21 = vmul.f32 1.442695, %v3919_v46  ;;  %v4028_v28 = vsel %vm3996_vm2, %v4012_v41, %v3980_v5 }
 0xe08   : > { %v4029_v44 = vsel %vm3997_vm15, %v4013_v6, %v3981_v4  ;;  %v3968_v32 = vmul.f32 %v5701_v8, %v3888_v0  ;;  %v3807_v9 = vadd.f32 1.4214138, %v3791_v10  ;;  %vm3994_vm3 = vcmp.lt.f32.partialorder %v7021_v37, 0.0 }
 0xe09   : > { %v4045_v39 = vadd.f32 1.0, %v4029_v44  ;;  %v5703_v31 = vpop.eup %5702  ;;  %v3886_v22 = vmul.f32 %v7111_v30, %v3870_v43  ;;  %vm4000_vm4 = vcmp.lt.f32.partialorder %v7067_v35, 0.0  ;;  %v4026_v62 = vsel %vm3994_vm3, %v4010_v34, %v3978_v24 }
 0xe0a   : > { %v5705_v59 = vpop.eup %5704  ;;  %v3963_v18 = vmul.f32 %v5703_v31, %v3883_v56  ;;  %v3984_v38 = vsub.f32 1.0, %v3968_v32  ;;  %v3823_v50 = vmul.f32 %v7129_v52, %v3807_v9  ;;  %5706 = vpow2.f32 %v3949_v21 }
 0xe0b   : > { %v4061_v55 = vmul.f32 %v4045_v39, %v3661_v48  ;;  %v3966_v29 = vmul.f32 %v5705_v59, %v3886_v22  ;;  %v4044_v48 = vadd.f32 1.0, %v4028_v28  ;;  %v3660_v58 = vmul.f32 0.5, %v6992_v57 }
 0xe0c   : > { %v4016_v7 = vsub.f32 0.0, %v3984_v38  ;;  %v3839_v20 = vadd.f32 -0.28449672, %v3823_v50  ;;  %v3979_v30 = vsub.f32 1.0, %v3963_v18  ;;  %v3664_v63 = vmul.f32 0.5, %v7057_v61 }
 0xe0d   : > { %v4069_v33 = vpack.c.bf16 %v4061_v55, %v4057_v1  ;;  %v3982_v25 = vsub.f32 1.0, %v3966_v29  ;;  %v4042_v12 = vadd.f32 1.0, %v4026_v62  ;;  %vm3998_vm5 = vcmp.lt.f32.partialorder %v7071_v11, 0.0 }
 0xe0e   : > { %v4032_v51 = vsel %vm4000_vm4, %v4016_v7, %v3984_v38  ;;  %v3855_v4 = vmul.f32 %v7129_v52, %v3839_v20  ;;  %v4060_v35 = vmul.f32 %v4044_v48, %v3660_v58  ;;  %v3658_v17 = vmul.f32 0.5, %v7011_v19 }
 0xe0f   : > { %4342 = vmatmul.bf16.gmra.mxu1 %v4069_v33  ;;  %v4048_v5 = vadd.f32 1.0, %v4032_v51  ;;  %v4014_v3 = vsub.f32 0.0, %v3982_v25  ;;  %v4011_v27 = vsub.f32 0.0, %v3979_v30  ;;  %v3662_v14 = vmul.f32 0.5, %v7060_v47 }
 0xe10   : > { %v3871_v37 = vadd.f32 0.2548296, %v3855_v4  ;;  %v5707_v57 = vpop.eup %5706  ;;  %v4058_v61 = vmul.f32 %v4042_v12, %v3658_v17  ;;  %vm3995_vm6 = vcmp.lt.f32.partialorder %v7029_v53, 0.0  ;;  %vm3999_vm7 = vcmp.lt.f32.partialorder %v7095_v26, 0.0  ;;  %v5489_v26 = vld [vmem:[%s886_s6] ss:$0 sm:$0xff] }
 0xe11   : > { %v4064_v42 = vmul.f32 %v4048_v5, %v3664_v63  ;;  %v4030_v6 = vsel %vm3998_vm5, %v4014_v3, %v3982_v25  ;;  %v4027_v11 = vsel %vm3995_vm6, %v4011_v27, %v3979_v30  ;;  %v3663_v40 = vmul.f32 0.5, %v7081_v36  ;;  %s7249_s6 = sld [smem:[#allocation8_spill]] }
 0xe12   : > { %v4046_v54 = vadd.f32 1.0, %v4030_v6  ;;  %v3887_v23 = vmul.f32 %v7129_v52, %v3871_v37  ;;  %v4043_v39 = vadd.f32 1.0, %v4027_v11  ;;  %v3659_v52 = vmul.f32 0.5, %v7018_v60 }
 0xe13   : > { %v4072_v44 = vpack.c.bf16 %v4064_v42, %v4060_v35 }
 0xe14   : > { %v4062_v16 = vmul.f32 %v4046_v54, %v3662_v14  ;;  %v3967_v49 = vmul.f32 %v5707_v57, %v3887_v23  ;;  %v4059_v41 = vmul.f32 %v4043_v39, %v3659_v52 }
 0xe15   : > { %4399 = vmatmul.bf16.gmra.mxu0 %v4072_v44 }
 0xe16   : > { %v3983_v8 = vsub.f32 1.0, %v3967_v49  ;;  %v4070_v24 = vpack.c.bf16 %v4062_v16, %v4058_v61 }
 0xe17   : > { %p5277_p6 = scmp.ne.s32.totalorder %s7249_s6, 1 }
 0xe18   : > { %v4015_v19 = vsub.f32 0.0, %v3983_v8  ;;  %4361 = vmatmul.bf16.gmra.mxu2 %v4070_v24 }
 0xe1a   : > { %v4031_v47 = vsel %vm3999_vm7, %v4015_v19, %v3983_v8 }
 0xe1b   : > { %v4047_v46 = vadd.f32 1.0, %v4031_v47 }
 0xe1d   : > { %v4063_v56 = vmul.f32 %v4047_v46, %v3663_v40 }
 0xe1f   : > { %v4071_v0 = vpack.c.bf16 %v4063_v56, %v4059_v41 }
 0xe21   : > { %4380 = vmatmul.bf16.gmra.mxu3 %v4071_v0 }
 0xe57   : > { %v4338_v53 = vpop.f32.mrf.mxu1 }
 0xe58   : > { %v4395_v55 = vpop.f32.mrf.mxu0 }
 0xe5f   : > { %v4340_v31 = vpop.f32.mrf.mxu1 }
 0xe60   : > { %v4397_v59 = vpop.f32.mrf.mxu0 }
 0xe69   : > { %v4357_v10 = vpop.f32.mrf.mxu2 }
 0xe6a   : > { %v4358_v1 = vadd.f32 %v4357_v10, %v4338_v53 }
 0xe6e   : > { %v4376_v43 = vpop.f32.mrf.mxu3 }
 0xe6f   : > { %v4377_v32 = vadd.f32 %v4376_v43, %v4358_v1 }
 0xe71   : > { %v4396_v9 = vadd.f32 %v4395_v55, %v4377_v32  ;;  %v4359_v60 = vpop.f32.mrf.mxu2 }
 0xe72   : > { %v4360_v34 = vadd.f32 %v4359_v60, %v4340_v31 }
 0xe73   : > { %v4405_v36 = vadd.f32 %v4396_v9, %v6672_v15 }
 0xe75   : > { %v4413_v22 = vadd.f32 %v5489_v26, %v4405_v36 }
 0xe76   : > { %v4378_v21 = vpop.f32.mrf.mxu3 }
 0xe77   : > { %4417 = vst [vmem:[#allocation2 + $0x10] sm:$0xff] %v4413_v22  ;;  %v4379_v33 = vadd.f32 %v4378_v21, %v4360_v34 }
 0xe79   : > { %v4398_v28 = vadd.f32 %v4397_v59, %v4379_v33 }
 0xe7b   : > { %v4406_v18 = vadd.f32 %v4398_v28, %v6676_v2 }
 0xe7d   : > { %v4414_v38 = vadd.f32 %v5489_v26, %v4406_v18 }
 0xe7f   : > { %4418 = vst [vmem:[#allocation2] sm:$0xff] %v4414_v38 }
 0xe8c   : > { %v4343_v29 = vpop.f32.mrf.mxu1 }
 0xe92   : > { %v4400_v20 = vpop.f32.mrf.mxu0 }
 0xe94   : > { %v4345_v15 = vpop.f32.mrf.mxu1 }
 0xe9a   : > { %v4402_v3 = vpop.f32.mrf.mxu0 }
 0xe9b   : > { %v4362_v50 = vpop.f32.mrf.mxu2 }
 0xe9c   : > { %v4363_v7 = vadd.f32 %v4362_v50, %v4343_v29 }
 0xea3   : > { %v4364_v25 = vpop.f32.mrf.mxu2 }
 0xea4   : > { %v4381_v48 = vpop.f32.mrf.mxu3  ;;  %v4365_v4 = vadd.f32 %v4364_v25, %v4345_v15 }
 0xea5   : > { %v4382_v62 = vadd.f32 %v4381_v48, %v4363_v7 }
 0xea7   : > { %v4401_v30 = vadd.f32 %v4400_v20, %v4382_v62 }
 0xea9   : > { %v4407_v51 = vadd.f32 %v4401_v30, %v6680_v13 }
 0xeab   : > { %v4415_v58 = vadd.f32 %v5489_v26, %v4407_v51 }
 0xeac   : > { %v4383_v63 = vpop.f32.mrf.mxu3 }
 0xead   : > { %4419 = vst [vmem:[#allocation2 + $0x18] sm:$0xff] %v4415_v58  ;;  %v4384_v5 = vadd.f32 %v4383_v63, %v4365_v4 }
 0xeaf   : > { %v4403_v2 = vadd.f32 %v4402_v3, %v4384_v5 }
 0xeb1   : > { %v4408_v12 = vadd.f32 %v4403_v2, %v6684_v45  ;;  %4424 = sbr.rel (%p5277_p6) target bundleno = 3770 (0xeba), region = 100 }
 0xeb3   : > { %v4416_v37 = vadd.f32 %v5489_v26, %v4408_v12 }
 0xeb5   : > { %4420 = vst [vmem:[#allocation2 + $0x8] sm:$0xff] %v4416_v37 }
 0xeb6   : > { %4425 = vst [vmem:[#allocation5] sm:$0xff] %v4413_v22 }
 0xeb7   : > { %4426 = vst [vmem:[#allocation5 + $0x8] sm:$0xff] %v4414_v38 }
 0xeb8   : > { %4427 = vst [vmem:[#allocation5 + $0x10] sm:$0xff] %v4415_v58 }
 0xeb9   : > { %4428 = vst [vmem:[#allocation5 + $0x18] sm:$0xff] %v4416_v37 }
 0xeba PF: > { %s7250_s19 = sld [smem:[#allocation10_spill]]  ;;  %s5773_s3 = smov [#allocation5]  }
 0xebb   : > { %s7252_s23 = sld [smem:[#allocation27_spill]]  ;;  %s4438_s22 = sshll.u32 %s5773_s3, 4  ;;  %s4439_s22 = int_to_ptr.vmem [resolvable:$true] %s4438_s22 }
 0xebc   : > { %s5774_s28 = smov 128   ;;  %s5775_s10 = smov 8  }
 0xec0   : > { %s7251_s17 = sadd.s32 4294967295, %s7250_s19  }
 0xec1   : > { %p5440_p7 = scmp.eq.s32.totalorder %s7251_s17, 1  ;;  %s4440_s8 = sshll.u32 %s7252_s23, 4  ;;  %s4441_s8 = int_to_ptr.hbm [resolvable:$true] %s4440_s8 }
 0xec3   : > { %5437 = dma.vmem_to_hbm [thread:$0]  (%p5440_p7), %s4439_s22, 512, %s4441_s8, [#allocation6], %s5774_s28, %s5774_s28, %s5775_s10  }
 0xec4   : > { %5753 = dma.done.wait (%p5440_p7), [#allocation6], 512  }
 0xec5   : > { %5755 = vsyncadd (%p5440_p7), [#allocation6], 4294966784 }
 0xec6 PF: > { %s7253_s18 = sld [smem:[#allocation10_spill]] }
 0xec7   : > { %s7254_s27 = sld [smem:[#allocation9_spill]] }
 0xec8   : > { %s7255_s28 = sld [smem:[#allocation11_spill]] }
 0xecc   : > { %s29_s29 = sadd.s32 1, %s7253_s18  }
 0xecd   : > { %p26_p8 = scmp.ge.s32.totalorder %s29_s29, 4  }
 0xecf   :  { %28 = sbr.rel (!%p26_p8) target bundleno = 18 (0x12), region = 179 }
 0xed4   :  { %4457 = vsyncpa [#allocation6], 1 }
 0xed5   :  { %4459 = vsyncpa [#allocation6 + $0x1], 1 }

</bundles_post_ra>
